<compile_context>
chip_gen: v6e
topology: v6e:2x2x1
jax: 0.10.0
libtpu: 0.0.40
codegen_flags: <defaults>
</compile_context>

<pallas_src>
import functools

import numpy as np
import jax
import jax.numpy as jnp
from jax import lax
from jax.experimental import pallas as pl
from jax.experimental.pallas import tpu as pltpu


# ----------------------------------------------------------------------------
# Compiler params
# ----------------------------------------------------------------------------
def _cparams(*sem):
    # Explicit VMEM budget (review item): blocks here are KB-scale; the limit
    # leaves headroom below v7x's 64 MiB physical VMEM.
    return pltpu.CompilerParams(dimension_semantics=sem,
                                vmem_limit_bytes=48 * 1024 * 1024)


_PAR1 = _cparams("parallel")
_SEQ1 = _cparams("arbitrary")


def _wspec(shape):
    """Whole-array (grid-invariant) BlockSpec for small weight operands."""
    return pl.BlockSpec(shape, lambda b: (0,) * len(shape))


# ----------------------------------------------------------------------------
# In-kernel helpers (channel-major (C, T) f32 slabs, tokens on lanes)
# ----------------------------------------------------------------------------
def _ln_channels(x, w, b):
    """LayerNorm over channels (axis 0) of a (C, T) slab.  w, b: (C, 1)."""
    mean = jnp.mean(x, axis=0, keepdims=True)
    xc = x - mean
    var = jnp.mean(xc * xc, axis=0, keepdims=True)
    return xc * lax.rsqrt(var + 1e-5) * w + b


def _ffn_cm(xin, w1, b1, dw, db, w2, b2, *, H, W, HW_img):
    """FFN: 1x1 -> depthwise3x3(zero pad 1) -> ReLU -> 1x1 on a (Cin, T) slab.

    T is a multiple of HW_img = H*W (one or more images laid out contiguously
    along the lane axis).  The depthwise conv is 9 lane rolls (XLU) + boundary
    masks (VPU selects); no padded buffers, no shifted-slice copies.
    The 1x1 convs are tiny jnp.dot matmuls (MXU is otherwise idle; <2% of a
    tile, so the pad/push/drain cost is negligible).
    """
    Chid = w1.shape[0]
    T = xin.shape[1]
    h = jnp.dot(w1, xin, preferred_element_type=jnp.float32) + b1      # (Chid, T)

    lane = lax.broadcasted_iota(jnp.int32, (Chid, T), 1)
    r = lane % HW_img            # token position within its image
    col = lane % W               # column within its row

    acc = jnp.zeros((Chid, T), jnp.float32) + db
    for dy in (-1, 0, 1):
        for dx in (-1, 0, 1):
            s = dy * W + dx
            tap = (dy + 1) * 3 + (dx + 1)
            shifted = h if s == 0 else pltpu.roll(h, shift=(-s) % T, axis=1)
            term = shifted * dw[:, tap:tap + 1]
            valid = None
            if dy == -1:
                valid = r >= W
            elif dy == 1:
                valid = r < (H - 1) * W
            if dx == -1:
                vx = col >= 1
                valid = vx if valid is None else jnp.logical_and(valid, vx)
            elif dx == 1:
                vx = col <= W - 2
                valid = vx if valid is None else jnp.logical_and(valid, vx)
            if valid is not None:
                term = jnp.where(valid, term, 0.0)
            acc = acc + term
    acc = jnp.maximum(acc, 0.0)                                        # ReLU
    return jnp.dot(w2, acc, preferred_element_type=jnp.float32) + b2   # (Cout, T)


# ----------------------------------------------------------------------------
# Pallas kernels
# ----------------------------------------------------------------------------
def _estimator_in_kernel(x_ref, wa_ref, wb_ref, b_ref, o_ref):
    # IlluminationEstimator front: channel-mean + concat + Conv2d(4,12,1), fused.
    x = x_ref[0].astype(jnp.float32)                     # (3, HW)
    mean_c = jnp.mean(x, axis=0, keepdims=True)          # (1, HW)
    y = (jnp.dot(wa_ref[...], x, preferred_element_type=jnp.float32)
         + wb_ref[...] * mean_c + b_ref[...])            # (12, HW)
    o_ref[0] = y.astype(o_ref.dtype)


def _estimator_out_kernel(fea_ref, x_ref, w_ref, b_ref, o_ref):
    # illu_map = Conv2d(12,3,1)(illu_fea);  out = x * illu_map + x (retinex).
    fea = fea_ref[0].astype(jnp.float32)                 # (12, HW)
    x = x_ref[0].astype(jnp.float32)                     # (3, HW)
    illu_map = (jnp.dot(w_ref[...], fea, preferred_element_type=jnp.float32)
                + b_ref[...])
    o_ref[0] = (x * illu_map + x).astype(o_ref.dtype)


def _ln_vproj_kernel(x_ref, lnw_ref, lnb_ref, vw_ref, vb_ref, illu_ref,
                     xn_ref, v_ref):
    # TransformerBlock: norm1(x)  and  v = v_proj(norm1(x)) * illu_fea, fused.
    x = x_ref[0].astype(jnp.float32)                     # (C, HW)
    xn = _ln_channels(x, lnw_ref[...], lnb_ref[...])
    v = (jnp.dot(vw_ref[...], xn, preferred_element_type=jnp.float32)
         + vb_ref[...]) * illu_ref[0].astype(jnp.float32)
    xn_ref[0] = xn.astype(xn_ref.dtype)
    v_ref[0] = v.astype(v_ref.dtype)


def _ln_ffn_slab_kernel(x_ref, lnw_ref, lnb_ref, w1_ref, b1_ref, dw_ref,
                        db_ref, w2_ref, b2_ref, o_ref, *, H, W, add_residual):
    # LayerNorm -> FFN (+ optional residual) on a (C, B*H*W) slab.
    x = x_ref[...].astype(jnp.float32)
    h = _ln_channels(x, lnw_ref[...], lnb_ref[...])
    y = _ffn_cm(h, w1_ref[...], b1_ref[...], dw_ref[...], db_ref[...],
                w2_ref[...], b2_ref[...], H=H, W=W, HW_img=H * W)
    if add_residual:
        y = y + x
    o_ref[...] = y.astype(o_ref.dtype)


def _tail_kernel(x_ref,
                 co_lnw, co_lnb, co_w1, co_b1, co_dw, co_db, co_w2, co_b2,
                 n1w, n1b, qw_ref, qb_ref, kt_ref, vbasis_ref,
                 n2w, n2b, rp_w1, rp_b1, rp_dw, rp_db, rp_w2, rp_b2,
                 o_ref, *, H, W):
    # Fused per-image tail: conv_out(LN+FFN) -> norm1 -> q(1x1) -> L2-normalize
    # over spatial -> relu(k_n^T . q_n) -> v . a -> norm2 -> reproj FFN.
    HW = H * W
    x = x_ref[0].astype(jnp.float32)                     # (15, HW)

    # encoder conv_out: LayerNorm(15) + FFN(15 -> 15 -> 15)
    h = _ln_channels(x, co_lnw[...], co_lnb[...])
    x = _ffn_cm(h, co_w1[...], co_b1[...], co_dw[...], co_db[...],
                co_w2[...], co_b2[...], H=H, W=W, HW_img=HW)

    # norm1 + q projection + basis attention.
    h = _ln_channels(x, n1w[...], n1b[...])
    q = (jnp.dot(qw_ref[...], h, preferred_element_type=jnp.float32)
         + qb_ref[...])                                  # (15, HW)
    # torch: q -> (B, C, HW); F.normalize(q, dim=-1) == L2 norm over the
    # SPATIAL axis per channel row (a lane-axis reduction here).
    ssum = jnp.sum(q * q, axis=1, keepdims=True)         # (15, 1)
    qn = q * lax.rsqrt(jnp.maximum(ssum, 1e-24))         # == q / max(||q||, 1e-12)
    a = jnp.dot(kt_ref[...], qn, preferred_element_type=jnp.float32)     # (30, HW)
    a = jnp.maximum(a, 0.0)
    y = jnp.dot(vbasis_ref[...], a, preferred_element_type=jnp.float32)  # (15, HW)

    # norm2 + reproj FFN(15 -> 15 -> 3)
    h = _ln_channels(y, n2w[...], n2b[...])
    out = _ffn_cm(h, rp_w1[...], rp_b1[...], rp_dw[...], rp_db[...],
                  rp_w2[...], rp_b2[...], H=H, W=W, HW_img=HW)
    o_ref[0] = out.astype(o_ref.dtype)


# ----------------------------------------------------------------------------
# Pallas wrappers
# ----------------------------------------------------------------------------
def estimator_in(x, conv1_p):
    B, Cin, H, W = x.shape
    HW = H * W
    Cout = conv1_p["w"].shape[0]
    wm = conv1_p["w"].reshape(Cout, Cin + 1)             # [img cols | mean col]
    out = pl.pallas_call(
        _estimator_in_kernel,
        out_shape=jax.ShapeDtypeStruct((B, Cout, HW), x.dtype),
        grid=(B,),
        in_specs=[
            pl.BlockSpec((1, Cin, HW), lambda b: (b, 0, 0)),
            _wspec((Cout, Cin)),
            _wspec((Cout, 1)),
            _wspec((Cout, 1)),
        ],
        out_specs=pl.BlockSpec((1, Cout, HW), lambda b: (b, 0, 0)),
        compiler_params=_PAR1,
    )(x.reshape(B, Cin, HW), wm[:, :Cin], wm[:, Cin:Cin + 1],
      conv1_p["b"].reshape(Cout, 1))
    return out.reshape(B, Cout, H, W)


def estimator_out(illu_fea, x, conv2_p):
    B, Cf, H, W = illu_fea.shape
    Cx = x.shape[1]
    HW = H * W
    Cm = conv2_p["w"].shape[0]
    out = pl.pallas_call(
        _estimator_out_kernel,
        out_shape=jax.ShapeDtypeStruct((B, Cx, HW), x.dtype),
        grid=(B,),
        in_specs=[
            pl.BlockSpec((1, Cf, HW), lambda b: (b, 0, 0)),
            pl.BlockSpec((1, Cx, HW), lambda b: (b, 0, 0)),
            _wspec((Cm, Cf)),
            _wspec((Cm, 1)),
        ],
        out_specs=pl.BlockSpec((1, Cx, HW), lambda b: (b, 0, 0)),
        compiler_params=_PAR1,
    )(illu_fea.reshape(B, Cf, HW), x.reshape(B, Cx, HW),
      conv2_p["w"].reshape(Cm, Cf), conv2_p["b"].reshape(Cm, 1))
    return out.reshape(B, Cx, H, W)


def ln_vproj(x, illu, ln_p, v_p):
    B, C, H2, W2 = x.shape
    HW = H2 * W2
    xn, v = pl.pallas_call(
        _ln_vproj_kernel,
        out_shape=(jax.ShapeDtypeStruct((B, C, HW), x.dtype),
                   jax.ShapeDtypeStruct((B, C, HW), x.dtype)),
        grid=(B,),
        in_specs=[
            pl.BlockSpec((1, C, HW), lambda b: (b, 0, 0)),
            _wspec((C, 1)), _wspec((C, 1)),
            _wspec((C, C)), _wspec((C, 1)),
            pl.BlockSpec((1, C, HW), lambda b: (b, 0, 0)),
        ],
        out_specs=(pl.BlockSpec((1, C, HW), lambda b: (b, 0, 0)),
                   pl.BlockSpec((1, C, HW), lambda b: (b, 0, 0))),
        compiler_params=_PAR1,
    )(x.reshape(B, C, HW), ln_p["w"].reshape(C, 1), ln_p["b"].reshape(C, 1),
      v_p["w"].reshape(C, C), v_p["b"].reshape(C, 1), illu.reshape(B, C, HW))
    return xn.reshape(B, C, H2, W2), v.reshape(B, C, H2, W2)


def ln_ffn_slab(x, ln_p, ffn_p, add_residual=False):
    # x: (B, C, H, W).  Batch is folded into the lane (token) axis so the
    # half-resolution token count (B * H/2 * W/2) stays a multiple of 128 and
    # the lane rolls / stores remain on the lane-dense fast path.
    B, Cin, H, W = x.shape
    Chid = ffn_p["pw1"]["w"].shape[0]
    Cout = ffn_p["pw2"]["w"].shape[0]
    if add_residual:
        assert Cin == Cout, "residual add requires Cin == Cout"
    T = B * H * W
    xs = jnp.transpose(x, (1, 0, 2, 3)).reshape(Cin, T)
    kern = functools.partial(_ln_ffn_slab_kernel, H=H, W=W,
                             add_residual=add_residual)
    out = pl.pallas_call(
        kern,
        out_shape=jax.ShapeDtypeStruct((Cout, T), x.dtype),
        grid=(1,),
        in_specs=[
            _wspec((Cin, T)),
            _wspec((Cin, 1)), _wspec((Cin, 1)),
            _wspec((Chid, Cin)), _wspec((Chid, 1)),
            _wspec((Chid, 9)), _wspec((Chid, 1)),
            _wspec((Cout, Chid)), _wspec((Cout, 1)),
        ],
        out_specs=_wspec((Cout, T)),
        compiler_params=_SEQ1,
    )(xs, ln_p["w"].reshape(Cin, 1), ln_p["b"].reshape(Cin, 1),
      ffn_p["pw1"]["w"].reshape(Chid, Cin), ffn_p["pw1"]["b"].reshape(Chid, 1),
      ffn_p["dw"]["w"].reshape(Chid, 9), ffn_p["dw"]["b"].reshape(Chid, 1),
      ffn_p["pw2"]["w"].reshape(Cout, Chid), ffn_p["pw2"]["b"].reshape(Cout, 1))
    return jnp.transpose(out.reshape(Cout, B, H, W), (1, 0, 2, 3))


def tail(x, p):
    # x = cat([retinex x, upsampled transformer out]) : (B, 15, H, W)
    B, MID, H, W = x.shape
    HW = H * W
    co_ln = p["encoder"]["conv_out_ln"]
    co = p["encoder"]["conv_out_ffn"]
    rp = p["reproj"]
    Chid = co["pw1"]["w"].shape[0]
    Rhid = rp["pw1"]["w"].shape[0]
    Cout = rp["pw2"]["w"].shape[0]

    # Tiny basis k/v projections (Conv1d(15,15,1) on a 15x30 basis): plain jnp.
    basis = p["basis"][0]                                       # (MID, N)
    k = jnp.dot(p["k"]["w"].reshape(MID, MID), basis) + p["k"]["b"][:, None]
    v = jnp.dot(p["v"]["w"].reshape(MID, MID), basis) + p["v"]["b"][:, None]
    k_n = k / jnp.maximum(jnp.sqrt(jnp.sum(k * k, axis=-1, keepdims=True)), 1e-12)
    kt = k_n.T                                                  # (N, MID)
    N = kt.shape[0]

    kern = functools.partial(_tail_kernel, H=H, W=W)
    out = pl.pallas_call(
        kern,
        out_shape=jax.ShapeDtypeStruct((B, Cout, HW), x.dtype),
        grid=(B,),
        in_specs=[
            pl.BlockSpec((1, MID, HW), lambda b: (b, 0, 0)),
            _wspec((MID, 1)), _wspec((MID, 1)),                 # conv_out LN
            _wspec((Chid, MID)), _wspec((Chid, 1)),             # conv_out pw1
            _wspec((Chid, 9)), _wspec((Chid, 1)),               # conv_out dw
            _wspec((MID, Chid)), _wspec((MID, 1)),              # conv_out pw2
            _wspec((MID, 1)), _wspec((MID, 1)),                 # norm1
            _wspec((MID, MID)), _wspec((MID, 1)),               # q
            _wspec((N, MID)),                                   # k^T (normalized)
            _wspec((MID, N)),                                   # v basis
            _wspec((MID, 1)), _wspec((MID, 1)),                 # norm2
            _wspec((Rhid, MID)), _wspec((Rhid, 1)),             # reproj pw1
            _wspec((Rhid, 9)), _wspec((Rhid, 1)),               # reproj dw
            _wspec((Cout, Rhid)), _wspec((Cout, 1)),            # reproj pw2
        ],
        out_specs=pl.BlockSpec((1, Cout, HW), lambda b: (b, 0, 0)),
        compiler_params=_PAR1,
    )(x.reshape(B, MID, HW),
      co_ln["w"].reshape(MID, 1), co_ln["b"].reshape(MID, 1),
      co["pw1"]["w"].reshape(Chid, MID), co["pw1"]["b"].reshape(Chid, 1),
      co["dw"]["w"].reshape(Chid, 9), co["dw"]["b"].reshape(Chid, 1),
      co["pw2"]["w"].reshape(MID, Chid), co["pw2"]["b"].reshape(MID, 1),
      p["norm1"]["w"].reshape(MID, 1), p["norm1"]["b"].reshape(MID, 1),
      p["q"]["w"].reshape(MID, MID), p["q"]["b"].reshape(MID, 1),
      kt, v,
      p["norm2"]["w"].reshape(MID, 1), p["norm2"]["b"].reshape(MID, 1),
      rp["pw1"]["w"].reshape(Rhid, MID), rp["pw1"]["b"].reshape(Rhid, 1),
      rp["dw"]["w"].reshape(Rhid, 9), rp["dw"]["b"].reshape(Rhid, 1),
      rp["pw2"]["w"].reshape(Cout, Rhid), rp["pw2"]["b"].reshape(Cout, 1))
    return out.reshape(B, Cout, H, W)


# ----------------------------------------------------------------------------
# Plain-JAX glue (NCHW convs, DWT, pooling, upsample, tiny channel attention)
# ----------------------------------------------------------------------------
def conv2d_nchw(x, w, b, stride=1, padding=0, groups=1, pad_mode="zeros"):
    if padding > 0 and pad_mode == "reflect":
        x = jnp.pad(x, ((0, 0), (0, 0), (padding, padding), (padding, padding)),
                    mode="reflect")
        pad_cfg = "VALID"
    else:
        pad_cfg = [(padding, padding), (padding, padding)]
    y = lax.conv_general_dilated(
        x, w, window_strides=(stride, stride), padding=pad_cfg,
        dimension_numbers=("NCHW", "OIHW", "NCHW"), feature_group_count=groups)
    return y + b[None, :, None, None]


def conv1x1_nchw(x, w, b):
    Cout, Cin = w.shape[0], w.shape[1]
    return (jnp.einsum("oc,bchw->bohw", w.reshape(Cout, Cin), x)
            + b[None, :, None, None])


def dwt_forward_nchw(x):
    # TODO(synk): DWTForward is not defined in the reference snippet; using the
    # standard Haar DWT (LL,HL,LH,HH channel concat, 2x spatial downsample).
    x01 = x[:, :, 0::2, :] / 2.0
    x02 = x[:, :, 1::2, :] / 2.0
    x1 = x01[:, :, :, 0::2]
    x2 = x02[:, :, :, 0::2]
    x3 = x01[:, :, :, 1::2]
    x4 = x02[:, :, :, 1::2]
    ll = x1 + x2 + x3 + x4
    hl = -x1 - x2 + x3 + x4
    lh = -x1 + x2 - x3 + x4
    hh = x1 - x2 - x3 + x4
    return jnp.concatenate([ll, hl, lh, hh], axis=1)


def avgpool2_nchw(x):
    B, C, H, W = x.shape
    return x.reshape(B, C, H // 2, 2, W // 2, 2).mean(axis=(3, 5))


def upsample2_nchw(x):
    B, C, H, W = x.shape
    return jax.image.resize(x, (B, C, 2 * H, 2 * W), method="bilinear")


def _l2n(x, axis=-1, eps=1e-12):
    n = jnp.sqrt(jnp.sum(x * x, axis=axis, keepdims=True))
    return x / jnp.maximum(n, eps)


def channel_attention_tail(xn, v, p, num_heads=3):
    # xn = norm1(x); v = v_proj(xn) * illu_fea (both from the fused Pallas call).
    B, C, H2, W2 = xn.shape
    q = conv2d_nchw(xn, p["q_proj"]["w"], p["q_proj"]["b"], stride=2, padding=1,
                    groups=C, pad_mode="reflect")
    k = conv2d_nchw(xn, p["k_proj"]["w"], p["k_proj"]["b"], stride=2, padding=1,
                    groups=1, pad_mode="reflect")
    a = conv2d_nchw(xn, p["a_proj0"]["w"], p["a_proj0"]["b"], stride=2, padding=1,
                    groups=C, pad_mode="reflect")
    a = conv1x1_nchw(a, p["a_proj1"]["w"], p["a_proj1"]["b"])

    def heads(t):
        b_, c_, h_, w_ = t.shape
        return t.reshape(b_, num_heads, c_ // num_heads, h_ * w_)

    qh, kh, vh, ah = heads(q), heads(k), heads(v), heads(a)
    qh, kh, ah = _l2n(qh), _l2n(kh), _l2n(ah)
    attn_a = jax.nn.softmax(
        jnp.matmul(qh, jnp.swapaxes(ah, -1, -2)) * p["temp_a"][None], axis=-1)
    attn_k = jax.nn.softmax(
        jnp.matmul(ah, jnp.swapaxes(kh, -1, -2)) * p["temp_v"][None], axis=-1)
    out = jnp.matmul(attn_a, jnp.matmul(attn_k, vh))       # (B, head, C/head, HW)
    out = out.reshape(B, C, H2, W2)
    return conv1x1_nchw(out, p["project_out"]["w"], p["project_out"]["b"])


def transformer_block(x, illu_ds, p):
    xn, v = ln_vproj(x, illu_ds, p["norm1"], p["attn"]["v_proj"])
    x = x + channel_attention_tail(xn, v, p["attn"])
    x = ln_ffn_slab(x, p["norm2"], p["ffn"], add_residual=True)
    return x


def light_generator_layer(x, p):
    # x: (B, 3, H, W), NCHW end-to-end (channel-major == lane-dense token axis).
    enc = p["encoder"]
    # Illumination estimator (mean+concat+1x1 and 1x1+retinex fused in Pallas).
    x1 = estimator_in(x, enc["est"]["conv1"])                        # (B,12,H,W)
    illu_fea = conv2d_nchw(x1, enc["est"]["dw"]["w"], enc["est"]["dw"]["b"],
                           stride=1, padding=2, groups=4)
    xr = estimator_out(illu_fea, x, enc["est"]["conv2"])             # (B,3,H,W)
    # Wavelet downsample + transformer block at half resolution.
    xd = dwt_forward_nchw(xr)                                        # (B,12,H/2,W/2)
    illu_ds = conv1x1_nchw(avgpool2_nchw(illu_fea),
                           enc["illu_down"]["w"], enc["illu_down"]["b"])
    xt = transformer_block(xd, illu_ds, enc["trans"])
    xu = upsample2_nchw(xt)                                          # (B,12,H,W)
    xc = jnp.concatenate([xr, xu], axis=1)                           # (B,15,H,W)
    # conv_out + norm1/q/basis-attention + norm2/reproj fused into one kernel.
    # TODO(synk): for large H*W, add a token-grid with a 1-row halo to the fused
    # FFN kernels (v7x wants >=4 grid steps and has only 64 MiB VMEM); whole-
    # image blocks are used here because the demo images are tiny.
    return tail(xc, p)


# ----------------------------------------------------------------------------
# Deterministic parameter init (shapes mirror the PyTorch __init__, OIHW)
# ----------------------------------------------------------------------------
class KeyGen:
    def __init__(self, seed):
        self.key = jax.random.PRNGKey(seed)

    def __call__(self):
        self.key, sub = jax.random.split(self.key)
        return sub


def init_params(seed=0):
    kg = KeyGen(seed)

    def conv(cout, cin_per_group, kh, kw):
        fan_in = cin_per_group * kh * kw
        bound = 1.0 / float(np.sqrt(fan_in))
        return dict(
            w=jax.random.uniform(kg(), (cout, cin_per_group, kh, kw),
                                 jnp.float32, -bound, bound),
            b=jax.random.uniform(kg(), (cout,), jnp.float32, -bound, bound),
        )

    def ln(c):
        return dict(w=jnp.ones((c,), jnp.float32), b=jnp.zeros((c,), jnp.float32))

    def ffn(cin, chid, cout):
        return dict(pw1=conv(chid, cin, 1, 1),
                    dw=conv(chid, 1, 3, 3),
                    pw2=conv(cout, chid, 1, 1))

    MID = 15  # 3 + 12
    params = dict(
        encoder=dict(
            est=dict(conv1=conv(12, 4, 1, 1),      # Conv2d(4,12,1)
                     dw=conv(12, 3, 5, 5),         # Conv2d(12,12,5,groups=4)
                     conv2=conv(3, 12, 1, 1)),     # Conv2d(12,3,1)
            illu_down=conv(12, 12, 1, 1),
            trans=dict(
                norm1=ln(12), norm2=ln(12),
                attn=dict(temp_a=jnp.ones((3, 1, 1), jnp.float32),
                          temp_v=jnp.ones((3, 1, 1), jnp.float32),
                          q_proj=conv(12, 1, 3, 3),      # depthwise, stride 2
                          k_proj=conv(12, 12, 3, 3),     # dense, stride 2
                          v_proj=conv(12, 12, 1, 1),
                          a_proj0=conv(12, 1, 3, 3),
                          a_proj1=conv(6, 12, 1, 1),
                          project_out=conv(12, 12, 1, 1)),
                ffn=ffn(12, 12, 12)),
            conv_out_ln=ln(MID),
            conv_out_ffn=ffn(MID, MID, MID)),
        norm1=ln(MID),
        basis=jax.random.uniform(kg(), (1, MID, 30), jnp.float32, 0.0, 1.0),
        q=conv(MID, MID, 1, 1),
        k=conv(MID, MID, 1, 1),   # Conv1d(15,15,1) stored as [15,15,1,1]
        v=conv(MID, MID, 1, 1),
        norm2=ln(MID),
        reproj=ffn(MID, MID, 3),  # FFN(15, out_features=3)
    )
    return params


# ----------------------------------------------------------------------------
if __name__ == "__main__":
    B, C, H, W = 2, 3, 16, 16          # in_channels=3, out_channels=3
    params = init_params(0)
    x = jax.random.normal(jax.random.PRNGKey(0), (B, C, H, W), jnp.float32)

    fwd = jax.jit(light_generator_layer)
    out = jax.block_until_ready(fwd(x, params))

    assert out.shape == (B, 3, H, W), out.shape
    assert bool(jnp.all(jnp.isfinite(out)))
    print("KERNEL_OK")
</pallas_src>

<mosaic_0001>
module attributes {stable_mosaic.version = 11 : i64} {
  func.func @_estimator_in_kernel(%arg0: i32, %arg1: memref<1x3x256xf32, #tpu.memory_space<vmem>>, %arg2: memref<12x3xf32, #tpu.memory_space<vmem>>, %arg3: memref<12x1xf32, #tpu.memory_space<vmem>>, %arg4: memref<12x1xf32, #tpu.memory_space<vmem>>, %arg5: memref<1x12x256xf32, #tpu.memory_space<vmem>>) attributes {dimension_semantics = [#tpu.dimension_semantics<parallel>], iteration_bounds = array<i64: 2>, scalar_prefetch = 0 : i64, scratch_operands = 0 : i64, tpu.core_type = #tpu.core_type<tc>, window_params = [{transform_indices = @transform_0, window_bounds = array<i64: 1, 3, 256>}, {pipeline_mode = #tpu.pipeline_mode<synchronous>, transform_indices = @transform_1, window_bounds = array<i64: 12, 3>}, {pipeline_mode = #tpu.pipeline_mode<synchronous>, transform_indices = @transform_2, window_bounds = array<i64: 12, 1>}, {pipeline_mode = #tpu.pipeline_mode<synchronous>, transform_indices = @transform_3, window_bounds = array<i64: 12, 1>}, {transform_indices = @transform_4, window_bounds = array<i64: 1, 12, 256>}]} {
    %c0 = arith.constant 0 : index
    %c0_0 = arith.constant 0 : index
    %c0_1 = arith.constant 0 : index
    %0 = vector.load %arg1[%c0, %c0_0, %c0_1] : memref<1x3x256xf32, #tpu.memory_space<vmem>>, vector<1x3x256xf32>
    %1 = vector.shape_cast %0 : vector<1x3x256xf32> to vector<3x256xf32>
    %cst = arith.constant dense<0.000000e+00> : vector<256xf32>
    %2 = vector.multi_reduction <add>, %1, %cst [0] : vector<3x256xf32> to vector<256xf32>
    %3 = vector.shape_cast %2 : vector<256xf32> to vector<1x256xf32>
    %cst_2 = arith.constant 3.000000e+00 : f32
    %4 = vector.broadcast %cst_2 : f32 to vector<1x256xf32>
    %5 = arith.divf %3, %4 : vector<1x256xf32>
    %c0_3 = arith.constant 0 : index
    %c0_4 = arith.constant 0 : index
    %6 = vector.load %arg2[%c0_3, %c0_4] : memref<12x3xf32, #tpu.memory_space<vmem>>, vector<12x3xf32>
    %cst_5 = arith.constant dense<0.000000e+00> : vector<12x256xf32>
    %7 = tpu.matmul %6, %1, %cst_5 {dimension_numbers = #tpu.dot_dimension_numbers<[1], [0], [0], [1], [0, 0, 1, 1], [], []>} : vector<12x3xf32>, vector<3x256xf32>, vector<12x256xf32> -> vector<12x256xf32>
    %c0_6 = arith.constant 0 : index
    %c0_7 = arith.constant 0 : index
    %8 = vector.load %arg3[%c0_6, %c0_7] : memref<12x1xf32, #tpu.memory_space<vmem>>, vector<12x1xf32>
    %9 = vector.broadcast %8 : vector<12x1xf32> to vector<12x256xf32>
    %10 = vector.broadcast %5 : vector<1x256xf32> to vector<12x256xf32>
    %11 = arith.mulf %9, %10 : vector<12x256xf32>
    %12 = arith.addf %7, %11 : vector<12x256xf32>
    %c0_8 = arith.constant 0 : index
    %c0_9 = arith.constant 0 : index
    %13 = vector.load %arg4[%c0_8, %c0_9] : memref<12x1xf32, #tpu.memory_space<vmem>>, vector<12x1xf32>
    %14 = vector.broadcast %13 : vector<12x1xf32> to vector<12x256xf32>
    %15 = arith.addf %12, %14 : vector<12x256xf32>
    %c0_10 = arith.constant 0 : index
    %c0_11 = arith.constant 0 : index
    %c0_12 = arith.constant 0 : index
    %16 = vector.load %arg5[%c0_10, %c0_11, %c0_12] : memref<1x12x256xf32, #tpu.memory_space<vmem>>, vector<1x12x256xf32>
    %17 = vector.shape_cast %16 : vector<1x12x256xf32> to vector<12x256xf32>
    %18 = vector.shape_cast %15 : vector<12x256xf32> to vector<1x12x256xf32>
    tpu.vector_store %arg5[%c0_10, %c0_11, %c0_12], %18 {strides = array<i32>} : memref<1x12x256xf32, #tpu.memory_space<vmem>>, vector<1x12x256xf32>,
    return
  }
  func.func @transform_0(%arg0: i32) -> (i32, i32, i32) {
    %c0_i32 = arith.constant 0 : i32
    %c0_i32_0 = arith.constant 0 : i32
    %c0_i32_1 = arith.constant 0 : i32
    return %arg0, %c0_i32, %c0_i32_0 : i32, i32, i32
  }
  func.func @transform_1(%arg0: i32) -> (i32, i32) {
    %c0_i32 = arith.constant 0 : i32
    %c0_i32_0 = arith.constant 0 : i32
    %c0_i32_1 = arith.constant 0 : i32
    return %c0_i32, %c0_i32_0 : i32, i32
  }
  func.func @transform_2(%arg0: i32) -> (i32, i32) {
    %c0_i32 = arith.constant 0 : i32
    %c0_i32_0 = arith.constant 0 : i32
    %c0_i32_1 = arith.constant 0 : i32
    return %c0_i32, %c0_i32_0 : i32, i32
  }
  func.func @transform_3(%arg0: i32) -> (i32, i32) {
    %c0_i32 = arith.constant 0 : i32
    %c0_i32_0 = arith.constant 0 : i32
    %c0_i32_1 = arith.constant 0 : i32
    return %c0_i32, %c0_i32_0 : i32, i32
  }
  func.func @transform_4(%arg0: i32) -> (i32, i32, i32) {
    %c0_i32 = arith.constant 0 : i32
    %c0_i32_0 = arith.constant 0 : i32
    %c0_i32_1 = arith.constant 0 : i32
    return %arg0, %c0_i32, %c0_i32_0 : i32, i32, i32
  }
}

module attributes {stable_mosaic.version = 11 : i64} {
  func.func @_estimator_out_kernel(%arg0: i32, %arg1: memref<1x12x256xf32, #tpu.memory_space<vmem>>, %arg2: memref<1x3x256xf32, #tpu.memory_space<vmem>>, %arg3: memref<3x12xf32, #tpu.memory_space<vmem>>, %arg4: memref<3x1xf32, #tpu.memory_space<vmem>>, %arg5: memref<1x3x256xf32, #tpu.memory_space<vmem>>) attributes {dimension_semantics = [#tpu.dimension_semantics<parallel>], iteration_bounds = array<i64: 2>, scalar_prefetch = 0 : i64, scratch_operands = 0 : i64, tpu.core_type = #tpu.core_type<tc>, window_params = [{transform_indices = @transform_0, window_bounds = array<i64: 1, 12, 256>}, {transform_indices = @transform_1, window_bounds = array<i64: 1, 3, 256>}, {pipeline_mode = #tpu.pipeline_mode<synchronous>, transform_indices = @transform_2, window_bounds = array<i64: 3, 12>}, {pipeline_mode = #tpu.pipeline_mode<synchronous>, transform_indices = @transform_3, window_bounds = array<i64: 3, 1>}, {transform_indices = @transform_4, window_bounds = array<i64: 1, 3, 256>}]} {
    %c0 = arith.constant 0 : index
    %c0_0 = arith.constant 0 : index
    %c0_1 = arith.constant 0 : index
    %0 = vector.load %arg1[%c0, %c0_0, %c0_1] : memref<1x12x256xf32, #tpu.memory_space<vmem>>, vector<1x12x256xf32>
    %1 = vector.shape_cast %0 : vector<1x12x256xf32> to vector<12x256xf32>
    %c0_2 = arith.constant 0 : index
    %c0_3 = arith.constant 0 : index
    %c0_4 = arith.constant 0 : index
    %2 = vector.load %arg2[%c0_2, %c0_3, %c0_4] : memref<1x3x256xf32, #tpu.memory_space<vmem>>, vector<1x3x256xf32>
    %3 = vector.shape_cast %2 : vector<1x3x256xf32> to vector<3x256xf32>
    %c0_5 = arith.constant 0 : index
    %c0_6 = arith.constant 0 : index
    %4 = vector.load %arg3[%c0_5, %c0_6] : memref<3x12xf32, #tpu.memory_space<vmem>>, vector<3x12xf32>
    %cst = arith.constant dense<0.000000e+00> : vector<3x256xf32>
    %5 = tpu.matmul %4, %1, %cst {dimension_numbers = #tpu.dot_dimension_numbers<[1], [0], [0], [1], [0, 0, 1, 1], [], []>} : vector<3x12xf32>, vector<12x256xf32>, vector<3x256xf32> -> vector<3x256xf32>
    %c0_7 = arith.constant 0 : index
    %c0_8 = arith.constant 0 : index
    %6 = vector.load %arg4[%c0_7, %c0_8] : memref<3x1xf32, #tpu.memory_space<vmem>>, vector<3x1xf32>
    %7 = vector.broadcast %6 : vector<3x1xf32> to vector<3x256xf32>
    %8 = arith.addf %5, %7 : vector<3x256xf32>
    %9 = arith.mulf %3, %8 : vector<3x256xf32>
    %10 = arith.addf %9, %3 : vector<3x256xf32>
    %c0_9 = arith.constant 0 : index
    %c0_10 = arith.constant 0 : index
    %c0_11 = arith.constant 0 : index
    %11 = vector.load %arg5[%c0_9, %c0_10, %c0_11] : memref<1x3x256xf32, #tpu.memory_space<vmem>>, vector<1x3x256xf32>
    %12 = vector.shape_cast %11 : vector<1x3x256xf32> to vector<3x256xf32>
    %13 = vector.shape_cast %10 : vector<3x256xf32> to vector<1x3x256xf32>
    tpu.vector_store %arg5[%c0_9, %c0_10, %c0_11], %13 {strides = array<i32>} : memref<1x3x256xf32, #tpu.memory_space<vmem>>, vector<1x3x256xf32>,
    return
  }
  func.func @transform_0(%arg0: i32) -> (i32, i32, i32) {
    %c0_i32 = arith.constant 0 : i32
    %c0_i32_0 = arith.constant 0 : i32
    %c0_i32_1 = arith.constant 0 : i32
    return %arg0, %c0_i32, %c0_i32_0 : i32, i32, i32
  }
  func.func @transform_1(%arg0: i32) -> (i32, i32, i32) {
    %c0_i32 = arith.constant 0 : i32
    %c0_i32_0 = arith.constant 0 : i32
    %c0_i32_1 = arith.constant 0 : i32
    return %arg0, %c0_i32, %c0_i32_0 : i32, i32, i32
  }
  func.func @transform_2(%arg0: i32) -> (i32, i32) {
    %c0_i32 = arith.constant 0 : i32
    %c0_i32_0 = arith.constant 0 : i32
    %c0_i32_1 = arith.constant 0 : i32
    return %c0_i32, %c0_i32_0 : i32, i32
  }
  func.func @transform_3(%arg0: i32) -> (i32, i32) {
    %c0_i32 = arith.constant 0 : i32
    %c0_i32_0 = arith.constant 0 : i32
    %c0_i32_1 = arith.constant 0 : i32
    return %c0_i32, %c0_i32_0 : i32, i32
  }
  func.func @transform_4(%arg0: i32) -> (i32, i32, i32) {
    %c0_i32 = arith.constant 0 : i32
    %c0_i32_0 = arith.constant 0 : i32
    %c0_i32_1 = arith.constant 0 : i32
    return %arg0, %c0_i32, %c0_i32_0 : i32, i32, i32
  }
}

module attributes {stable_mosaic.version = 11 : i64} {
  func.func @_ln_vproj_kernel(%arg0: i32, %arg1: memref<1x12x64xf32, #tpu.memory_space<vmem>>, %arg2: memref<12x1xf32, #tpu.memory_space<vmem>>, %arg3: memref<12x1xf32, #tpu.memory_space<vmem>>, %arg4: memref<12x12xf32, #tpu.memory_space<vmem>>, %arg5: memref<12x1xf32, #tpu.memory_space<vmem>>, %arg6: memref<1x12x64xf32, #tpu.memory_space<vmem>>, %arg7: memref<1x12x64xf32, #tpu.memory_space<vmem>>, %arg8: memref<1x12x64xf32, #tpu.memory_space<vmem>>) attributes {dimension_semantics = [#tpu.dimension_semantics<parallel>], iteration_bounds = array<i64: 2>, scalar_prefetch = 0 : i64, scratch_operands = 0 : i64, tpu.core_type = #tpu.core_type<tc>, window_params = [{transform_indices = @transform_0, window_bounds = array<i64: 1, 12, 64>}, {pipeline_mode = #tpu.pipeline_mode<synchronous>, transform_indices = @transform_1, window_bounds = array<i64: 12, 1>}, {pipeline_mode = #tpu.pipeline_mode<synchronous>, transform_indices = @transform_2, window_bounds = array<i64: 12, 1>}, {pipeline_mode = #tpu.pipeline_mode<synchronous>, transform_indices = @transform_3, window_bounds = array<i64: 12, 12>}, {pipeline_mode = #tpu.pipeline_mode<synchronous>, transform_indices = @transform_4, window_bounds = array<i64: 12, 1>}, {transform_indices = @transform_5, window_bounds = array<i64: 1, 12, 64>}, {transform_indices = @transform_6, window_bounds = array<i64: 1, 12, 64>}, {transform_indices = @transform_7, window_bounds = array<i64: 1, 12, 64>}]} {
    %c0 = arith.constant 0 : index
    %c0_0 = arith.constant 0 : index
    %c0_1 = arith.constant 0 : index
    %0 = vector.load %arg1[%c0, %c0_0, %c0_1] : memref<1x12x64xf32, #tpu.memory_space<vmem>>, vector<1x12x64xf32>
    %1 = vector.shape_cast %0 : vector<1x12x64xf32> to vector<12x64xf32>
    %c0_2 = arith.constant 0 : index
    %c0_3 = arith.constant 0 : index
    %2 = vector.load %arg2[%c0_2, %c0_3] : memref<12x1xf32, #tpu.memory_space<vmem>>, vector<12x1xf32>
    %c0_4 = arith.constant 0 : index
    %c0_5 = arith.constant 0 : index
    %3 = vector.load %arg3[%c0_4, %c0_5] : memref<12x1xf32, #tpu.memory_space<vmem>>, vector<12x1xf32>
    %cst = arith.constant dense<0.000000e+00> : vector<64xf32>
    %4 = vector.multi_reduction <add>, %1, %cst [0] : vector<12x64xf32> to vector<64xf32>
    %5 = vector.shape_cast %4 : vector<64xf32> to vector<1x64xf32>
    %cst_6 = arith.constant 1.200000e+01 : f32
    %6 = vector.broadcast %cst_6 : f32 to vector<1x64xf32>
    %7 = arith.divf %5, %6 : vector<1x64xf32>
    %8 = vector.broadcast %7 : vector<1x64xf32> to vector<12x64xf32>
    %9 = arith.subf %1, %8 : vector<12x64xf32>
    %10 = arith.mulf %9, %9 : vector<12x64xf32>
    %cst_7 = arith.constant dense<0.000000e+00> : vector<64xf32>
    %11 = vector.multi_reduction <add>, %10, %cst_7 [0] : vector<12x64xf32> to vector<64xf32>
    %12 = vector.shape_cast %11 : vector<64xf32> to vector<1x64xf32>
    %cst_8 = arith.constant 1.200000e+01 : f32
    %13 = vector.broadcast %cst_8 : f32 to vector<1x64xf32>
    %14 = arith.divf %12, %13 : vector<1x64xf32>
    %cst_9 = arith.constant 9.99999974E-6 : f32
    %15 = vector.broadcast %cst_9 : f32 to vector<1x64xf32>
    %16 = arith.addf %14, %15 : vector<1x64xf32>
    %17 = math.rsqrt %16 : vector<1x64xf32>
    %18 = vector.broadcast %17 : vector<1x64xf32> to vector<12x64xf32>
    %19 = arith.mulf %9, %18 : vector<12x64xf32>
    %20 = vector.broadcast %2 : vector<12x1xf32> to vector<12x64xf32>
    %21 = arith.mulf %19, %20 : vector<12x64xf32>
    %22 = vector.broadcast %3 : vector<12x1xf32> to vector<12x64xf32>
    %23 = arith.addf %21, %22 : vector<12x64xf32>
    %c0_10 = arith.constant 0 : index
    %c0_11 = arith.constant 0 : index
    %24 = vector.load %arg4[%c0_10, %c0_11] : memref<12x12xf32, #tpu.memory_space<vmem>>, vector<12x12xf32>
    %cst_12 = arith.constant dense<0.000000e+00> : vector<12x64xf32>
    %25 = tpu.matmul %24, %23, %cst_12 {dimension_numbers = #tpu.dot_dimension_numbers<[1], [0], [0], [1], [0, 0, 1, 1], [], []>} : vector<12x12xf32>, vector<12x64xf32>, vector<12x64xf32> -> vector<12x64xf32>
    %c0_13 = arith.constant 0 : index
    %c0_14 = arith.constant 0 : index
    %26 = vector.load %arg5[%c0_13, %c0_14] : memref<12x1xf32, #tpu.memory_space<vmem>>, vector<12x1xf32>
    %27 = vector.broadcast %26 : vector<12x1xf32> to vector<12x64xf32>
    %28 = arith.addf %25, %27 : vector<12x64xf32>
    %c0_15 = arith.constant 0 : index
    %c0_16 = arith.constant 0 : index
    %c0_17 = arith.constant 0 : index
    %29 = vector.load %arg6[%c0_15, %c0_16, %c0_17] : memref<1x12x64xf32, #tpu.memory_space<vmem>>, vector<1x12x64xf32>
    %30 = vector.shape_cast %29 : vector<1x12x64xf32> to vector<12x64xf32>
    %31 = arith.mulf %28, %30 : vector<12x64xf32>
    %c0_18 = arith.constant 0 : index
    %c0_19 = arith.constant 0 : index
    %c0_20 = arith.constant 0 : index
    %32 = vector.load %arg7[%c0_18, %c0_19, %c0_20] : memref<1x12x64xf32, #tpu.memory_space<vmem>>, vector<1x12x64xf32>
    %33 = vector.shape_cast %32 : vector<1x12x64xf32> to vector<12x64xf32>
    %34 = vector.shape_cast %23 : vector<12x64xf32> to vector<1x12x64xf32>
    tpu.vector_store %arg7[%c0_18, %c0_19, %c0_20], %34 {strides = array<i32>} : memref<1x12x64xf32, #tpu.memory_space<vmem>>, vector<1x12x64xf32>,
    %c0_21 = arith.constant 0 : index
    %c0_22 = arith.constant 0 : index
    %c0_23 = arith.constant 0 : index
    %35 = vector.load %arg8[%c0_21, %c0_22, %c0_23] : memref<1x12x64xf32, #tpu.memory_space<vmem>>, vector<1x12x64xf32>
    %36 = vector.shape_cast %35 : vector<1x12x64xf32> to vector<12x64xf32>
    %37 = vector.shape_cast %31 : vector<12x64xf32> to vector<1x12x64xf32>
    tpu.vector_store %arg8[%c0_21, %c0_22, %c0_23], %37 {strides = array<i32>} : memref<1x12x64xf32, #tpu.memory_space<vmem>>, vector<1x12x64xf32>,
    return
  }
  func.func @transform_0(%arg0: i32) -> (i32, i32, i32) {
    %c0_i32 = arith.constant 0 : i32
    %c0_i32_0 = arith.constant 0 : i32
    %c0_i32_1 = arith.constant 0 : i32
    return %arg0, %c0_i32, %c0_i32_0 : i32, i32, i32
  }
  func.func @transform_1(%arg0: i32) -> (i32, i32) {
    %c0_i32 = arith.constant 0 : i32
    %c0_i32_0 = arith.constant 0 : i32
    %c0_i32_1 = arith.constant 0 : i32
    return %c0_i32, %c0_i32_0 : i32, i32
  }
  func.func @transform_2(%arg0: i32) -> (i32, i32) {
    %c0_i32 = arith.constant 0 : i32
    %c0_i32_0 = arith.constant 0 : i32
    %c0_i32_1 = arith.constant 0 : i32
    return %c0_i32, %c0_i32_0 : i32, i32
  }
  func.func @transform_3(%arg0: i32) -> (i32, i32) {
    %c0_i32 = arith.constant 0 : i32
    %c0_i32_0 = arith.constant 0 : i32
    %c0_i32_1 = arith.constant 0 : i32
    return %c0_i32, %c0_i32_0 : i32, i32
  }
  func.func @transform_4(%arg0: i32) -> (i32, i32) {
    %c0_i32 = arith.constant 0 : i32
    %c0_i32_0 = arith.constant 0 : i32
    %c0_i32_1 = arith.constant 0 : i32
    return %c0_i32, %c0_i32_0 : i32, i32
  }
  func.func @transform_5(%arg0: i32) -> (i32, i32, i32) {
    %c0_i32 = arith.constant 0 : i32
    %c0_i32_0 = arith.constant 0 : i32
    %c0_i32_1 = arith.constant 0 : i32
    return %arg0, %c0_i32, %c0_i32_0 : i32, i32, i32
  }
  func.func @transform_6(%arg0: i32) -> (i32, i32, i32) {
    %c0_i32 = arith.constant 0 : i32
    %c0_i32_0 = arith.constant 0 : i32
    %c0_i32_1 = arith.constant 0 : i32
    return %arg0, %c0_i32, %c0_i32_0 : i32, i32, i32
  }
  func.func @transform_7(%arg0: i32) -> (i32, i32, i32) {
    %c0_i32 = arith.constant 0 : i32
    %c0_i32_0 = arith.constant 0 : i32
    %c0_i32_1 = arith.constant 0 : i32
    return %arg0, %c0_i32, %c0_i32_0 : i32, i32, i32
  }
}

module attributes {stable_mosaic.version = 11 : i64} {
  func.func @_ln_ffn_slab_kernel(%arg0: i32, %arg1: memref<12x128xf32, #tpu.memory_space<vmem>>, %arg2: memref<12x1xf32, #tpu.memory_space<vmem>>, %arg3: memref<12x1xf32, #tpu.memory_space<vmem>>, %arg4: memref<12x12xf32, #tpu.memory_space<vmem>>, %arg5: memref<12x1xf32, #tpu.memory_space<vmem>>, %arg6: memref<12x9xf32, #tpu.memory_space<vmem>>, %arg7: memref<12x1xf32, #tpu.memory_space<vmem>>, %arg8: memref<12x12xf32, #tpu.memory_space<vmem>>, %arg9: memref<12x1xf32, #tpu.memory_space<vmem>>, %arg10: memref<12x128xf32, #tpu.memory_space<vmem>>) attributes {dimension_semantics = [#tpu.dimension_semantics<arbitrary>], iteration_bounds = array<i64: 1>, scalar_prefetch = 0 : i64, scratch_operands = 0 : i64, tpu.core_type = #tpu.core_type<tc>, window_params = [{pipeline_mode = #tpu.pipeline_mode<synchronous>, transform_indices = @transform_0, window_bounds = array<i64: 12, 128>}, {pipeline_mode = #tpu.pipeline_mode<synchronous>, transform_indices = @transform_1, window_bounds = array<i64: 12, 1>}, {pipeline_mode = #tpu.pipeline_mode<synchronous>, transform_indices = @transform_2, window_bounds = array<i64: 12, 1>}, {pipeline_mode = #tpu.pipeline_mode<synchronous>, transform_indices = @transform_3, window_bounds = array<i64: 12, 12>}, {pipeline_mode = #tpu.pipeline_mode<synchronous>, transform_indices = @transform_4, window_bounds = array<i64: 12, 1>}, {pipeline_mode = #tpu.pipeline_mode<synchronous>, transform_indices = @transform_5, window_bounds = array<i64: 12, 9>}, {pipeline_mode = #tpu.pipeline_mode<synchronous>, transform_indices = @transform_6, window_bounds = array<i64: 12, 1>}, {pipeline_mode = #tpu.pipeline_mode<synchronous>, transform_indices = @transform_7, window_bounds = array<i64: 12, 12>}, {pipeline_mode = #tpu.pipeline_mode<synchronous>, transform_indices = @transform_8, window_bounds = array<i64: 12, 1>}, {pipeline_mode = #tpu.pipeline_mode<synchronous>, transform_indices = @transform_9, window_bounds = array<i64: 12, 128>}]} {
    %c0 = arith.constant 0 : index
    %c0_0 = arith.constant 0 : index
    %0 = vector.load %arg1[%c0, %c0_0] : memref<12x128xf32, #tpu.memory_space<vmem>>, vector<12x128xf32>
    %c0_1 = arith.constant 0 : index
    %c0_2 = arith.constant 0 : index
    %1 = vector.load %arg2[%c0_1, %c0_2] : memref<12x1xf32, #tpu.memory_space<vmem>>, vector<12x1xf32>
    %c0_3 = arith.constant 0 : index
    %c0_4 = arith.constant 0 : index
    %2 = vector.load %arg3[%c0_3, %c0_4] : memref<12x1xf32, #tpu.memory_space<vmem>>, vector<12x1xf32>
    %cst = arith.constant dense<0.000000e+00> : vector<128xf32>
    %3 = vector.multi_reduction <add>, %0, %cst [0] : vector<12x128xf32> to vector<128xf32>
    %4 = vector.shape_cast %3 : vector<128xf32> to vector<1x128xf32>
    %cst_5 = arith.constant 1.200000e+01 : f32
    %5 = vector.broadcast %cst_5 : f32 to vector<1x128xf32>
    %6 = arith.divf %4, %5 : vector<1x128xf32>
    %7 = vector.broadcast %6 : vector<1x128xf32> to vector<12x128xf32>
    %8 = arith.subf %0, %7 : vector<12x128xf32>
    %9 = arith.mulf %8, %8 : vector<12x128xf32>
    %cst_6 = arith.constant dense<0.000000e+00> : vector<128xf32>
    %10 = vector.multi_reduction <add>, %9, %cst_6 [0] : vector<12x128xf32> to vector<128xf32>
    %11 = vector.shape_cast %10 : vector<128xf32> to vector<1x128xf32>
    %cst_7 = arith.constant 1.200000e+01 : f32
    %12 = vector.broadcast %cst_7 : f32 to vector<1x128xf32>
    %13 = arith.divf %11, %12 : vector<1x128xf32>
    %cst_8 = arith.constant 9.99999974E-6 : f32
    %14 = vector.broadcast %cst_8 : f32 to vector<1x128xf32>
    %15 = arith.addf %13, %14 : vector<1x128xf32>
    %16 = math.rsqrt %15 : vector<1x128xf32>
    %17 = vector.broadcast %16 : vector<1x128xf32> to vector<12x128xf32>
    %18 = arith.mulf %8, %17 : vector<12x128xf32>
    %19 = vector.broadcast %1 : vector<12x1xf32> to vector<12x128xf32>
    %20 = arith.mulf %18, %19 : vector<12x128xf32>
    %21 = vector.broadcast %2 : vector<12x1xf32> to vector<12x128xf32>
    %22 = arith.addf %20, %21 : vector<12x128xf32>
    %c0_9 = arith.constant 0 : index
    %c0_10 = arith.constant 0 : index
    %23 = vector.load %arg4[%c0_9, %c0_10] : memref<12x12xf32, #tpu.memory_space<vmem>>, vector<12x12xf32>
    %c0_11 = arith.constant 0 : index
    %c0_12 = arith.constant 0 : index
    %24 = vector.load %arg5[%c0_11, %c0_12] : memref<12x1xf32, #tpu.memory_space<vmem>>, vector<12x1xf32>
    %c0_13 = arith.constant 0 : index
    %c0_14 = arith.constant 0 : index
    %25 = vector.load %arg6[%c0_13, %c0_14] : memref<12x9xf32, #tpu.memory_space<vmem>>, vector<12x9xf32>
    %c0_15 = arith.constant 0 : index
    %c0_16 = arith.constant 0 : index
    %26 = vector.load %arg7[%c0_15, %c0_16] : memref<12x1xf32, #tpu.memory_space<vmem>>, vector<12x1xf32>
    %c0_17 = arith.constant 0 : index
    %c0_18 = arith.constant 0 : index
    %27 = vector.load %arg8[%c0_17, %c0_18] : memref<12x12xf32, #tpu.memory_space<vmem>>, vector<12x12xf32>
    %c0_19 = arith.constant 0 : index
    %c0_20 = arith.constant 0 : index
    %28 = vector.load %arg9[%c0_19, %c0_20] : memref<12x1xf32, #tpu.memory_space<vmem>>, vector<12x1xf32>
    %cst_21 = arith.constant dense<0.000000e+00> : vector<12x128xf32>
    %29 = tpu.matmul %23, %22, %cst_21 {dimension_numbers = #tpu.dot_dimension_numbers<[1], [0], [0], [1], [0, 0, 1, 1], [], []>} : vector<12x12xf32>, vector<12x128xf32>, vector<12x128xf32> -> vector<12x128xf32>
    %30 = vector.broadcast %24 : vector<12x1xf32> to vector<12x128xf32>
    %31 = arith.addf %29, %30 : vector<12x128xf32>
    %32 = tpu.iota {dimensions = array<i32: 1>} : vector<12x128xi32>
    %c64_i32 = arith.constant 64 : i32
    %c0_i32 = arith.constant 0 : i32
    %33 = arith.cmpi eq, %c64_i32, %c0_i32 : i32
    %c1_i32 = arith.constant 1 : i32
    %34 = arith.select %33, %c1_i32, %c64_i32 : i32
    %35 = vector.broadcast %34 : i32 to vector<12x128xi32>
    %36 = arith.remsi %32, %35 : vector<12x128xi32>
    %c0_i32_22 = arith.constant 0 : i32
    %37 = vector.broadcast %c0_i32_22 : i32 to vector<12x128xi32>
    %38 = arith.cmpi ne, %36, %37 : vector<12x128xi32>
    %c0_i32_23 = arith.constant 0 : i32
    %39 = vector.broadcast %c0_i32_23 : i32 to vector<12x128xi32>
    %40 = arith.cmpi slt, %36, %39 : vector<12x128xi32>
    %c0_i32_24 = arith.constant 0 : i32
    %41 = arith.cmpi slt, %34, %c0_i32_24 : i32
    %42 = vector.broadcast %41 : i1 to vector<12x128xi1>
    %43 = vector.broadcast %42 : vector<12x128xi1> to vector<12x128xi1>
    %44 = arith.xori %40, %43 : vector<12x128xi1>
    %45 = arith.andi %44, %38 : vector<12x128xi1>
    %46 = vector.broadcast %34 : i32 to vector<12x128xi32>
    %47 = arith.addi %36, %46 : vector<12x128xi32>
    %48 = arith.select %45, %47, %36 : vector<12x128xi1>, vector<12x128xi32>
    %c8_i32 = arith.constant 8 : i32
    %c0_i32_25 = arith.constant 0 : i32
    %49 = arith.cmpi eq, %c8_i32, %c0_i32_25 : i32
    %c1_i32_26 = arith.constant 1 : i32
    %50 = arith.select %49, %c1_i32_26, %c8_i32 : i32
    %51 = vector.broadcast %50 : i32 to vector<12x128xi32>
    %52 = arith.remsi %32, %51 : vector<12x128xi32>
    %c0_i32_27 = arith.constant 0 : i32
    %53 = vector.broadcast %c0_i32_27 : i32 to vector<12x128xi32>
    %54 = arith.cmpi ne, %52, %53 : vector<12x128xi32>
    %c0_i32_28 = arith.constant 0 : i32
    %55 = vector.broadcast %c0_i32_28 : i32 to vector<12x128xi32>
    %56 = arith.cmpi slt, %52, %55 : vector<12x128xi32>
    %c0_i32_29 = arith.constant 0 : i32
    %57 = arith.cmpi slt, %50, %c0_i32_29 : i32
    %58 = vector.broadcast %57 : i1 to vector<12x128xi1>
    %59 = vector.broadcast %58 : vector<12x128xi1> to vector<12x128xi1>
    %60 = arith.xori %56, %59 : vector<12x128xi1>
    %61 = arith.andi %60, %54 : vector<12x128xi1>
    %62 = vector.broadcast %50 : i32 to vector<12x128xi32>
    %63 = arith.addi %52, %62 : vector<12x128xi32>
    %64 = arith.select %61, %63, %52 : vector<12x128xi1>, vector<12x128xi32>
    %cst_30 = arith.constant 0.000000e+00 : f32
    %65 = vector.broadcast %cst_30 : f32 to vector<12x128xf32>
    %66 = vector.broadcast %26 : vector<12x1xf32> to vector<12x128xf32>
    %67 = arith.addf %65, %66 : vector<12x128xf32>
    %c9_i32 = arith.constant 9 : i32
    %68 = tpu.dynamic_rotate %31 by %c9_i32 dim 1 : vector<12x128xf32>, i32 -> vector<12x128xf32>
    %69 = vector.extract_strided_slice %25 {offsets = [0, 0], sizes = [12, 1], strides = [1, 1]} : vector<12x9xf32> to vector<12x1xf32>
    %70 = vector.broadcast %69 : vector<12x1xf32> to vector<12x128xf32>
    %71 = arith.mulf %68, %70 : vector<12x128xf32>
    %c8_i32_31 = arith.constant 8 : i32
    %72 = vector.broadcast %c8_i32_31 : i32 to vector<12x128xi32>
    %73 = arith.cmpi sge, %48, %72 : vector<12x128xi32>
    %c1_i32_32 = arith.constant 1 : i32
    %74 = vector.broadcast %c1_i32_32 : i32 to vector<12x128xi32>
    %75 = arith.cmpi sge, %64, %74 : vector<12x128xi32>
    %76 = arith.andi %73, %75 : vector<12x128xi1>
    %cst_33 = arith.constant 0.000000e+00 : f32
    %77 = vector.broadcast %cst_33 : f32 to vector<12x128xf32>
    %78 = arith.select %76, %71, %77 : vector<12x128xi1>, vector<12x128xf32>
    %79 = arith.addf %67, %78 : vector<12x128xf32>
    %c8_i32_34 = arith.constant 8 : i32
    %80 = tpu.dynamic_rotate %31 by %c8_i32_34 dim 1 : vector<12x128xf32>, i32 -> vector<12x128xf32>
    %81 = vector.extract_strided_slice %25 {offsets = [0, 1], sizes = [12, 1], strides = [1, 1]} : vector<12x9xf32> to vector<12x1xf32>
    %82 = vector.broadcast %81 : vector<12x1xf32> to vector<12x128xf32>
    %83 = arith.mulf %80, %82 : vector<12x128xf32>
    %c8_i32_35 = arith.constant 8 : i32
    %84 = vector.broadcast %c8_i32_35 : i32 to vector<12x128xi32>
    %85 = arith.cmpi sge, %48, %84 : vector<12x128xi32>
    %cst_36 = arith.constant 0.000000e+00 : f32
    %86 = vector.broadcast %cst_36 : f32 to vector<12x128xf32>
    %87 = arith.select %85, %83, %86 : vector<12x128xi1>, vector<12x128xf32>
    %88 = arith.addf %79, %87 : vector<12x128xf32>
    %c7_i32 = arith.constant 7 : i32
    %89 = tpu.dynamic_rotate %31 by %c7_i32 dim 1 : vector<12x128xf32>, i32 -> vector<12x128xf32>
    %90 = vector.extract_strided_slice %25 {offsets = [0, 2], sizes = [12, 1], strides = [1, 1]} : vector<12x9xf32> to vector<12x1xf32>
    %91 = vector.broadcast %90 : vector<12x1xf32> to vector<12x128xf32>
    %92 = arith.mulf %89, %91 : vector<12x128xf32>
    %c8_i32_37 = arith.constant 8 : i32
    %93 = vector.broadcast %c8_i32_37 : i32 to vector<12x128xi32>
    %94 = arith.cmpi sge, %48, %93 : vector<12x128xi32>
    %c6_i32 = arith.constant 6 : i32
    %95 = vector.broadcast %c6_i32 : i32 to vector<12x128xi32>
    %96 = arith.cmpi sle, %64, %95 : vector<12x128xi32>
    %97 = arith.andi %94, %96 : vector<12x128xi1>
    %cst_38 = arith.constant 0.000000e+00 : f32
    %98 = vector.broadcast %cst_38 : f32 to vector<12x128xf32>
    %99 = arith.select %97, %92, %98 : vector<12x128xi1>, vector<12x128xf32>
    %100 = arith.addf %88, %99 : vector<12x128xf32>
    %c1_i32_39 = arith.constant 1 : i32
    %101 = tpu.dynamic_rotate %31 by %c1_i32_39 dim 1 : vector<12x128xf32>, i32 -> vector<12x128xf32>
    %102 = vector.extract_strided_slice %25 {offsets = [0, 3], sizes = [12, 1], strides = [1, 1]} : vector<12x9xf32> to vector<12x1xf32>
    %103 = vector.broadcast %102 : vector<12x1xf32> to vector<12x128xf32>
    %104 = arith.mulf %101, %103 : vector<12x128xf32>
    %c1_i32_40 = arith.constant 1 : i32
    %105 = vector.broadcast %c1_i32_40 : i32 to vector<12x128xi32>
    %106 = arith.cmpi sge, %64, %105 : vector<12x128xi32>
    %cst_41 = arith.constant 0.000000e+00 : f32
    %107 = vector.broadcast %cst_41 : f32 to vector<12x128xf32>
    %108 = arith.select %106, %104, %107 : vector<12x128xi1>, vector<12x128xf32>
    %109 = arith.addf %100, %108 : vector<12x128xf32>
    %110 = vector.extract_strided_slice %25 {offsets = [0, 4], sizes = [12, 1], strides = [1, 1]} : vector<12x9xf32> to vector<12x1xf32>
    %111 = vector.broadcast %110 : vector<12x1xf32> to vector<12x128xf32>
    %112 = arith.mulf %31, %111 : vector<12x128xf32>
    %113 = arith.addf %109, %112 : vector<12x128xf32>
    %c127_i32 = arith.constant 127 : i32
    %114 = tpu.dynamic_rotate %31 by %c127_i32 dim 1 : vector<12x128xf32>, i32 -> vector<12x128xf32>
    %115 = vector.extract_strided_slice %25 {offsets = [0, 5], sizes = [12, 1], strides = [1, 1]} : vector<12x9xf32> to vector<12x1xf32>
    %116 = vector.broadcast %115 : vector<12x1xf32> to vector<12x128xf32>
    %117 = arith.mulf %114, %116 : vector<12x128xf32>
    %c6_i32_42 = arith.constant 6 : i32
    %118 = vector.broadcast %c6_i32_42 : i32 to vector<12x128xi32>
    %119 = arith.cmpi sle, %64, %118 : vector<12x128xi32>
    %cst_43 = arith.constant 0.000000e+00 : f32
    %120 = vector.broadcast %cst_43 : f32 to vector<12x128xf32>
    %121 = arith.select %119, %117, %120 : vector<12x128xi1>, vector<12x128xf32>
    %122 = arith.addf %113, %121 : vector<12x128xf32>
    %c121_i32 = arith.constant 121 : i32
    %123 = tpu.dynamic_rotate %31 by %c121_i32 dim 1 : vector<12x128xf32>, i32 -> vector<12x128xf32>
    %124 = vector.extract_strided_slice %25 {offsets = [0, 6], sizes = [12, 1], strides = [1, 1]} : vector<12x9xf32> to vector<12x1xf32>
    %125 = vector.broadcast %124 : vector<12x1xf32> to vector<12x128xf32>
    %126 = arith.mulf %123, %125 : vector<12x128xf32>
    %c56_i32 = arith.constant 56 : i32
    %127 = vector.broadcast %c56_i32 : i32 to vector<12x128xi32>
    %128 = arith.cmpi slt, %48, %127 : vector<12x128xi32>
    %c1_i32_44 = arith.constant 1 : i32
    %129 = vector.broadcast %c1_i32_44 : i32 to vector<12x128xi32>
    %130 = arith.cmpi sge, %64, %129 : vector<12x128xi32>
    %131 = arith.andi %128, %130 : vector<12x128xi1>
    %cst_45 = arith.constant 0.000000e+00 : f32
    %132 = vector.broadcast %cst_45 : f32 to vector<12x128xf32>
    %133 = arith.select %131, %126, %132 : vector<12x128xi1>, vector<12x128xf32>
    %134 = arith.addf %122, %133 : vector<12x128xf32>
    %c120_i32 = arith.constant 120 : i32
    %135 = tpu.dynamic_rotate %31 by %c120_i32 dim 1 : vector<12x128xf32>, i32 -> vector<12x128xf32>
    %136 = vector.extract_strided_slice %25 {offsets = [0, 7], sizes = [12, 1], strides = [1, 1]} : vector<12x9xf32> to vector<12x1xf32>
    %137 = vector.broadcast %136 : vector<12x1xf32> to vector<12x128xf32>
    %138 = arith.mulf %135, %137 : vector<12x128xf32>
    %c56_i32_46 = arith.constant 56 : i32
    %139 = vector.broadcast %c56_i32_46 : i32 to vector<12x128xi32>
    %140 = arith.cmpi slt, %48, %139 : vector<12x128xi32>
    %cst_47 = arith.constant 0.000000e+00 : f32
    %141 = vector.broadcast %cst_47 : f32 to vector<12x128xf32>
    %142 = arith.select %140, %138, %141 : vector<12x128xi1>, vector<12x128xf32>
    %143 = arith.addf %134, %142 : vector<12x128xf32>
    %c119_i32 = arith.constant 119 : i32
    %144 = tpu.dynamic_rotate %31 by %c119_i32 dim 1 : vector<12x128xf32>, i32 -> vector<12x128xf32>
    %145 = vector.extract_strided_slice %25 {offsets = [0, 8], sizes = [12, 1], strides = [1, 1]} : vector<12x9xf32> to vector<12x1xf32>
    %146 = vector.broadcast %145 : vector<12x1xf32> to vector<12x128xf32>
    %147 = arith.mulf %144, %146 : vector<12x128xf32>
    %c56_i32_48 = arith.constant 56 : i32
    %148 = vector.broadcast %c56_i32_48 : i32 to vector<12x128xi32>
    %149 = arith.cmpi slt, %48, %148 : vector<12x128xi32>
    %c6_i32_49 = arith.constant 6 : i32
    %150 = vector.broadcast %c6_i32_49 : i32 to vector<12x128xi32>
    %151 = arith.cmpi sle, %64, %150 : vector<12x128xi32>
    %152 = arith.andi %149, %151 : vector<12x128xi1>
    %cst_50 = arith.constant 0.000000e+00 : f32
    %153 = vector.broadcast %cst_50 : f32 to vector<12x128xf32>
    %154 = arith.select %152, %147, %153 : vector<12x128xi1>, vector<12x128xf32>
    %155 = arith.addf %143, %154 : vector<12x128xf32>
    %cst_51 = arith.constant 0.000000e+00 : f32
    %156 = vector.broadcast %cst_51 : f32 to vector<12x128xf32>
    %157 = arith.maximumf %155, %156 : vector<12x128xf32>
    %cst_52 = arith.constant dense<0.000000e+00> : vector<12x128xf32>
    %158 = tpu.matmul %27, %157, %cst_52 {dimension_numbers = #tpu.dot_dimension_numbers<[1], [0], [0], [1], [0, 0, 1, 1], [], []>} : vector<12x12xf32>, vector<12x128xf32>, vector<12x128xf32> -> vector<12x128xf32>
    %159 = vector.broadcast %28 : vector<12x1xf32> to vector<12x128xf32>
    %160 = arith.addf %158, %159 : vector<12x128xf32>
    %161 = arith.addf %160, %0 : vector<12x128xf32>
    %c0_53 = arith.constant 0 : index
    %c0_54 = arith.constant 0 : index
    %162 = vector.load %arg10[%c0_53, %c0_54] : memref<12x128xf32, #tpu.memory_space<vmem>>, vector<12x128xf32>
    tpu.vector_store %arg10[%c0_53, %c0_54], %161 {strides = array<i32>} : memref<12x128xf32, #tpu.memory_space<vmem>>, vector<12x128xf32>,
    return
  }
  func.func @transform_0(%arg0: i32) -> (i32, i32) {
    %c0_i32 = arith.constant 0 : i32
    %c0_i32_0 = arith.constant 0 : i32
    %c0_i32_1 = arith.constant 0 : i32
    return %c0_i32, %c0_i32_0 : i32, i32
  }
  func.func @transform_1(%arg0: i32) -> (i32, i32) {
    %c0_i32 = arith.constant 0 : i32
    %c0_i32_0 = arith.constant 0 : i32
    %c0_i32_1 = arith.constant 0 : i32
    return %c0_i32, %c0_i32_0 : i32, i32
  }
  func.func @transform_2(%arg0: i32) -> (i32, i32) {
    %c0_i32 = arith.constant 0 : i32
    %c0_i32_0 = arith.constant 0 : i32
    %c0_i32_1 = arith.constant 0 : i32
    return %c0_i32, %c0_i32_0 : i32, i32
  }
  func.func @transform_3(%arg0: i32) -> (i32, i32) {
    %c0_i32 = arith.constant 0 : i32
    %c0_i32_0 = arith.constant 0 : i32
    %c0_i32_1 = arith.constant 0 : i32
    return %c0_i32, %c0_i32_0 : i32, i32
  }
  func.func @transform_4(%arg0: i32) -> (i32, i32) {
    %c0_i32 = arith.constant 0 : i32
    %c0_i32_0 = arith.constant 0 : i32
    %c0_i32_1 = arith.constant 0 : i32
    return %c0_i32, %c0_i32_0 : i32, i32
  }
  func.func @transform_5(%arg0: i32) -> (i32, i32) {
    %c0_i32 = arith.constant 0 : i32
    %c0_i32_0 = arith.constant 0 : i32
    %c0_i32_1 = arith.constant 0 : i32
    return %c0_i32, %c0_i32_0 : i32, i32
  }
  func.func @transform_6(%arg0: i32) -> (i32, i32) {
    %c0_i32 = arith.constant 0 : i32
    %c0_i32_0 = arith.constant 0 : i32
    %c0_i32_1 = arith.constant 0 : i32
    return %c0_i32, %c0_i32_0 : i32, i32
  }
  func.func @transform_7(%arg0: i32) -> (i32, i32) {
    %c0_i32 = arith.constant 0 : i32
    %c0_i32_0 = arith.constant 0 : i32
    %c0_i32_1 = arith.constant 0 : i32
    return %c0_i32, %c0_i32_0 : i32, i32
  }
  func.func @transform_8(%arg0: i32) -> (i32, i32) {
    %c0_i32 = arith.constant 0 : i32
    %c0_i32_0 = arith.constant 0 : i32
    %c0_i32_1 = arith.constant 0 : i32
    return %c0_i32, %c0_i32_0 : i32, i32
  }
  func.func @transform_9(%arg0: i32) -> (i32, i32) {
    %c0_i32 = arith.constant 0 : i32
    %c0_i32_0 = arith.constant 0 : i32
    %c0_i32_1 = arith.constant 0 : i32
    return %c0_i32, %c0_i32_0 : i32, i32
  }
}

module attributes {stable_mosaic.version = 11 : i64} {
  func.func @_tail_kernel(%arg0: i32, %arg1: memref<1x15x256xf32, #tpu.memory_space<vmem>>, %arg2: memref<15x1xf32, #tpu.memory_space<vmem>>, %arg3: memref<15x1xf32, #tpu.memory_space<vmem>>, %arg4: memref<15x15xf32, #tpu.memory_space<vmem>>, %arg5: memref<15x1xf32, #tpu.memory_space<vmem>>, %arg6: memref<15x9xf32, #tpu.memory_space<vmem>>, %arg7: memref<15x1xf32, #tpu.memory_space<vmem>>, %arg8: memref<15x15xf32, #tpu.memory_space<vmem>>, %arg9: memref<15x1xf32, #tpu.memory_space<vmem>>, %arg10: memref<15x1xf32, #tpu.memory_space<vmem>>, %arg11: memref<15x1xf32, #tpu.memory_space<vmem>>, %arg12: memref<15x15xf32, #tpu.memory_space<vmem>>, %arg13: memref<15x1xf32, #tpu.memory_space<vmem>>, %arg14: memref<30x15xf32, #tpu.memory_space<vmem>>, %arg15: memref<15x30xf32, #tpu.memory_space<vmem>>, %arg16: memref<15x1xf32, #tpu.memory_space<vmem>>, %arg17: memref<15x1xf32, #tpu.memory_space<vmem>>, %arg18: memref<15x15xf32, #tpu.memory_space<vmem>>, %arg19: memref<15x1xf32, #tpu.memory_space<vmem>>, %arg20: memref<15x9xf32, #tpu.memory_space<vmem>>, %arg21: memref<15x1xf32, #tpu.memory_space<vmem>>, %arg22: memref<3x15xf32, #tpu.memory_space<vmem>>, %arg23: memref<3x1xf32, #tpu.memory_space<vmem>>, %arg24: memref<1x3x256xf32, #tpu.memory_space<vmem>>) attributes {dimension_semantics = [#tpu.dimension_semantics<parallel>], iteration_bounds = array<i64: 2>, scalar_prefetch = 0 : i64, scratch_operands = 0 : i64, tpu.core_type = #tpu.core_type<tc>, window_params = [{transform_indices = @transform_0, window_bounds = array<i64: 1, 15, 256>}, {pipeline_mode = #tpu.pipeline_mode<synchronous>, transform_indices = @transform_1, window_bounds = array<i64: 15, 1>}, {pipeline_mode = #tpu.pipeline_mode<synchronous>, transform_indices = @transform_2, window_bounds = array<i64: 15, 1>}, {pipeline_mode = #tpu.pipeline_mode<synchronous>, transform_indices = @transform_3, window_bounds = array<i64: 15, 15>}, {pipeline_mode = #tpu.pipeline_mode<synchronous>, transform_indices = @transform_4, window_bounds = array<i64: 15, 1>}, {pipeline_mode = #tpu.pipeline_mode<synchronous>, transform_indices = @transform_5, window_bounds = array<i64: 15, 9>}, {pipeline_mode = #tpu.pipeline_mode<synchronous>, transform_indices = @transform_6, window_bounds = array<i64: 15, 1>}, {pipeline_mode = #tpu.pipeline_mode<synchronous>, transform_indices = @transform_7, window_bounds = array<i64: 15, 15>}, {pipeline_mode = #tpu.pipeline_mode<synchronous>, transform_indices = @transform_8, window_bounds = array<i64: 15, 1>}, {pipeline_mode = #tpu.pipeline_mode<synchronous>, transform_indices = @transform_9, window_bounds = array<i64: 15, 1>}, {pipeline_mode = #tpu.pipeline_mode<synchronous>, transform_indices = @transform_10, window_bounds = array<i64: 15, 1>}, {pipeline_mode = #tpu.pipeline_mode<synchronous>, transform_indices = @transform_11, window_bounds = array<i64: 15, 15>}, {pipeline_mode = #tpu.pipeline_mode<synchronous>, transform_indices = @transform_12, window_bounds = array<i64: 15, 1>}, {pipeline_mode = #tpu.pipeline_mode<synchronous>, transform_indices = @transform_13, window_bounds = array<i64: 30, 15>}, {pipeline_mode = #tpu.pipeline_mode<synchronous>, transform_indices = @transform_14, window_bounds = array<i64: 15, 30>}, {pipeline_mode = #tpu.pipeline_mode<synchronous>, transform_indices = @transform_15, window_bounds = array<i64: 15, 1>}, {pipeline_mode = #tpu.pipeline_mode<synchronous>, transform_indices = @transform_16, window_bounds = array<i64: 15, 1>}, {pipeline_mode = #tpu.pipeline_mode<synchronous>, transform_indices = @transform_17, window_bounds = array<i64: 15, 15>}, {pipeline_mode = #tpu.pipeline_mode<synchronous>, transform_indices = @transform_18, window_bounds = array<i64: 15, 1>}, {pipeline_mode = #tpu.pipeline_mode<synchronous>, transform_indices = @transform_19, window_bounds = array<i64: 15, 9>}, {pipeline_mode = #tpu.pipeline_mode<synchronous>, transform_indices = @transform_20, window_bounds = array<i64: 15, 1>}, {pipeline_mode = #tpu.pipeline_mode<synchronous>, transform_indices = @transform_21, window_bounds = array<i64: 3, 15>}, {pipeline_mode = #tpu.pipeline_mode<synchronous>, transform_indices = @transform_22, window_bounds = array<i64: 3, 1>}, {transform_indices = @transform_23, window_bounds = array<i64: 1, 3, 256>}]} {
    %c0 = arith.constant 0 : index
    %c0_0 = arith.constant 0 : index
    %c0_1 = arith.constant 0 : index
    %0 = vector.load %arg1[%c0, %c0_0, %c0_1] : memref<1x15x256xf32, #tpu.memory_space<vmem>>, vector<1x15x256xf32>
    %1 = vector.shape_cast %0 : vector<1x15x256xf32> to vector<15x256xf32>
    %c0_2 = arith.constant 0 : index
    %c0_3 = arith.constant 0 : index
    %2 = vector.load %arg2[%c0_2, %c0_3] : memref<15x1xf32, #tpu.memory_space<vmem>>, vector<15x1xf32>
    %c0_4 = arith.constant 0 : index
    %c0_5 = arith.constant 0 : index
    %3 = vector.load %arg3[%c0_4, %c0_5] : memref<15x1xf32, #tpu.memory_space<vmem>>, vector<15x1xf32>
    %cst = arith.constant dense<0.000000e+00> : vector<256xf32>
    %4 = vector.multi_reduction <add>, %1, %cst [0] : vector<15x256xf32> to vector<256xf32>
    %5 = vector.shape_cast %4 : vector<256xf32> to vector<1x256xf32>
    %cst_6 = arith.constant 1.500000e+01 : f32
    %6 = vector.broadcast %cst_6 : f32 to vector<1x256xf32>
    %7 = arith.divf %5, %6 : vector<1x256xf32>
    %8 = vector.broadcast %7 : vector<1x256xf32> to vector<15x256xf32>
    %9 = arith.subf %1, %8 : vector<15x256xf32>
    %10 = arith.mulf %9, %9 : vector<15x256xf32>
    %cst_7 = arith.constant dense<0.000000e+00> : vector<256xf32>
    %11 = vector.multi_reduction <add>, %10, %cst_7 [0] : vector<15x256xf32> to vector<256xf32>
    %12 = vector.shape_cast %11 : vector<256xf32> to vector<1x256xf32>
    %cst_8 = arith.constant 1.500000e+01 : f32
    %13 = vector.broadcast %cst_8 : f32 to vector<1x256xf32>
    %14 = arith.divf %12, %13 : vector<1x256xf32>
    %cst_9 = arith.constant 9.99999974E-6 : f32
    %15 = vector.broadcast %cst_9 : f32 to vector<1x256xf32>
    %16 = arith.addf %14, %15 : vector<1x256xf32>
    %17 = math.rsqrt %16 : vector<1x256xf32>
    %18 = vector.broadcast %17 : vector<1x256xf32> to vector<15x256xf32>
    %19 = arith.mulf %9, %18 : vector<15x256xf32>
    %20 = vector.broadcast %2 : vector<15x1xf32> to vector<15x256xf32>
    %21 = arith.mulf %19, %20 : vector<15x256xf32>
    %22 = vector.broadcast %3 : vector<15x1xf32> to vector<15x256xf32>
    %23 = arith.addf %21, %22 : vector<15x256xf32>
    %c0_10 = arith.constant 0 : index
    %c0_11 = arith.constant 0 : index
    %24 = vector.load %arg4[%c0_10, %c0_11] : memref<15x15xf32, #tpu.memory_space<vmem>>, vector<15x15xf32>
    %c0_12 = arith.constant 0 : index
    %c0_13 = arith.constant 0 : index
    %25 = vector.load %arg5[%c0_12, %c0_13] : memref<15x1xf32, #tpu.memory_space<vmem>>, vector<15x1xf32>
    %c0_14 = arith.constant 0 : index
    %c0_15 = arith.constant 0 : index
    %26 = vector.load %arg6[%c0_14, %c0_15] : memref<15x9xf32, #tpu.memory_space<vmem>>, vector<15x9xf32>
    %c0_16 = arith.constant 0 : index
    %c0_17 = arith.constant 0 : index
    %27 = vector.load %arg7[%c0_16, %c0_17] : memref<15x1xf32, #tpu.memory_space<vmem>>, vector<15x1xf32>
    %c0_18 = arith.constant 0 : index
    %c0_19 = arith.constant 0 : index
    %28 = vector.load %arg8[%c0_18, %c0_19] : memref<15x15xf32, #tpu.memory_space<vmem>>, vector<15x15xf32>
    %c0_20 = arith.constant 0 : index
    %c0_21 = arith.constant 0 : index
    %29 = vector.load %arg9[%c0_20, %c0_21] : memref<15x1xf32, #tpu.memory_space<vmem>>, vector<15x1xf32>
    %cst_22 = arith.constant dense<0.000000e+00> : vector<15x256xf32>
    %30 = tpu.matmul %24, %23, %cst_22 {dimension_numbers = #tpu.dot_dimension_numbers<[1], [0], [0], [1], [0, 0, 1, 1], [], []>} : vector<15x15xf32>, vector<15x256xf32>, vector<15x256xf32> -> vector<15x256xf32>
    %31 = vector.broadcast %25 : vector<15x1xf32> to vector<15x256xf32>
    %32 = arith.addf %30, %31 : vector<15x256xf32>
    %33 = tpu.iota {dimensions = array<i32: 1>} : vector<15x256xi32>
    %c256_i32 = arith.constant 256 : i32
    %c0_i32 = arith.constant 0 : i32
    %34 = arith.cmpi eq, %c256_i32, %c0_i32 : i32
    %c1_i32 = arith.constant 1 : i32
    %35 = arith.select %34, %c1_i32, %c256_i32 : i32
    %36 = vector.broadcast %35 : i32 to vector<15x256xi32>
    %37 = arith.remsi %33, %36 : vector<15x256xi32>
    %c0_i32_23 = arith.constant 0 : i32
    %38 = vector.broadcast %c0_i32_23 : i32 to vector<15x256xi32>
    %39 = arith.cmpi ne, %37, %38 : vector<15x256xi32>
    %c0_i32_24 = arith.constant 0 : i32
    %40 = vector.broadcast %c0_i32_24 : i32 to vector<15x256xi32>
    %41 = arith.cmpi slt, %37, %40 : vector<15x256xi32>
    %c0_i32_25 = arith.constant 0 : i32
    %42 = arith.cmpi slt, %35, %c0_i32_25 : i32
    %43 = vector.broadcast %42 : i1 to vector<15x256xi1>
    %44 = vector.broadcast %43 : vector<15x256xi1> to vector<15x256xi1>
    %45 = arith.xori %41, %44 : vector<15x256xi1>
    %46 = arith.andi %45, %39 : vector<15x256xi1>
    %47 = vector.broadcast %35 : i32 to vector<15x256xi32>
    %48 = arith.addi %37, %47 : vector<15x256xi32>
    %49 = arith.select %46, %48, %37 : vector<15x256xi1>, vector<15x256xi32>
    %c16_i32 = arith.constant 16 : i32
    %c0_i32_26 = arith.constant 0 : i32
    %50 = arith.cmpi eq, %c16_i32, %c0_i32_26 : i32
    %c1_i32_27 = arith.constant 1 : i32
    %51 = arith.select %50, %c1_i32_27, %c16_i32 : i32
    %52 = vector.broadcast %51 : i32 to vector<15x256xi32>
    %53 = arith.remsi %33, %52 : vector<15x256xi32>
    %c0_i32_28 = arith.constant 0 : i32
    %54 = vector.broadcast %c0_i32_28 : i32 to vector<15x256xi32>
    %55 = arith.cmpi ne, %53, %54 : vector<15x256xi32>
    %c0_i32_29 = arith.constant 0 : i32
    %56 = vector.broadcast %c0_i32_29 : i32 to vector<15x256xi32>
    %57 = arith.cmpi slt, %53, %56 : vector<15x256xi32>
    %c0_i32_30 = arith.constant 0 : i32
    %58 = arith.cmpi slt, %51, %c0_i32_30 : i32
    %59 = vector.broadcast %58 : i1 to vector<15x256xi1>
    %60 = vector.broadcast %59 : vector<15x256xi1> to vector<15x256xi1>
    %61 = arith.xori %57, %60 : vector<15x256xi1>
    %62 = arith.andi %61, %55 : vector<15x256xi1>
    %63 = vector.broadcast %51 : i32 to vector<15x256xi32>
    %64 = arith.addi %53, %63 : vector<15x256xi32>
    %65 = arith.select %62, %64, %53 : vector<15x256xi1>, vector<15x256xi32>
    %cst_31 = arith.constant 0.000000e+00 : f32
    %66 = vector.broadcast %cst_31 : f32 to vector<15x256xf32>
    %67 = vector.broadcast %27 : vector<15x1xf32> to vector<15x256xf32>
    %68 = arith.addf %66, %67 : vector<15x256xf32>
    %c17_i32 = arith.constant 17 : i32
    %69 = tpu.dynamic_rotate %32 by %c17_i32 dim 1 : vector<15x256xf32>, i32 -> vector<15x256xf32>
    %70 = vector.extract_strided_slice %26 {offsets = [0, 0], sizes = [15, 1], strides = [1, 1]} : vector<15x9xf32> to vector<15x1xf32>
    %71 = vector.broadcast %70 : vector<15x1xf32> to vector<15x256xf32>
    %72 = arith.mulf %69, %71 : vector<15x256xf32>
    %c16_i32_32 = arith.constant 16 : i32
    %73 = vector.broadcast %c16_i32_32 : i32 to vector<15x256xi32>
    %74 = arith.cmpi sge, %49, %73 : vector<15x256xi32>
    %c1_i32_33 = arith.constant 1 : i32
    %75 = vector.broadcast %c1_i32_33 : i32 to vector<15x256xi32>
    %76 = arith.cmpi sge, %65, %75 : vector<15x256xi32>
    %77 = arith.andi %74, %76 : vector<15x256xi1>
    %cst_34 = arith.constant 0.000000e+00 : f32
    %78 = vector.broadcast %cst_34 : f32 to vector<15x256xf32>
    %79 = arith.select %77, %72, %78 : vector<15x256xi1>, vector<15x256xf32>
    %80 = arith.addf %68, %79 : vector<15x256xf32>
    %c16_i32_35 = arith.constant 16 : i32
    %81 = tpu.dynamic_rotate %32 by %c16_i32_35 dim 1 : vector<15x256xf32>, i32 -> vector<15x256xf32>
    %82 = vector.extract_strided_slice %26 {offsets = [0, 1], sizes = [15, 1], strides = [1, 1]} : vector<15x9xf32> to vector<15x1xf32>
    %83 = vector.broadcast %82 : vector<15x1xf32> to vector<15x256xf32>
    %84 = arith.mulf %81, %83 : vector<15x256xf32>
    %c16_i32_36 = arith.constant 16 : i32
    %85 = vector.broadcast %c16_i32_36 : i32 to vector<15x256xi32>
    %86 = arith.cmpi sge, %49, %85 : vector<15x256xi32>
    %cst_37 = arith.constant 0.000000e+00 : f32
    %87 = vector.broadcast %cst_37 : f32 to vector<15x256xf32>
    %88 = arith.select %86, %84, %87 : vector<15x256xi1>, vector<15x256xf32>
    %89 = arith.addf %80, %88 : vector<15x256xf32>
    %c15_i32 = arith.constant 15 : i32
    %90 = tpu.dynamic_rotate %32 by %c15_i32 dim 1 : vector<15x256xf32>, i32 -> vector<15x256xf32>
    %91 = vector.extract_strided_slice %26 {offsets = [0, 2], sizes = [15, 1], strides = [1, 1]} : vector<15x9xf32> to vector<15x1xf32>
    %92 = vector.broadcast %91 : vector<15x1xf32> to vector<15x256xf32>
    %93 = arith.mulf %90, %92 : vector<15x256xf32>
    %c16_i32_38 = arith.constant 16 : i32
    %94 = vector.broadcast %c16_i32_38 : i32 to vector<15x256xi32>
    %95 = arith.cmpi sge, %49, %94 : vector<15x256xi32>
    %c14_i32 = arith.constant 14 : i32
    %96 = vector.broadcast %c14_i32 : i32 to vector<15x256xi32>
    %97 = arith.cmpi sle, %65, %96 : vector<15x256xi32>
    %98 = arith.andi %95, %97 : vector<15x256xi1>
    %cst_39 = arith.constant 0.000000e+00 : f32
    %99 = vector.broadcast %cst_39 : f32 to vector<15x256xf32>
    %100 = arith.select %98, %93, %99 : vector<15x256xi1>, vector<15x256xf32>
    %101 = arith.addf %89, %100 : vector<15x256xf32>
    %c1_i32_40 = arith.constant 1 : i32
    %102 = tpu.dynamic_rotate %32 by %c1_i32_40 dim 1 : vector<15x256xf32>, i32 -> vector<15x256xf32>
    %103 = vector.extract_strided_slice %26 {offsets = [0, 3], sizes = [15, 1], strides = [1, 1]} : vector<15x9xf32> to vector<15x1xf32>
    %104 = vector.broadcast %103 : vector<15x1xf32> to vector<15x256xf32>
    %105 = arith.mulf %102, %104 : vector<15x256xf32>
    %c1_i32_41 = arith.constant 1 : i32
    %106 = vector.broadcast %c1_i32_41 : i32 to vector<15x256xi32>
    %107 = arith.cmpi sge, %65, %106 : vector<15x256xi32>
    %cst_42 = arith.constant 0.000000e+00 : f32
    %108 = vector.broadcast %cst_42 : f32 to vector<15x256xf32>
    %109 = arith.select %107, %105, %108 : vector<15x256xi1>, vector<15x256xf32>
    %110 = arith.addf %101, %109 : vector<15x256xf32>
    %111 = vector.extract_strided_slice %26 {offsets = [0, 4], sizes = [15, 1], strides = [1, 1]} : vector<15x9xf32> to vector<15x1xf32>
    %112 = vector.broadcast %111 : vector<15x1xf32> to vector<15x256xf32>
    %113 = arith.mulf %32, %112 : vector<15x256xf32>
    %114 = arith.addf %110, %113 : vector<15x256xf32>
    %c255_i32 = arith.constant 255 : i32
    %115 = tpu.dynamic_rotate %32 by %c255_i32 dim 1 : vector<15x256xf32>, i32 -> vector<15x256xf32>
    %116 = vector.extract_strided_slice %26 {offsets = [0, 5], sizes = [15, 1], strides = [1, 1]} : vector<15x9xf32> to vector<15x1xf32>
    %117 = vector.broadcast %116 : vector<15x1xf32> to vector<15x256xf32>
    %118 = arith.mulf %115, %117 : vector<15x256xf32>
    %c14_i32_43 = arith.constant 14 : i32
    %119 = vector.broadcast %c14_i32_43 : i32 to vector<15x256xi32>
    %120 = arith.cmpi sle, %65, %119 : vector<15x256xi32>
    %cst_44 = arith.constant 0.000000e+00 : f32
    %121 = vector.broadcast %cst_44 : f32 to vector<15x256xf32>
    %122 = arith.select %120, %118, %121 : vector<15x256xi1>, vector<15x256xf32>
    %123 = arith.addf %114, %122 : vector<15x256xf32>
    %c241_i32 = arith.constant 241 : i32
    %124 = tpu.dynamic_rotate %32 by %c241_i32 dim 1 : vector<15x256xf32>, i32 -> vector<15x256xf32>
    %125 = vector.extract_strided_slice %26 {offsets = [0, 6], sizes = [15, 1], strides = [1, 1]} : vector<15x9xf32> to vector<15x1xf32>
    %126 = vector.broadcast %125 : vector<15x1xf32> to vector<15x256xf32>
    %127 = arith.mulf %124, %126 : vector<15x256xf32>
    %c240_i32 = arith.constant 240 : i32
    %128 = vector.broadcast %c240_i32 : i32 to vector<15x256xi32>
    %129 = arith.cmpi slt, %49, %128 : vector<15x256xi32>
    %c1_i32_45 = arith.constant 1 : i32
    %130 = vector.broadcast %c1_i32_45 : i32 to vector<15x256xi32>
    %131 = arith.cmpi sge, %65, %130 : vector<15x256xi32>
    %132 = arith.andi %129, %131 : vector<15x256xi1>
    %cst_46 = arith.constant 0.000000e+00 : f32
    %133 = vector.broadcast %cst_46 : f32 to vector<15x256xf32>
    %134 = arith.select %132, %127, %133 : vector<15x256xi1>, vector<15x256xf32>
    %135 = arith.addf %123, %134 : vector<15x256xf32>
    %c240_i32_47 = arith.constant 240 : i32
    %136 = tpu.dynamic_rotate %32 by %c240_i32_47 dim 1 : vector<15x256xf32>, i32 -> vector<15x256xf32>
    %137 = vector.extract_strided_slice %26 {offsets = [0, 7], sizes = [15, 1], strides = [1, 1]} : vector<15x9xf32> to vector<15x1xf32>
    %138 = vector.broadcast %137 : vector<15x1xf32> to vector<15x256xf32>
    %139 = arith.mulf %136, %138 : vector<15x256xf32>
    %c240_i32_48 = arith.constant 240 : i32
    %140 = vector.broadcast %c240_i32_48 : i32 to vector<15x256xi32>
    %141 = arith.cmpi slt, %49, %140 : vector<15x256xi32>
    %cst_49 = arith.constant 0.000000e+00 : f32
    %142 = vector.broadcast %cst_49 : f32 to vector<15x256xf32>
    %143 = arith.select %141, %139, %142 : vector<15x256xi1>, vector<15x256xf32>
    %144 = arith.addf %135, %143 : vector<15x256xf32>
    %c239_i32 = arith.constant 239 : i32
    %145 = tpu.dynamic_rotate %32 by %c239_i32 dim 1 : vector<15x256xf32>, i32 -> vector<15x256xf32>
    %146 = vector.extract_strided_slice %26 {offsets = [0, 8], sizes = [15, 1], strides = [1, 1]} : vector<15x9xf32> to vector<15x1xf32>
    %147 = vector.broadcast %146 : vector<15x1xf32> to vector<15x256xf32>
    %148 = arith.mulf %145, %147 : vector<15x256xf32>
    %c240_i32_50 = arith.constant 240 : i32
    %149 = vector.broadcast %c240_i32_50 : i32 to vector<15x256xi32>
    %150 = arith.cmpi slt, %49, %149 : vector<15x256xi32>
    %c14_i32_51 = arith.constant 14 : i32
    %151 = vector.broadcast %c14_i32_51 : i32 to vector<15x256xi32>
    %152 = arith.cmpi sle, %65, %151 : vector<15x256xi32>
    %153 = arith.andi %150, %152 : vector<15x256xi1>
    %cst_52 = arith.constant 0.000000e+00 : f32
    %154 = vector.broadcast %cst_52 : f32 to vector<15x256xf32>
    %155 = arith.select %153, %148, %154 : vector<15x256xi1>, vector<15x256xf32>
    %156 = arith.addf %144, %155 : vector<15x256xf32>
    %cst_53 = arith.constant 0.000000e+00 : f32
    %157 = vector.broadcast %cst_53 : f32 to vector<15x256xf32>
    %158 = arith.maximumf %156, %157 : vector<15x256xf32>
    %cst_54 = arith.constant dense<0.000000e+00> : vector<15x256xf32>
    %159 = tpu.matmul %28, %158, %cst_54 {dimension_numbers = #tpu.dot_dimension_numbers<[1], [0], [0], [1], [0, 0, 1, 1], [], []>} : vector<15x15xf32>, vector<15x256xf32>, vector<15x256xf32> -> vector<15x256xf32>
    %160 = vector.broadcast %29 : vector<15x1xf32> to vector<15x256xf32>
    %161 = arith.addf %159, %160 : vector<15x256xf32>
    %c0_55 = arith.constant 0 : index
    %c0_56 = arith.constant 0 : index
    %162 = vector.load %arg10[%c0_55, %c0_56] : memref<15x1xf32, #tpu.memory_space<vmem>>, vector<15x1xf32>
    %c0_57 = arith.constant 0 : index
    %c0_58 = arith.constant 0 : index
    %163 = vector.load %arg11[%c0_57, %c0_58] : memref<15x1xf32, #tpu.memory_space<vmem>>, vector<15x1xf32>
    %cst_59 = arith.constant dense<0.000000e+00> : vector<256xf32>
    %164 = vector.multi_reduction <add>, %161, %cst_59 [0] : vector<15x256xf32> to vector<256xf32>
    %165 = vector.shape_cast %164 : vector<256xf32> to vector<1x256xf32>
    %cst_60 = arith.constant 1.500000e+01 : f32
    %166 = vector.broadcast %cst_60 : f32 to vector<1x256xf32>
    %167 = arith.divf %165, %166 : vector<1x256xf32>
    %168 = vector.broadcast %167 : vector<1x256xf32> to vector<15x256xf32>
    %169 = arith.subf %161, %168 : vector<15x256xf32>
    %170 = arith.mulf %169, %169 : vector<15x256xf32>
    %cst_61 = arith.constant dense<0.000000e+00> : vector<256xf32>
    %171 = vector.multi_reduction <add>, %170, %cst_61 [0] : vector<15x256xf32> to vector<256xf32>
    %172 = vector.shape_cast %171 : vector<256xf32> to vector<1x256xf32>
    %cst_62 = arith.constant 1.500000e+01 : f32
    %173 = vector.broadcast %cst_62 : f32 to vector<1x256xf32>
    %174 = arith.divf %172, %173 : vector<1x256xf32>
    %cst_63 = arith.constant 9.99999974E-6 : f32
    %175 = vector.broadcast %cst_63 : f32 to vector<1x256xf32>
    %176 = arith.addf %174, %175 : vector<1x256xf32>
    %177 = math.rsqrt %176 : vector<1x256xf32>
    %178 = vector.broadcast %177 : vector<1x256xf32> to vector<15x256xf32>
    %179 = arith.mulf %169, %178 : vector<15x256xf32>
    %180 = vector.broadcast %162 : vector<15x1xf32> to vector<15x256xf32>
    %181 = arith.mulf %179, %180 : vector<15x256xf32>
    %182 = vector.broadcast %163 : vector<15x1xf32> to vector<15x256xf32>
    %183 = arith.addf %181, %182 : vector<15x256xf32>
    %c0_64 = arith.constant 0 : index
    %c0_65 = arith.constant 0 : index
    %184 = vector.load %arg12[%c0_64, %c0_65] : memref<15x15xf32, #tpu.memory_space<vmem>>, vector<15x15xf32>
    %cst_66 = arith.constant dense<0.000000e+00> : vector<15x256xf32>
    %185 = tpu.matmul %184, %183, %cst_66 {dimension_numbers = #tpu.dot_dimension_numbers<[1], [0], [0], [1], [0, 0, 1, 1], [], []>} : vector<15x15xf32>, vector<15x256xf32>, vector<15x256xf32> -> vector<15x256xf32>
    %c0_67 = arith.constant 0 : index
    %c0_68 = arith.constant 0 : index
    %186 = vector.load %arg13[%c0_67, %c0_68] : memref<15x1xf32, #tpu.memory_space<vmem>>, vector<15x1xf32>
    %187 = vector.broadcast %186 : vector<15x1xf32> to vector<15x256xf32>
    %188 = arith.addf %185, %187 : vector<15x256xf32>
    %189 = arith.mulf %188, %188 : vector<15x256xf32>
    %cst_69 = arith.constant dense<0.000000e+00> : vector<15xf32>
    %190 = vector.multi_reduction <add>, %189, %cst_69 [1] : vector<15x256xf32> to vector<15xf32>
    %191 = vector.shape_cast %190 : vector<15xf32> to vector<15x1xf32>
    %cst_70 = arith.constant 1.000000e-24 : f32
    %192 = vector.broadcast %cst_70 : f32 to vector<15x1xf32>
    %193 = arith.maximumf %191, %192 : vector<15x1xf32>
    %194 = math.rsqrt %193 : vector<15x1xf32>
    %195 = vector.broadcast %194 : vector<15x1xf32> to vector<15x256xf32>
    %196 = arith.mulf %188, %195 : vector<15x256xf32>
    %c0_71 = arith.constant 0 : index
    %c0_72 = arith.constant 0 : index
    %197 = vector.load %arg14[%c0_71, %c0_72] : memref<30x15xf32, #tpu.memory_space<vmem>>, vector<30x15xf32>
    %cst_73 = arith.constant dense<0.000000e+00> : vector<30x256xf32>
    %198 = tpu.matmul %197, %196, %cst_73 {dimension_numbers = #tpu.dot_dimension_numbers<[1], [0], [0], [1], [0, 0, 1, 1], [], []>} : vector<30x15xf32>, vector<15x256xf32>, vector<30x256xf32> -> vector<30x256xf32>
    %cst_74 = arith.constant 0.000000e+00 : f32
    %199 = vector.broadcast %cst_74 : f32 to vector<30x256xf32>
    %200 = arith.maximumf %198, %199 : vector<30x256xf32>
    %c0_75 = arith.constant 0 : index
    %c0_76 = arith.constant 0 : index
    %201 = vector.load %arg15[%c0_75, %c0_76] : memref<15x30xf32, #tpu.memory_space<vmem>>, vector<15x30xf32>
    %cst_77 = arith.constant dense<0.000000e+00> : vector<15x256xf32>
    %202 = tpu.matmul %201, %200, %cst_77 {dimension_numbers = #tpu.dot_dimension_numbers<[1], [0], [0], [1], [0, 0, 1, 1], [], []>} : vector<15x30xf32>, vector<30x256xf32>, vector<15x256xf32> -> vector<15x256xf32>
    %c0_78 = arith.constant 0 : index
    %c0_79 = arith.constant 0 : index
    %203 = vector.load %arg16[%c0_78, %c0_79] : memref<15x1xf32, #tpu.memory_space<vmem>>, vector<15x1xf32>
    %c0_80 = arith.constant 0 : index
    %c0_81 = arith.constant 0 : index
    %204 = vector.load %arg17[%c0_80, %c0_81] : memref<15x1xf32, #tpu.memory_space<vmem>>, vector<15x1xf32>
    %cst_82 = arith.constant dense<0.000000e+00> : vector<256xf32>
    %205 = vector.multi_reduction <add>, %202, %cst_82 [0] : vector<15x256xf32> to vector<256xf32>
    %206 = vector.shape_cast %205 : vector<256xf32> to vector<1x256xf32>
    %cst_83 = arith.constant 1.500000e+01 : f32
    %207 = vector.broadcast %cst_83 : f32 to vector<1x256xf32>
    %208 = arith.divf %206, %207 : vector<1x256xf32>
    %209 = vector.broadcast %208 : vector<1x256xf32> to vector<15x256xf32>
    %210 = arith.subf %202, %209 : vector<15x256xf32>
    %211 = arith.mulf %210, %210 : vector<15x256xf32>
    %cst_84 = arith.constant dense<0.000000e+00> : vector<256xf32>
    %212 = vector.multi_reduction <add>, %211, %cst_84 [0] : vector<15x256xf32> to vector<256xf32>
    %213 = vector.shape_cast %212 : vector<256xf32> to vector<1x256xf32>
    %cst_85 = arith.constant 1.500000e+01 : f32
    %214 = vector.broadcast %cst_85 : f32 to vector<1x256xf32>
    %215 = arith.divf %213, %214 : vector<1x256xf32>
    %cst_86 = arith.constant 9.99999974E-6 : f32
    %216 = vector.broadcast %cst_86 : f32 to vector<1x256xf32>
    %217 = arith.addf %215, %216 : vector<1x256xf32>
    %218 = math.rsqrt %217 : vector<1x256xf32>
    %219 = vector.broadcast %218 : vector<1x256xf32> to vector<15x256xf32>
    %220 = arith.mulf %210, %219 : vector<15x256xf32>
    %221 = vector.broadcast %203 : vector<15x1xf32> to vector<15x256xf32>
    %222 = arith.mulf %220, %221 : vector<15x256xf32>
    %223 = vector.broadcast %204 : vector<15x1xf32> to vector<15x256xf32>
    %224 = arith.addf %222, %223 : vector<15x256xf32>
    %c0_87 = arith.constant 0 : index
    %c0_88 = arith.constant 0 : index
    %225 = vector.load %arg18[%c0_87, %c0_88] : memref<15x15xf32, #tpu.memory_space<vmem>>, vector<15x15xf32>
    %c0_89 = arith.constant 0 : index
    %c0_90 = arith.constant 0 : index
    %226 = vector.load %arg19[%c0_89, %c0_90] : memref<15x1xf32, #tpu.memory_space<vmem>>, vector<15x1xf32>
    %c0_91 = arith.constant 0 : index
    %c0_92 = arith.constant 0 : index
    %227 = vector.load %arg20[%c0_91, %c0_92] : memref<15x9xf32, #tpu.memory_space<vmem>>, vector<15x9xf32>
    %c0_93 = arith.constant 0 : index
    %c0_94 = arith.constant 0 : index
    %228 = vector.load %arg21[%c0_93, %c0_94] : memref<15x1xf32, #tpu.memory_space<vmem>>, vector<15x1xf32>
    %c0_95 = arith.constant 0 : index
    %c0_96 = arith.constant 0 : index
    %229 = vector.load %arg22[%c0_95, %c0_96] : memref<3x15xf32, #tpu.memory_space<vmem>>, vector<3x15xf32>
    %c0_97 = arith.constant 0 : index
    %c0_98 = arith.constant 0 : index
    %230 = vector.load %arg23[%c0_97, %c0_98] : memref<3x1xf32, #tpu.memory_space<vmem>>, vector<3x1xf32>
    %cst_99 = arith.constant dense<0.000000e+00> : vector<15x256xf32>
    %231 = tpu.matmul %225, %224, %cst_99 {dimension_numbers = #tpu.dot_dimension_numbers<[1], [0], [0], [1], [0, 0, 1, 1], [], []>} : vector<15x15xf32>, vector<15x256xf32>, vector<15x256xf32> -> vector<15x256xf32>
    %232 = vector.broadcast %226 : vector<15x1xf32> to vector<15x256xf32>
    %233 = arith.addf %231, %232 : vector<15x256xf32>
    %234 = tpu.iota {dimensions = array<i32: 1>} : vector<15x256xi32>
    %c256_i32_100 = arith.constant 256 : i32
    %c0_i32_101 = arith.constant 0 : i32
    %235 = arith.cmpi eq, %c256_i32_100, %c0_i32_101 : i32
    %c1_i32_102 = arith.constant 1 : i32
    %236 = arith.select %235, %c1_i32_102, %c256_i32_100 : i32
    %237 = vector.broadcast %236 : i32 to vector<15x256xi32>
    %238 = arith.remsi %234, %237 : vector<15x256xi32>
    %c0_i32_103 = arith.constant 0 : i32
    %239 = vector.broadcast %c0_i32_103 : i32 to vector<15x256xi32>
    %240 = arith.cmpi ne, %238, %239 : vector<15x256xi32>
    %c0_i32_104 = arith.constant 0 : i32
    %241 = vector.broadcast %c0_i32_104 : i32 to vector<15x256xi32>
    %242 = arith.cmpi slt, %238, %241 : vector<15x256xi32>
    %c0_i32_105 = arith.constant 0 : i32
    %243 = arith.cmpi slt, %236, %c0_i32_105 : i32
    %244 = vector.broadcast %243 : i1 to vector<15x256xi1>
    %245 = vector.broadcast %244 : vector<15x256xi1> to vector<15x256xi1>
    %246 = arith.xori %242, %245 : vector<15x256xi1>
    %247 = arith.andi %246, %240 : vector<15x256xi1>
    %248 = vector.broadcast %236 : i32 to vector<15x256xi32>
    %249 = arith.addi %238, %248 : vector<15x256xi32>
    %250 = arith.select %247, %249, %238 : vector<15x256xi1>, vector<15x256xi32>
    %c16_i32_106 = arith.constant 16 : i32
    %c0_i32_107 = arith.constant 0 : i32
    %251 = arith.cmpi eq, %c16_i32_106, %c0_i32_107 : i32
    %c1_i32_108 = arith.constant 1 : i32
    %252 = arith.select %251, %c1_i32_108, %c16_i32_106 : i32
    %253 = vector.broadcast %252 : i32 to vector<15x256xi32>
    %254 = arith.remsi %234, %253 : vector<15x256xi32>
    %c0_i32_109 = arith.constant 0 : i32
    %255 = vector.broadcast %c0_i32_109 : i32 to vector<15x256xi32>
    %256 = arith.cmpi ne, %254, %255 : vector<15x256xi32>
    %c0_i32_110 = arith.constant 0 : i32
    %257 = vector.broadcast %c0_i32_110 : i32 to vector<15x256xi32>
    %258 = arith.cmpi slt, %254, %257 : vector<15x256xi32>
    %c0_i32_111 = arith.constant 0 : i32
    %259 = arith.cmpi slt, %252, %c0_i32_111 : i32
    %260 = vector.broadcast %259 : i1 to vector<15x256xi1>
    %261 = vector.broadcast %260 : vector<15x256xi1> to vector<15x256xi1>
    %262 = arith.xori %258, %261 : vector<15x256xi1>
    %263 = arith.andi %262, %256 : vector<15x256xi1>
    %264 = vector.broadcast %252 : i32 to vector<15x256xi32>
    %265 = arith.addi %254, %264 : vector<15x256xi32>
    %266 = arith.select %263, %265, %254 : vector<15x256xi1>, vector<15x256xi32>
    %cst_112 = arith.constant 0.000000e+00 : f32
    %267 = vector.broadcast %cst_112 : f32 to vector<15x256xf32>
    %268 = vector.broadcast %228 : vector<15x1xf32> to vector<15x256xf32>
    %269 = arith.addf %267, %268 : vector<15x256xf32>
    %c17_i32_113 = arith.constant 17 : i32
    %270 = tpu.dynamic_rotate %233 by %c17_i32_113 dim 1 : vector<15x256xf32>, i32 -> vector<15x256xf32>
    %271 = vector.extract_strided_slice %227 {offsets = [0, 0], sizes = [15, 1], strides = [1, 1]} : vector<15x9xf32> to vector<15x1xf32>
    %272 = vector.broadcast %271 : vector<15x1xf32> to vector<15x256xf32>
    %273 = arith.mulf %270, %272 : vector<15x256xf32>
    %c16_i32_114 = arith.constant 16 : i32
    %274 = vector.broadcast %c16_i32_114 : i32 to vector<15x256xi32>
    %275 = arith.cmpi sge, %250, %274 : vector<15x256xi32>
    %c1_i32_115 = arith.constant 1 : i32
    %276 = vector.broadcast %c1_i32_115 : i32 to vector<15x256xi32>
    %277 = arith.cmpi sge, %266, %276 : vector<15x256xi32>
    %278 = arith.andi %275, %277 : vector<15x256xi1>
    %cst_116 = arith.constant 0.000000e+00 : f32
    %279 = vector.broadcast %cst_116 : f32 to vector<15x256xf32>
    %280 = arith.select %278, %273, %279 : vector<15x256xi1>, vector<15x256xf32>
    %281 = arith.addf %269, %280 : vector<15x256xf32>
    %c16_i32_117 = arith.constant 16 : i32
    %282 = tpu.dynamic_rotate %233 by %c16_i32_117 dim 1 : vector<15x256xf32>, i32 -> vector<15x256xf32>
    %283 = vector.extract_strided_slice %227 {offsets = [0, 1], sizes = [15, 1], strides = [1, 1]} : vector<15x9xf32> to vector<15x1xf32>
    %284 = vector.broadcast %283 : vector<15x1xf32> to vector<15x256xf32>
    %285 = arith.mulf %282, %284 : vector<15x256xf32>
    %c16_i32_118 = arith.constant 16 : i32
    %286 = vector.broadcast %c16_i32_118 : i32 to vector<15x256xi32>
    %287 = arith.cmpi sge, %250, %286 : vector<15x256xi32>
    %cst_119 = arith.constant 0.000000e+00 : f32
    %288 = vector.broadcast %cst_119 : f32 to vector<15x256xf32>
    %289 = arith.select %287, %285, %288 : vector<15x256xi1>, vector<15x256xf32>
    %290 = arith.addf %281, %289 : vector<15x256xf32>
    %c15_i32_120 = arith.constant 15 : i32
    %291 = tpu.dynamic_rotate %233 by %c15_i32_120 dim 1 : vector<15x256xf32>, i32 -> vector<15x256xf32>
    %292 = vector.extract_strided_slice %227 {offsets = [0, 2], sizes = [15, 1], strides = [1, 1]} : vector<15x9xf32> to vector<15x1xf32>
    %293 = vector.broadcast %292 : vector<15x1xf32> to vector<15x256xf32>
    %294 = arith.mulf %291, %293 : vector<15x256xf32>
    %c16_i32_121 = arith.constant 16 : i32
    %295 = vector.broadcast %c16_i32_121 : i32 to vector<15x256xi32>
    %296 = arith.cmpi sge, %250, %295 : vector<15x256xi32>
    %c14_i32_122 = arith.constant 14 : i32
    %297 = vector.broadcast %c14_i32_122 : i32 to vector<15x256xi32>
    %298 = arith.cmpi sle, %266, %297 : vector<15x256xi32>
    %299 = arith.andi %296, %298 : vector<15x256xi1>
    %cst_123 = arith.constant 0.000000e+00 : f32
    %300 = vector.broadcast %cst_123 : f32 to vector<15x256xf32>
    %301 = arith.select %299, %294, %300 : vector<15x256xi1>, vector<15x256xf32>
    %302 = arith.addf %290, %301 : vector<15x256xf32>
    %c1_i32_124 = arith.constant 1 : i32
    %303 = tpu.dynamic_rotate %233 by %c1_i32_124 dim 1 : vector<15x256xf32>, i32 -> vector<15x256xf32>
    %304 = vector.extract_strided_slice %227 {offsets = [0, 3], sizes = [15, 1], strides = [1, 1]} : vector<15x9xf32> to vector<15x1xf32>
    %305 = vector.broadcast %304 : vector<15x1xf32> to vector<15x256xf32>
    %306 = arith.mulf %303, %305 : vector<15x256xf32>
    %c1_i32_125 = arith.constant 1 : i32
    %307 = vector.broadcast %c1_i32_125 : i32 to vector<15x256xi32>
    %308 = arith.cmpi sge, %266, %307 : vector<15x256xi32>
    %cst_126 = arith.constant 0.000000e+00 : f32
    %309 = vector.broadcast %cst_126 : f32 to vector<15x256xf32>
    %310 = arith.select %308, %306, %309 : vector<15x256xi1>, vector<15x256xf32>
    %311 = arith.addf %302, %310 : vector<15x256xf32>
    %312 = vector.extract_strided_slice %227 {offsets = [0, 4], sizes = [15, 1], strides = [1, 1]} : vector<15x9xf32> to vector<15x1xf32>
    %313 = vector.broadcast %312 : vector<15x1xf32> to vector<15x256xf32>
    %314 = arith.mulf %233, %313 : vector<15x256xf32>
    %315 = arith.addf %311, %314 : vector<15x256xf32>
    %c255_i32_127 = arith.constant 255 : i32
    %316 = tpu.dynamic_rotate %233 by %c255_i32_127 dim 1 : vector<15x256xf32>, i32 -> vector<15x256xf32>
    %317 = vector.extract_strided_slice %227 {offsets = [0, 5], sizes = [15, 1], strides = [1, 1]} : vector<15x9xf32> to vector<15x1xf32>
    %318 = vector.broadcast %317 : vector<15x1xf32> to vector<15x256xf32>
    %319 = arith.mulf %316, %318 : vector<15x256xf32>
    %c14_i32_128 = arith.constant 14 : i32
    %320 = vector.broadcast %c14_i32_128 : i32 to vector<15x256xi32>
    %321 = arith.cmpi sle, %266, %320 : vector<15x256xi32>
    %cst_129 = arith.constant 0.000000e+00 : f32
    %322 = vector.broadcast %cst_129 : f32 to vector<15x256xf32>
    %323 = arith.select %321, %319, %322 : vector<15x256xi1>, vector<15x256xf32>
    %324 = arith.addf %315, %323 : vector<15x256xf32>
    %c241_i32_130 = arith.constant 241 : i32
    %325 = tpu.dynamic_rotate %233 by %c241_i32_130 dim 1 : vector<15x256xf32>, i32 -> vector<15x256xf32>
    %326 = vector.extract_strided_slice %227 {offsets = [0, 6], sizes = [15, 1], strides = [1, 1]} : vector<15x9xf32> to vector<15x1xf32>
    %327 = vector.broadcast %326 : vector<15x1xf32> to vector<15x256xf32>
    %328 = arith.mulf %325, %327 : vector<15x256xf32>
    %c240_i32_131 = arith.constant 240 : i32
    %329 = vector.broadcast %c240_i32_131 : i32 to vector<15x256xi32>
    %330 = arith.cmpi slt, %250, %329 : vector<15x256xi32>
    %c1_i32_132 = arith.constant 1 : i32
    %331 = vector.broadcast %c1_i32_132 : i32 to vector<15x256xi32>
    %332 = arith.cmpi sge, %266, %331 : vector<15x256xi32>
    %333 = arith.andi %330, %332 : vector<15x256xi1>
    %cst_133 = arith.constant 0.000000e+00 : f32
    %334 = vector.broadcast %cst_133 : f32 to vector<15x256xf32>
    %335 = arith.select %333, %328, %334 : vector<15x256xi1>, vector<15x256xf32>
    %336 = arith.addf %324, %335 : vector<15x256xf32>
    %c240_i32_134 = arith.constant 240 : i32
    %337 = tpu.dynamic_rotate %233 by %c240_i32_134 dim 1 : vector<15x256xf32>, i32 -> vector<15x256xf32>
    %338 = vector.extract_strided_slice %227 {offsets = [0, 7], sizes = [15, 1], strides = [1, 1]} : vector<15x9xf32> to vector<15x1xf32>
    %339 = vector.broadcast %338 : vector<15x1xf32> to vector<15x256xf32>
    %340 = arith.mulf %337, %339 : vector<15x256xf32>
    %c240_i32_135 = arith.constant 240 : i32
    %341 = vector.broadcast %c240_i32_135 : i32 to vector<15x256xi32>
    %342 = arith.cmpi slt, %250, %341 : vector<15x256xi32>
    %cst_136 = arith.constant 0.000000e+00 : f32
    %343 = vector.broadcast %cst_136 : f32 to vector<15x256xf32>
    %344 = arith.select %342, %340, %343 : vector<15x256xi1>, vector<15x256xf32>
    %345 = arith.addf %336, %344 : vector<15x256xf32>
    %c239_i32_137 = arith.constant 239 : i32
    %346 = tpu.dynamic_rotate %233 by %c239_i32_137 dim 1 : vector<15x256xf32>, i32 -> vector<15x256xf32>
    %347 = vector.extract_strided_slice %227 {offsets = [0, 8], sizes = [15, 1], strides = [1, 1]} : vector<15x9xf32> to vector<15x1xf32>
    %348 = vector.broadcast %347 : vector<15x1xf32> to vector<15x256xf32>
    %349 = arith.mulf %346, %348 : vector<15x256xf32>
    %c240_i32_138 = arith.constant 240 : i32
    %350 = vector.broadcast %c240_i32_138 : i32 to vector<15x256xi32>
    %351 = arith.cmpi slt, %250, %350 : vector<15x256xi32>
    %c14_i32_139 = arith.constant 14 : i32
    %352 = vector.broadcast %c14_i32_139 : i32 to vector<15x256xi32>
    %353 = arith.cmpi sle, %266, %352 : vector<15x256xi32>
    %354 = arith.andi %351, %353 : vector<15x256xi1>
    %cst_140 = arith.constant 0.000000e+00 : f32
    %355 = vector.broadcast %cst_140 : f32 to vector<15x256xf32>
    %356 = arith.select %354, %349, %355 : vector<15x256xi1>, vector<15x256xf32>
    %357 = arith.addf %345, %356 : vector<15x256xf32>
    %cst_141 = arith.constant 0.000000e+00 : f32
    %358 = vector.broadcast %cst_141 : f32 to vector<15x256xf32>
    %359 = arith.maximumf %357, %358 : vector<15x256xf32>
    %cst_142 = arith.constant dense<0.000000e+00> : vector<3x256xf32>
    %360 = tpu.matmul %229, %359, %cst_142 {dimension_numbers = #tpu.dot_dimension_numbers<[1], [0], [0], [1], [0, 0, 1, 1], [], []>} : vector<3x15xf32>, vector<15x256xf32>, vector<3x256xf32> -> vector<3x256xf32>
    %361 = vector.broadcast %230 : vector<3x1xf32> to vector<3x256xf32>
    %362 = arith.addf %360, %361 : vector<3x256xf32>
    %c0_143 = arith.constant 0 : index
    %c0_144 = arith.constant 0 : index
    %c0_145 = arith.constant 0 : index
    %363 = vector.load %arg24[%c0_143, %c0_144, %c0_145] : memref<1x3x256xf32, #tpu.memory_space<vmem>>, vector<1x3x256xf32>
    %364 = vector.shape_cast %363 : vector<1x3x256xf32> to vector<3x256xf32>
    %365 = vector.shape_cast %362 : vector<3x256xf32> to vector<1x3x256xf32>
    tpu.vector_store %arg24[%c0_143, %c0_144, %c0_145], %365 {strides = array<i32>} : memref<1x3x256xf32, #tpu.memory_space<vmem>>, vector<1x3x256xf32>,
    return
  }
  func.func @transform_0(%arg0: i32) -> (i32, i32, i32) {
    %c0_i32 = arith.constant 0 : i32
    %c0_i32_0 = arith.constant 0 : i32
    %c0_i32_1 = arith.constant 0 : i32
    return %arg0, %c0_i32, %c0_i32_0 : i32, i32, i32
  }
  func.func @transform_1(%arg0: i32) -> (i32, i32) {
    %c0_i32 = arith.constant 0 : i32
    %c0_i32_0 = arith.constant 0 : i32
    %c0_i32_1 = arith.constant 0 : i32
    return %c0_i32, %c0_i32_0 : i32, i32
  }
  func.func @transform_2(%arg0: i32) -> (i32, i32) {
    %c0_i32 = arith.constant 0 : i32
    %c0_i32_0 = arith.constant 0 : i32
    %c0_i32_1 = arith.constant 0 : i32
    return %c0_i32, %c0_i32_0 : i32, i32
  }
  func.func @transform_3(%arg0: i32) -> (i32, i32) {
    %c0_i32 = arith.constant 0 : i32
    %c0_i32_0 = arith.constant 0 : i32
    %c0_i32_1 = arith.constant 0 : i32
    return %c0_i32, %c0_i32_0 : i32, i32
  }
  func.func @transform_4(%arg0: i32) -> (i32, i32) {
    %c0_i32 = arith.constant 0 : i32
    %c0_i32_0 = arith.constant 0 : i32
    %c0_i32_1 = arith.constant 0 : i32
    return %c0_i32, %c0_i32_0 : i32, i32
  }
  func.func @transform_5(%arg0: i32) -> (i32, i32) {
    %c0_i32 = arith.constant 0 : i32
    %c0_i32_0 = arith.constant 0 : i32
    %c0_i32_1 = arith.constant 0 : i32
    return %c0_i32, %c0_i32_0 : i32, i32
  }
  func.func @transform_6(%arg0: i32) -> (i32, i32) {
    %c0_i32 = arith.constant 0 : i32
    %c0_i32_0 = arith.constant 0 : i32
    %c0_i32_1 = arith.constant 0 : i32
    return %c0_i32, %c0_i32_0 : i32, i32
  }
  func.func @transform_7(%arg0: i32) -> (i32, i32) {
    %c0_i32 = arith.constant 0 : i32
    %c0_i32_0 = arith.constant 0 : i32
    %c0_i32_1 = arith.constant 0 : i32
    return %c0_i32, %c0_i32_0 : i32, i32
  }
  func.func @transform_8(%arg0: i32) -> (i32, i32) {
    %c0_i32 = arith.constant 0 : i32
    %c0_i32_0 = arith.constant 0 : i32
    %c0_i32_1 = arith.constant 0 : i32
    return %c0_i32, %c0_i32_0 : i32, i32
  }
  func.func @transform_9(%arg0: i32) -> (i32, i32) {
    %c0_i32 = arith.constant 0 : i32
    %c0_i32_0 = arith.constant 0 : i32
    %c0_i32_1 = arith.constant 0 : i32
    return %c0_i32, %c0_i32_0 : i32, i32
  }
  func.func @transform_10(%arg0: i32) -> (i32, i32) {
    %c0_i32 = arith.constant 0 : i32
    %c0_i32_0 = arith.constant 0 : i32
    %c0_i32_1 = arith.constant 0 : i32
    return %c0_i32, %c0_i32_0 : i32, i32
  }
  func.func @transform_11(%arg0: i32) -> (i32, i32) {
    %c0_i32 = arith.constant 0 : i32
    %c0_i32_0 = arith.constant 0 : i32
    %c0_i32_1 = arith.constant 0 : i32
    return %c0_i32, %c0_i32_0 : i32, i32
  }
  func.func @transform_12(%arg0: i32) -> (i32, i32) {
    %c0_i32 = arith.constant 0 : i32
    %c0_i32_0 = arith.constant 0 : i32
    %c0_i32_1 = arith.constant 0 : i32
    return %c0_i32, %c0_i32_0 : i32, i32
  }
  func.func @transform_13(%arg0: i32) -> (i32, i32) {
    %c0_i32 = arith.constant 0 : i32
    %c0_i32_0 = arith.constant 0 : i32
    %c0_i32_1 = arith.constant 0 : i32
    return %c0_i32, %c0_i32_0 : i32, i32
  }
  func.func @transform_14(%arg0: i32) -> (i32, i32) {
    %c0_i32 = arith.constant 0 : i32
    %c0_i32_0 = arith.constant 0 : i32
    %c0_i32_1 = arith.constant 0 : i32
    return %c0_i32, %c0_i32_0 : i32, i32
  }
  func.func @transform_15(%arg0: i32) -> (i32, i32) {
    %c0_i32 = arith.constant 0 : i32
    %c0_i32_0 = arith.constant 0 : i32
    %c0_i32_1 = arith.constant 0 : i32
    return %c0_i32, %c0_i32_0 : i32, i32
  }
  func.func @transform_16(%arg0: i32) -> (i32, i32) {
    %c0_i32 = arith.constant 0 : i32
    %c0_i32_0 = arith.constant 0 : i32
    %c0_i32_1 = arith.constant 0 : i32
    return %c0_i32, %c0_i32_0 : i32, i32
  }
  func.func @transform_17(%arg0: i32) -> (i32, i32) {
    %c0_i32 = arith.constant 0 : i32
    %c0_i32_0 = arith.constant 0 : i32
    %c0_i32_1 = arith.constant 0 : i32
    return %c0_i32, %c0_i32_0 : i32, i32
  }
  func.func @transform_18(%arg0: i32) -> (i32, i32) {
    %c0_i32 = arith.constant 0 : i32
    %c0_i32_0 = arith.constant 0 : i32
    %c0_i32_1 = arith.constant 0 : i32
    return %c0_i32, %c0_i32_0 : i32, i32
  }
  func.func @transform_19(%arg0: i32) -> (i32, i32) {
    %c0_i32 = arith.constant 0 : i32
    %c0_i32_0 = arith.constant 0 : i32
    %c0_i32_1 = arith.constant 0 : i32
    return %c0_i32, %c0_i32_0 : i32, i32
  }
  func.func @transform_20(%arg0: i32) -> (i32, i32) {
    %c0_i32 = arith.constant 0 : i32
    %c0_i32_0 = arith.constant 0 : i32
    %c0_i32_1 = arith.constant 0 : i32
    return %c0_i32, %c0_i32_0 : i32, i32
  }
  func.func @transform_21(%arg0: i32) -> (i32, i32) {
    %c0_i32 = arith.constant 0 : i32
    %c0_i32_0 = arith.constant 0 : i32
    %c0_i32_1 = arith.constant 0 : i32
    return %c0_i32, %c0_i32_0 : i32, i32
  }
  func.func @transform_22(%arg0: i32) -> (i32, i32) {
    %c0_i32 = arith.constant 0 : i32
    %c0_i32_0 = arith.constant 0 : i32
    %c0_i32_1 = arith.constant 0 : i32
    return %c0_i32, %c0_i32_0 : i32, i32
  }
  func.func @transform_23(%arg0: i32) -> (i32, i32, i32) {
    %c0_i32 = arith.constant 0 : i32
    %c0_i32_0 = arith.constant 0 : i32
    %c0_i32_1 = arith.constant 0 : i32
    return %arg0, %c0_i32, %c0_i32_0 : i32, i32, i32
  }
}

</mosaic_0001>

<bundles_post_ra>
// kernel: light_generator_layer.5
= control target key start
LH: loop header
LB: loop body
LE: loop exit
PB: predicated region body
PF: predicated region fallthrough
CT: control target
= control target key end

     0   :  { %s468_s15 = smov 0   ;;  %s507_s0 = inlined_call_operand.vmem [shape: f32[2,3,256], index: 0, kind: input, shape index: {}]   ;;  %s508_s1 = inlined_call_operand.vmem [shape: f32[12,3], index: 1, kind: input, shape index: {}]   ;;  %s509_s2 = inlined_call_operand.vmem [shape: f32[12,1], index: 2, kind: input, shape index: {}]   ;;  %s510_s3 = inlined_call_operand.vmem [shape: f32[12,1], index: 3, kind: input, shape index: {}]   ;;  %s511_s4 = inlined_call_operand.vmem [shape: f32[2,12,256], index: 4, kind: output, shape index: {}]  }
   0x1 LB: > { %s401_s16 = sadd.s32 4294967295, %s439_s15   ;;  %p405_p0 = scmp.ge.s32.totalorder %s439_s15, 1  ;;  %s439_s15 = sphi %s468_s15, %s14_s15  }
   0x2   : > { %p162_p1 = scmp.lt.s32.totalorder %s439_s15, 3 }
   0x4   : > { %p163_p2 = pnand %p405_p0, %p162_p1 }
   0x5   : > { %p188_p3 = scmp.lt.s32.totalorder (!%p163_p2), %s401_s16, 1 }
   0x6   : > { %166 = sbr.rel (%p163_p2) target bundleno = 220 (0xdc), region = 36 }
   0xb   : > { %v441_v0 = vmov 0.0   ;;  %v222_v1 = vld [vmem:[%s509_s2] sm:$0xff]  ;;  %s513_s16 = smov (!%p188_p3, %s401_s16), 1  ;;  %v442_v3 = vmov 0   ;;  %v223_v4 = vld [vmem:[%s509_s2 + $0x8] sm:$0xf] }
   0xc   : > { %313 = vmatprep.mubr.f32.mxu0 %v441_v0  ;;  %319 = vmatprep.mubr.f32.mxu1 %v441_v0  ;;  %v326_v2 = vld [vmem:[%s510_s3] sm:$0xff]  ;;  %s416_s21 = sshll.u32 %s513_s16, 3  ;;  %v327_v5 = vld [vmem:[%s510_s3 + $0x8] sm:$0xf]  ;;  %vm202_vm0 = vcmask 1042432   ;;  %vm238_vm1 = vcmask 23552  }
   0xd   : > { %430 = vset.pattern.permute.xlu0 %v442_v3  ;;  %431 = vset.pattern.permute.xlu1 %v442_v3  ;;  %s192_s28 = scalar_lea.vmem %s507_s0, %s416_s21  ;;  %v220_v9 = vld [vmem:[%s508_s1] sm:$0xff]  ;;  %v221_v10 = vld [vmem:[%s508_s1 + $0x8] sm:$0xf]  ;;  %s417_s7 = sshll.u32 %s513_s16, 5 }
   0xe   : > { %226 = vperm.xlu0 %430, %v222_v1   ;;  %330 = vperm.xlu1 %431, %v326_v2   ;;  %v198_v6 = vld [vmem:[%s192_s28] sm:$0x77]  ;;  %s197_s10 = scalar_lea.vmem %s511_s4, %s417_s7 }
   0xf   : > { %v200_v7 = vcombine.high %v198_v6, %v198_v6  ;;  %v203_v8 = vsel %vm202_vm0, %v198_v6, 0.0 }
  0x10   : > { %v204_v12 = vrot.slane %v203_v8, 4 }
  0x11   : > { %v210_v11 = vsel %vm202_vm0, %v200_v7, 0.0  ;;  %410 = vmatprep.subr.msk.mxu0 %vm202_vm0, %v200_v7  ;;  %418 = vmatprep.subr.msk.mxu1 %vm202_vm0, %v200_v7 }
  0x12   : > { %231 = vperm.xlu0 %430, %v223_v4   ;;  %335 = vperm.xlu1 %431, %v327_v5   ;;  %v211_v13 = vrot.slane %v210_v11, 4  ;;  %v205_v14 = vadd.f32 %v204_v12, %v203_v8 }
  0x13   : > { %411 = vmatpush1.msk.msra.mxu0 %vm202_vm0, %v198_v6  ;;  %419 = vmatpush1.msk.msra.mxu1 %vm202_vm0, %v198_v6 }
  0x14   : > { %412 = vmatmul.mubr.msk.f32.vlgmr.msra.gmra.mxu0 %vm238_vm1, %v220_v9  ;;  %413 = vmatmul.mubr.msk.f32.vlgmr.msra.gmra.mxu1 %vm238_vm1, %v221_v10  ;;  %v212_v15 = vadd.f32 %v211_v13, %v210_v11  ;;  %v206_v16 = vrot.slane %v205_v14, 2 }
  0x16   : > { %v213_v17 = vrot.slane %v212_v15, 2  ;;  %v207_v18 = vadd.f32 %v206_v16, %v205_v14 }
  0x18   : > { %v214_v19 = vadd.f32 %v213_v17, %v212_v15  ;;  %v208_v20 = vrot.slane %v207_v18, 1 }
  0x1a   : > { %v215_v21 = vrot.slane %v214_v19, 1  ;;  %v209_v23 = vadd.f32 %v208_v20, %v207_v18 }
  0x1c   : > { %v216_v24 = vadd.f32 %v215_v21, %v214_v19  ;;  %v218_v25 = vmul.f32 0.33333334, %v209_v23 }
  0x1e   : > { %v219_v28 = vmul.f32 0.33333334, %v216_v24 }
  0x89   : > { %v227_v22 = vpop.permute.xlu0 %226  ;;  %v331_v26 = vpop.permute.xlu1 %330 }
  0x8a   : > { %v234_v29 = vmul.f32 %v227_v22, %v218_v25  ;;  %v235_v33 = vmul.f32 %v227_v22, %v219_v28 }
  0x8d   : > { %v232_v27 = vpop.permute.xlu0 %231  ;;  %v336_v35 = vpop.permute.xlu1 %335 }
  0x8e   : > { %v236_v30 = vmul.f32 %v232_v27, %v218_v25  ;;  %v237_v34 = vmul.f32 %v232_v27, %v219_v28 }
  0xd4   : > { %v315_v31 = vpop.f32.mrf.mxu0  ;;  %v321_v32 = vpop.f32.mrf.mxu1 }
  0xd5   : > { %v316_v36 = vadd.f32 %v315_v31, %v234_v29  ;;  %v322_v37 = vadd.f32 %v321_v32, %v236_v30 }
  0xd6   : > { %v317_v38 = vpop.f32.mrf.mxu0  ;;  %v323_v39 = vpop.f32.mrf.mxu1 }
  0xd7   : > { %v338_v40 = vadd.f32 %v331_v26, %v316_v36  ;;  %v340_v41 = vadd.f32 %v336_v35, %v322_v37  ;;  %v318_v42 = vadd.f32 %v317_v38, %v235_v33  ;;  %v324_v43 = vadd.f32 %v323_v39, %v237_v34 }
  0xd9   : > { %342 = vst [vmem:[%s197_s10] sm:$0xff] %v338_v40  ;;  %344 = vst [vmem:[%s197_s10 + $0x10] sm:$0xf] %v340_v41  ;;  %v339_v44 = vadd.f32 %v331_v26, %v318_v42  ;;  %v341_v45 = vadd.f32 %v336_v35, %v324_v43 }
  0xdb   : > { %343 = vst [vmem:[%s197_s10 + $0x8] sm:$0xff] %v339_v44  ;;  %345 = vst [vmem:[%s197_s10 + $0x18] sm:$0xf] %v341_v45 }
  0xdc PF: > { %s14_s15 = sadd.s32 1, %s439_s15  }
  0xdd   : > { %p11_p4 = scmp.ge.s32.totalorder %s14_s15, 4  }
  0xdf   :  { %13 = sbr.rel (!%p11_p4) target bundleno = 1 (0x1), region = 66 }

// kernel: light_generator_layer.6
= control target key start
LH: loop header
LB: loop body
LE: loop exit
PB: predicated region body
PF: predicated region fallthrough
CT: control target
= control target key end

     0   :  { %s451_s15 = smov 0   ;;  %s481_s0 = inlined_call_operand.vmem [shape: f32[2,12,256], index: 0, kind: input, shape index: {}]   ;;  %s482_s1 = inlined_call_operand.vmem [shape: f32[2,3,256], index: 1, kind: input, shape index: {}]   ;;  %s483_s2 = inlined_call_operand.vmem [shape: f32[3,12], index: 2, kind: input, shape index: {}]   ;;  %s484_s3 = inlined_call_operand.vmem [shape: f32[3,1], index: 3, kind: input, shape index: {}]   ;;  %s485_s4 = inlined_call_operand.vmem [shape: f32[2,3,256], index: 4, kind: output, shape index: {}]  }
   0x1 LB: > { %s386_s16 = sadd.s32 4294967295, %s422_s15   ;;  %p390_p0 = scmp.ge.s32.totalorder %s422_s15, 1  ;;  %s422_s15 = sphi %s451_s15, %s14_s15  }
   0x2   : > { %p172_p1 = scmp.lt.s32.totalorder %s422_s15, 3 }
   0x4   : > { %p173_p2 = pnand %p390_p0, %p172_p1 }
   0x5   : > { %p203_p3 = scmp.lt.s32.totalorder (!%p173_p2), %s386_s16, 1 }
   0x6   : > { %176 = sbr.rel (%p173_p2) target bundleno = 223 (0xdf), region = 36 }
   0xb   : > { %v424_v0 = vmov 0.0   ;;  %v224_v1 = vld [vmem:[%s484_s3] sm:$0x7]  ;;  %s487_s16 = smov (!%p203_p3, %s386_s16), 1  ;;  %v425_v2 = vmov 0   ;;  %vm234_vm0 = vcmask 1043456  }
   0xc   : > { %305 = vmatprep.mubr.f32.mxu0 %v424_v0  ;;  %415 = vset.pattern.permute.xlu0 %v425_v2  ;;  %s402_s19 = sshll.u32 %s487_s16, 5  ;;  %v223_v7 = vld [vmem:[%s483_s2] sm:$0x7]  ;;  %vm230_vm1 = vcmask 97280   ;;  %s403_s25 = sshll.u32 %s487_s16, 3 }
   0xd   : > { %227 = vperm.xlu0 %415, %v224_v1   ;;  %s207_s22 = scalar_lea.vmem %s481_s0, %s402_s19  ;;  %s212_s28 = scalar_lea.vmem %s482_s1, %s403_s25 }
   0xe   : > { %v221_v3 = vld [vmem:[%s207_s22 + $0x18] sm:$0xf]  ;;  %v220_v4 = vld [vmem:[%s207_s22 + $0x10] sm:$0xf]  ;;  %v219_v5 = vld [vmem:[%s207_s22 + $0x8] sm:$0xff]  ;;  %s217_s5 = scalar_lea.vmem %s485_s4, %s403_s25 }
   0xf   : > { %397 = vmatprep.subr.msk.mxu0 %vm234_vm0, %v221_v3  ;;  %v218_v6 = vld [vmem:[%s207_s22] sm:$0xff] }
  0x10   : > { %398 = vmatpush1.msk.msra.mxu0 %vm234_vm0, %v220_v4  ;;  %v222_v13 = vld [vmem:[%s212_s28] sm:$0x77] }
  0x11   : > { %271 = vmatprep.subr.mxu0 %v219_v5 }
  0x12   : > { %272 = vmatpush1.msra.mxu0 %v218_v6 }
  0x13   : > { %399 = vmatmul.mubr.msk.f32.vlgmr.msra.gmra.mxu0 %vm230_vm1, %v223_v7 }
  0x88   : > { %v228_v8 = vpop.permute.xlu0 %227 }
  0xd3   : > { %v307_v9 = vpop.f32.mrf.mxu0 }
  0xd4   : > { %v308_v11 = vadd.f32 %v307_v9, %v228_v8 }
  0xd5   : > { %v309_v10 = vpop.f32.mrf.mxu0 }
  0xd6   : > { %v310_v12 = vadd.f32 %v309_v10, %v228_v8 }
  0xd8   : > { %v314_v14 = vcombine.low %v308_v11, %v310_v12 }
  0xda   : > { %v316_v15 = vmul.f32 %v314_v14, %v222_v13 }
  0xdc   : > { %v317_v16 = vadd.f32 %v316_v15, %v222_v13 }
  0xde   : > { %318 = vst [vmem:[%s217_s5] sm:$0x77] %v317_v16 }
  0xdf PF: > { %s14_s15 = sadd.s32 1, %s422_s15  }
  0xe0   : > { %p11_p4 = scmp.ge.s32.totalorder %s14_s15, 4  }
  0xe2   :  { %13 = sbr.rel (!%p11_p4) target bundleno = 1 (0x1), region = 69 }

// kernel: light_generator_layer.7
= control target key start
LH: loop header
LB: loop body
LE: loop exit
PB: predicated region body
PF: predicated region fallthrough
CT: control target
= control target key end

     0   :  { %s676_s24 = smov 0   ;;  %s739_s0 = inlined_call_operand.vmem [shape: f32[2,12,64], index: 0, kind: input, shape index: {}]   ;;  %s740_s1 = inlined_call_operand.vmem [shape: f32[12,1], index: 1, kind: input, shape index: {}]   ;;  %s741_s2 = inlined_call_operand.vmem [shape: f32[12,1], index: 2, kind: input, shape index: {}]   ;;  %s742_s3 = inlined_call_operand.vmem [shape: f32[12,12], index: 3, kind: input, shape index: {}]   ;;  %s743_s4 = inlined_call_operand.vmem [shape: f32[12,1], index: 4, kind: input, shape index: {}]   ;;  %s744_s5 = inlined_call_operand.vmem [shape: f32[2,12,64], index: 5, kind: input, shape index: {}]   ;;  %s745_s6 = inlined_call_operand.vmem [shape: f32[2,12,64], index: 6, kind: output, shape index: {0}]   ;;  %s746_s7 = inlined_call_operand.vmem [shape: f32[2,12,64], index: 7, kind: output, shape index: {1}]  }
   0x1 LB: > { %s581_s25 = sadd.s32 4294967295, %s633_s24   ;;  %p585_p0 = scmp.ge.s32.totalorder %s633_s24, 1  ;;  %s633_s24 = sphi %s676_s24, %s18_s24  }
   0x2   : > { %p250_p1 = scmp.lt.s32.totalorder %s633_s24, 3 }
   0x4   : > { %p251_p2 = pnand %p585_p0, %p250_p1 }
   0x5   : > { %p292_p3 = scmp.lt.s32.totalorder (!%p251_p2), %s581_s25, 1 }
   0x6   : > { %254 = sbr.rel (%p251_p2) target bundleno = 347 (0x15b), region = 44 }
   0xb   : > { %v317_v0 = vld [vmem:[%s741_s2 + $0x8] sm:$0xf]  ;;  %v635_v2 = vmov 0   ;;  %v316_v3 = vld [vmem:[%s741_s2] sm:$0xff]  ;;  %vm387_vm0 = vcmask 97280   ;;  %s748_s25 = smov (!%p292_p3, %s581_s25), 1 }
   0xc   : > { %v315_v1 = vld [vmem:[%s740_s1 + $0x8] sm:$0xf]  ;;  %624 = vset.pattern.permute.xlu1 %v635_v2  ;;  %623 = vset.pattern.permute.xlu0 %v635_v2  ;;  %v314_v4 = vld [vmem:[%s740_s1] sm:$0xff]  ;;  %s706_s17 = sshll.u32 %s748_s25, 4  ;;  %vm318_vm1 = vcmask 523264   ;;  %vm320_vm2 = vcmask 519168  }
   0xd   : > { %368 = vperm.xlu1 %624, %v317_v0   ;;  %356 = vperm.xlu0 %623, %v315_v1   ;;  %v373_v5 = vld [vmem:[%s742_s3] sm:$0xff]  ;;  %v376_v6 = vld [vmem:[%s743_s4 + $0x8] sm:$0xf]  ;;  %s296_s20 = scalar_lea.vmem %s739_s0, %s706_s17  ;;  %s306_s23 = scalar_lea.vmem %s745_s6, %s706_s17  ;;  %vm394_vm3 = vcmask 1043456  }
   0xe   : > { %v375_v7 = vld [vmem:[%s743_s4] sm:$0xff]  ;;  %611 = vmatprep.mubr.msk.f32.mxu0 %vm387_vm0, %v373_v5  ;;  %v313_v9 = vld [vmem:[%s296_s20 + $0x8] sm:$0xf]  ;;  %s301_s29 = scalar_lea.vmem %s744_s5, %s706_s17  ;;  %s311_s9 = scalar_lea.vmem %s746_s7, %s706_s17 }
   0xf   : > { %v312_v8 = vld [vmem:[%s296_s20] sm:$0xff]  ;;  %v321_v11 = vsel %vm320_vm2, %v313_v9, 0.0  ;;  %v374_v46 = vld [vmem:[%s742_s3 + $0x8] sm:$0xf] }
  0x10   : > { %v319_v10 = vsel %vm318_vm1, %v312_v8, 0.0  ;;  %v474_v49 = vld [vmem:[%s301_s29 + $0x8] sm:$0xf]  ;;  %v473_v53 = vld [vmem:[%s301_s29] sm:$0xff] }
  0x11   : > { %363 = vperm.xlu1 %624, %v316_v3   ;;  %351 = vperm.xlu0 %623, %v314_v4   ;;  %v322_v12 = vadd.f32 %v321_v11, %v319_v10 }
  0x13   : > { %v323_v13 = vrot.slane %v322_v12, 4 }
  0x15   : > { %384 = vperm.xlu1 %624, %v376_v6   ;;  %379 = vperm.xlu0 %623, %v375_v7   ;;  %v324_v14 = vadd.f32 %v323_v13, %v322_v12 }
  0x17   : > { %v325_v15 = vrot.slane %v324_v14, 2 }
  0x19   : > { %v326_v16 = vadd.f32 %v325_v15, %v324_v14 }
  0x1b   : > { %v327_v17 = vrot.slane %v326_v16, 1 }
  0x1d   : > { %v328_v18 = vadd.f32 %v327_v17, %v326_v16 }
  0x1f   : > { %v330_v19 = vmul.f32 0.083333336, %v328_v18 }
  0x21   : > { %v331_v20 = vsub.f32 %v312_v8, %v330_v19  ;;  %v332_v21 = vsub.f32 %v313_v9, %v330_v19 }
  0x23   : > { %v333_v22 = vmul.f32 %v331_v20, %v331_v20  ;;  %v334_v23 = vmul.f32 %v332_v21, %v332_v21 }
  0x25   : > { %v335_v24 = vsel %vm318_vm1, %v333_v22, 0.0  ;;  %v336_v25 = vsel %vm320_vm2, %v334_v23, 0.0 }
  0x26   : > { %v337_v26 = vadd.f32 %v336_v25, %v335_v24 }
  0x28   : > { %v338_v27 = vrot.slane %v337_v26, 4 }
  0x2a   : > { %v339_v28 = vadd.f32 %v338_v27, %v337_v26 }
  0x2c   : > { %v340_v29 = vrot.slane %v339_v28, 2 }
  0x2e   : > { %v341_v30 = vadd.f32 %v340_v29, %v339_v28 }
  0x30   : > { %v342_v31 = vrot.slane %v341_v30, 1 }
  0x32   : > { %v343_v32 = vadd.f32 %v342_v31, %v341_v30 }
  0x34   : > { %v344_v33 = vmul.f32 0.083333336, %v343_v32 }
  0x36   : > { %v345_v34 = vadd.f32 1e-05, %v344_v33 }
  0x38   : > { %625 = vrsqrt.f32 %v345_v34 }
  0x45   : > { %v626_v35 = vpop.eup %625 }
  0x46   : > { %v348_v36 = vmul.f32 %v626_v35, %v332_v21  ;;  %v347_v40 = vmul.f32 %v626_v35, %v331_v20 }
  0x88   : > { %v369_v37 = vpop.permute.xlu1 %368  ;;  %v357_v38 = vpop.permute.xlu0 %356 }
  0x89   : > { %v360_v39 = vmul.f32 %v357_v38, %v348_v36 }
  0x8b   : > { %v372_v41 = vadd.f32 %v369_v37, %v360_v39 }
  0x8c   : > { %v352_v42 = vpop.permute.xlu0 %351  ;;  %v364_v44 = vpop.permute.xlu1 %363 }
  0x8d   : > { %478 = vst.msk [vmem:[%s306_s23 + $0x8] sm:$0xf] %vm320_vm2, %v372_v41  ;;  %v359_v43 = vmul.f32 %v352_v42, %v347_v40  ;;  %607 = vmatprep.subr.msk.mxu0 %vm394_vm3, %v372_v41 }
  0x8e   : > { %608 = vmatpush3.msk.msra.mxu0 %vm394_vm3, %v372_v41 }
  0x8f   : > { %v371_v45 = vadd.f32 %v364_v44, %v359_v43 }
  0x90   : > { %v385_v47 = vpop.permute.xlu1 %384  ;;  %v380_v51 = vpop.permute.xlu0 %379 }
  0x91   : > { %477 = vst.msk [vmem:[%s306_s23] sm:$0xff] %vm318_vm1, %v371_v45  ;;  %609 = vmatprep.subr.mxu0 %v371_v45 }
  0x92   : > { %610 = vmatpush3.msra.mxu0 %v371_v45 }
  0x93   : > { %612 = vmatmul.mubr.msk.f32.vlgmr.msra.gmra.mxu0 %vm387_vm0, %v374_v46 }
 0x153   : > { %v613_v48 = vpop.f32.mrf.mxu0 }
 0x154   : > { %v470_v50 = vadd.f32 %v613_v48, %v385_v47 }
 0x155   : > { %v464_v52 = vpop.f32.mrf.mxu0 }
 0x156   : > { %v476_v54 = vmul.f32 %v474_v49, %v470_v50  ;;  %v465_v55 = vadd.f32 %v464_v52, %v380_v51 }
 0x158   : > { %480 = vst.msk [vmem:[%s311_s9 + $0x8] sm:$0xf] %vm320_vm2, %v476_v54  ;;  %v475_v56 = vmul.f32 %v473_v53, %v465_v55 }
 0x15a   : > { %479 = vst.msk [vmem:[%s311_s9] sm:$0xff] %vm318_vm1, %v475_v56 }
 0x15b PF: > { %s18_s24 = sadd.s32 1, %s633_s24  }
 0x15c   : > { %p15_p4 = scmp.ge.s32.totalorder %s18_s24, 4  }
 0x15e   :  { %17 = sbr.rel (!%p15_p4) target bundleno = 1 (0x1), region = 89 }

// kernel: light_generator_layer.8
= control target key start
LH: loop header
LB: loop body
LE: loop exit
PB: predicated region body
PF: predicated region fallthrough
CT: control target
= control target key end

     0   :  { %v571_v0 = vmov 0   ;;  %vm112_vm0 = vcmask 97280   ;;  %v572_v10 = vmov 1   ;;  %v573_v12 = vmov 2   ;;  %s580_s10 = smov 1   ;;  %s581_s11 = smov 9   ;;  %s836_s2 = inlined_call_operand.vmem [shape: f32[12,1], index: 2, kind: input, shape index: {}]   ;;  %s837_s1 = inlined_call_operand.vmem [shape: f32[12,1], index: 1, kind: input, shape index: {}]   ;;  %s838_s4 = inlined_call_operand.vmem [shape: f32[12,1], index: 4, kind: input, shape index: {}]   ;;  %s839_s3 = inlined_call_operand.vmem [shape: f32[12,12], index: 3, kind: input, shape index: {}]   ;;  %s840_s5 = inlined_call_operand.vmem [shape: f32[12,9], index: 5, kind: input, shape index: {}]   ;;  %s841_s6 = inlined_call_operand.vmem [shape: f32[12,1], index: 6, kind: input, shape index: {}]   ;;  %s842_s0 = inlined_call_operand.vmem [shape: f32[12,128], index: 0, kind: input, shape index: {}]   ;;  %s843_s8 = inlined_call_operand.vmem [shape: f32[12,1], index: 8, kind: input, shape index: {}]   ;;  %s844_s7 = inlined_call_operand.vmem [shape: f32[12,12], index: 7, kind: input, shape index: {}]   ;;  %s845_s9 = inlined_call_operand.vmem [shape: f32[12,128], index: 9, kind: output, shape index: {}]  }
   0x1   :  { %551 = vset.pattern.permute.xlu1 %v571_v0  ;;  %550 = vset.pattern.permute.xlu0 %v571_v0  ;;  %v37_v1 = vld [vmem:[%s836_s2 + $0x8] sm:$0xf]  ;;  %v36_v3 = vld [vmem:[%s836_s2] sm:$0xff]  ;;  %vm38_vm1 = vcmask 1043456   ;;  %v574_v18 = vmov 3   ;;  %v575_v20 = vmov 4  }
   0x2   :  { %v35_v2 = vld [vmem:[%s837_s1 + $0x8] sm:$0xf]  ;;  %85 = vperm.xlu1 %551, %v37_v1   ;;  %v34_v4 = vld [vmem:[%s837_s1] sm:$0xff]  ;;  %v576_v22 = vmov 5   ;;  %v577_v25 = vmov 6   ;;  %v578_v27 = vmov 7  }
   0x3   :  { %73 = vperm.xlu0 %550, %v35_v2   ;;  %v90_v5 = vld [vmem:[%s839_s3] sm:$0xff]  ;;  %v93_v7 = vld [vmem:[%s838_s4 + $0x8] sm:$0xf]  ;;  %v579_v30 = vmov 8   ;;  %s582_s12 = smov 8   ;;  %s584_s13 = smov 121  }
   0x4   :  { %v92_v6 = vld [vmem:[%s838_s4] sm:$0xff]  ;;  %523 = vmatprep.mubr.msk.f32.mxu0 %vm112_vm0, %v90_v5  ;;  %v95_v9 = vld [vmem:[%s840_s5 + $0x8] sm:$0xf]  ;;  %s585_s14 = smov 127   ;;  %s586_s15 = smov 120  }
   0x5   :  { %v665_v8 = vld [vmem:[%s840_s5] sm:$0xff]  ;;  %v97_v11 = vld [vmem:[%s841_s6 + $0x8] sm:$0xf]  ;;  %s587_s16 = smov 119  }
   0x6   :  { %80 = vperm.xlu1 %551, %v36_v3   ;;  %v677_v13 = vld [vmem:[%s842_s0 + $0x8] sm:$0xf]  ;;  %v683_v14 = vld [vmem:[%s842_s0] sm:$0xff] }
   0x7   :  { %68 = vperm.xlu0 %550, %v34_v4   ;;  %v39_v15 = vsel %vm38_vm1, %v677_v13, 0.0  ;;  %v96_v16 = vld [vmem:[%s841_s6] sm:$0xff]  ;;  %v91_v56 = vld [vmem:[%s839_s3 + $0x8] sm:$0xf]  ;;  %s583_s3 = smov 7  }
   0x8   :  { %v40_v17 = vadd.f32 %v39_v15, %v683_v14  ;;  %v101_v63 = vld [vmem:[%s843_s8 + $0x8] sm:$0xf]  ;;  %v98_v1 = vld [vmem:[%s844_s7] sm:$0xff] }
   0x9   :  { %530 = vmatprep.mubr.msk.f32.mxu1 %vm112_vm0, %v98_v1 }
   0xa   :  { %104 = vperm.xlu1 %551, %v92_v6   ;;  %v41_v19 = vrot.slane %v40_v17, 4 }
   0xb   :  { %109 = vperm.xlu0 %550, %v93_v7  }
   0xc   :  { %v42_v21 = vadd.f32 %v41_v19, %v40_v17 }
   0xe   :  { %241 = vperm.xlu1 %551, %v665_v8   ;;  %v43_v23 = vrot.slane %v42_v21, 2 }
   0xf   :  { %552 = vset.pattern.permute.xlu0 %v572_v10 }
  0x10   :  { %267 = vperm.xlu0 %552, %v95_v9   ;;  %v44_v24 = vadd.f32 %v43_v23, %v42_v21  ;;  %v197_v23 = vlaneseq }
  0x12   :  { %230 = vperm.xlu1 %551, %v97_v11   ;;  %v45_v26 = vrot.slane %v44_v24, 1 }
  0x14   :  { %554 = vset.pattern.permute.xlu0 %v573_v12  ;;  %v46_v28 = vadd.f32 %v45_v26, %v44_v24 }
  0x15   :  { %285 = vperm.xlu0 %554, %v95_v9  }
  0x16   :  { %553 = vset.pattern.permute.xlu1 %v572_v10  ;;  %v48_v29 = vmul.f32 0.083333336, %v46_v28 }
  0x17   :  { %263 = vperm.xlu1 %553, %v665_v8  }
  0x18   :  { %v50_v31 = vsub.f32 %v677_v13, %v48_v29  ;;  %v49_v32 = vsub.f32 %v683_v14, %v48_v29 }
  0x19   :  { %281 = vperm.xlu0 %554, %v665_v8  }
  0x1a   :  { %v52_v33 = vmul.f32 %v50_v31, %v50_v31  ;;  %v51_v34 = vmul.f32 %v49_v32, %v49_v32 }
  0x1b   :  { %555 = vset.pattern.permute.xlu1 %v571_v0 }
  0x1c   :  { %225 = vperm.xlu1 %555, %v96_v16   ;;  %v53_v35 = vsel %vm38_vm1, %v52_v33, 0.0 }
  0x1d   :  { %557 = vset.pattern.permute.xlu0 %v574_v18  ;;  %v54_v36 = vadd.f32 %v53_v35, %v51_v34 }
  0x1e   :  { %301 = vperm.xlu0 %557, %v665_v8  }
  0x1f   :  { %v55_v37 = vrot.slane %v54_v36, 4 }
  0x20   :  { %556 = vset.pattern.permute.xlu1 %v574_v18 }
  0x21   :  { %305 = vperm.xlu1 %556, %v95_v9   ;;  %v56_v38 = vadd.f32 %v55_v37, %v54_v36 }
  0x22   :  { %558 = vset.pattern.permute.xlu0 %v575_v20 }
  0x23   :  { %319 = vperm.xlu0 %558, %v95_v9   ;;  %v57_v39 = vrot.slane %v56_v38, 2 }
  0x25   :  { %559 = vset.pattern.permute.xlu1 %v576_v22  ;;  %v58_v40 = vadd.f32 %v57_v39, %v56_v38 }
  0x26   :  { %335 = vperm.xlu1 %559, %v95_v9  }
  0x27   :  { %561 = vset.pattern.permute.xlu0 %v576_v22  ;;  %v59_v41 = vrot.slane %v58_v40, 1 }
  0x28   :  { %331 = vperm.xlu0 %561, %v665_v8  }
  0x29   :  { %v60_v42 = vadd.f32 %v59_v41, %v58_v40 }
  0x2a   :  { %560 = vset.pattern.permute.xlu1 %v575_v20 }
  0x2b   :  { %315 = vperm.xlu1 %560, %v665_v8   ;;  %v61_v43 = vmul.f32 0.083333336, %v60_v42 }
  0x2c   :  { %563 = vset.pattern.permute.xlu0 %v577_v25 }
  0x2d   :  { %349 = vperm.xlu0 %563, %v665_v8   ;;  %v62_v44 = vadd.f32 1e-05, %v61_v43 }
  0x2f   :  { %562 = vset.pattern.permute.xlu1 %v577_v25  ;;  %569 = vrsqrt.f32 %v62_v44  ;;  %v198_v25 = vand.u32 127, %v197_v23 }
  0x30   :  { %353 = vperm.xlu1 %562, %v95_v9  }
  0x31   :  { %565 = vset.pattern.permute.xlu0 %v578_v27  ;;  %v215_v28 = vand.u32 7, %v198_v25  ;;  %v203_v29 = vand.u32 63, %v198_v25 }
  0x32   :  { %369 = vperm.xlu0 %565, %v665_v8  }
  0x33   :  { %vm748_vm2 = vcmp.ge.s32.totalorder %v215_v28, 1  ;;  %vm752_vm3 = vcmp.ge.s32.totalorder %v203_v29, 8  ;;  %vm760_vm5 = vcmp.le.s32.totalorder %v215_v28, 6  ;;  %vm795_vm7 = vcmp.lt.s32.totalorder %v203_v29, 56 }
  0x34   :  { %564 = vset.pattern.permute.xlu1 %v578_v27  ;;  %vm253_vm4 = vmand %vm752_vm3, %vm748_vm2 }
  0x35   :  { %373 = vperm.xlu1 %564, %v95_v9   ;;  %vm291_vm6 = vmand %vm752_vm3, %vm760_vm5 }
  0x36   :  { %566 = vset.pattern.permute.xlu0 %v571_v0  ;;  %vm359_vm8 = vmand %vm795_vm7, %vm748_vm2 }
  0x37   :  { %246 = vperm.xlu0 %566, %v95_v9   ;;  %vm396_vm9 = vmand %vm795_vm7, %vm760_vm5 }
  0x39   :  { %567 = vset.pattern.permute.xlu1 %v579_v30 }
  0x3a   :  { %391 = vperm.xlu1 %567, %v95_v9  }
  0x3c   :  { %v570_v45 = vpop.eup %569 }
  0x3d   :  { %v65_v46 = vmul.f32 %v570_v45, %v50_v31  ;;  %v64_v50 = vmul.f32 %v570_v45, %v49_v32 }
  0x7d   :  { %v86_v47 = vpop.permute.xlu1 %85 }
  0x7e   :  { %v74_v48 = vpop.permute.xlu0 %73 }
  0x7f   :  { %v77_v49 = vmul.f32 %v74_v48, %v65_v46 }
  0x81   :  { %v89_v51 = vadd.f32 %v86_v47, %v77_v49  ;;  %v81_v54 = vpop.permute.xlu1 %80 }
  0x82   :  { %v69_v52 = vpop.permute.xlu0 %68 }
  0x83   :  { %v76_v53 = vmul.f32 %v69_v52, %v64_v50  ;;  %519 = vmatprep.subr.msk.mxu0 %vm38_vm1, %v89_v51 }
  0x84   :  { %520 = vmatpush3.msk.msra.mxu0 %vm38_vm1, %v89_v51 }
  0x85   :  { %v88_v55 = vadd.f32 %v81_v54, %v76_v53  ;;  %v105_v61 = vpop.permute.xlu1 %104 }
  0x86   :  { %v110_v57 = vpop.permute.xlu0 %109 }
  0x87   :  { %521 = vmatprep.subr.mxu0 %v88_v55 }
  0x88   :  { %522 = vmatpush3.msra.mxu0 %v88_v55 }
  0x89   :  { %524 = vmatmul.mubr.msk.f32.vlgmr.msra.gmra.mxu0 %vm112_vm0, %v91_v56  ;;  %v242_v2 = vpop.permute.xlu1 %241 }
  0x8b   :  { %v268_v6 = vpop.permute.xlu0 %267 }
  0x8d   :  { %v231_v3 = vpop.permute.xlu1 %230 }
  0x92   :  { %v264_v4 = vpop.permute.xlu1 %263 }
  0x97   :  { %v226_v5 = vpop.permute.xlu1 %225 }
  0x9c   :  { %v306_v7 = vpop.permute.xlu1 %305 }
  0xa1   :  { %v336_v9 = vpop.permute.xlu1 %335 }
  0xa6   :  { %v740_v11 = vpop.permute.xlu1 %315 }
  0xab   :  { %v354_v15 = vpop.permute.xlu1 %353 }
  0xb0   :  { %v374_v17 = vpop.permute.xlu1 %373 }
  0xb5   :  { %v744_v19 = vpop.permute.xlu1 %391 }
 0x149   :  { %v525_v58 = vpop.f32.mrf.mxu0 }
 0x14a   :  { %v708_v59 = vadd.f32 %v525_v58, %v110_v57 }
 0x14b   :  { %v188_v60 = vpop.f32.mrf.mxu0 }
 0x14c   :  { %298 = vrot.lane.b32.xlu0 %v708_v59, %s580_s10  ;;  %237 = vrot.lane.b32.xlu1 %v708_v59, %s581_s11  ;;  %v712_v62 = vadd.f32 %v188_v60, %v105_v61 }
 0x150   :  { %260 = vrot.lane.b32.xlu1 %v708_v59, %s582_s12  ;;  %235 = vrot.lane.b32.xlu0 %v712_v62, %s581_s11 }
 0x154   :  { %278 = vrot.lane.b32.xlu1 %v708_v59, %s583_s3  ;;  %346 = vrot.lane.b32.xlu0 %v708_v59, %s584_s13 }
 0x158   :  { %328 = vrot.lane.b32.xlu1 %v708_v59, %s585_s14  ;;  %344 = vrot.lane.b32.xlu0 %v712_v62, %s584_s13 }
 0x15c   :  { %387 = vperm.xlu1 %567, %v665_v8   ;;  %364 = vrot.lane.b32.xlu0 %v712_v62, %s586_s15  ;;  %v286_v8 = vpop.permute.xlu0 %285 }
 0x160   :  { %366 = vrot.lane.b32.xlu1 %v708_v59, %s586_s15  ;;  %382 = vrot.lane.b32.xlu0 %v712_v62, %s587_s16  ;;  %v282_v10 = vpop.permute.xlu0 %281 }
 0x161   :  { %568 = vset.pattern.permute.xlu1 %v571_v0  ;;  %v100_v0 = vld [vmem:[%s843_s8] sm:$0xff] }
 0x164   :  { %258 = vrot.lane.b32.xlu1 %v712_v62, %s582_s12  ;;  %410 = vperm.xlu0 %566, %v101_v63   ;;  %v302_v12 = vpop.permute.xlu0 %301 }
 0x168   :  { %276 = vrot.lane.b32.xlu1 %v712_v62, %s583_s3  ;;  %v320_v16 = vpop.permute.xlu0 %319 }
 0x169   :  { %v323_v60 = vmul.f32 %v320_v16, %v708_v59  ;;  %v322_v16 = vmul.f32 %v740_v11, %v712_v62 }
 0x16c   :  { %296 = vrot.lane.b32.xlu1 %v712_v62, %s580_s10  ;;  %v742_v18 = vpop.permute.xlu0 %331 }
 0x170   :  { %326 = vrot.lane.b32.xlu1 %v712_v62, %s585_s14  ;;  %v350_v20 = vpop.permute.xlu0 %349 }
 0x174   :  { %384 = vrot.lane.b32.xlu1 %v708_v59, %s587_s16  ;;  %v746_v22 = vpop.permute.xlu0 %369 }
 0x178   :  { %405 = vperm.xlu1 %568, %v100_v0   ;;  %v247_v26 = vpop.permute.xlu0 %246 }
 0x1be   :  { %v238_v21 = vpop.permute.xlu1 %237  ;;  %v299_v30 = vpop.permute.xlu0 %298 }
 0x1bf   :  { %v250_v34 = vmul.f32 %v247_v26, %v238_v21  ;;  %v309_v47 = vmul.f32 %v306_v7, %v299_v30 }
 0x1c1   :  { %v255_v39 = vsel %vm253_vm4, %v250_v34, 0.0  ;;  %v311_v52 = vsel %vm748_vm2, %v309_v47, 0.0 }
 0x1c2   :  { %v261_v24 = vpop.permute.xlu1 %260  ;;  %v236_v37 = vpop.permute.xlu0 %235  ;;  %v257_v42 = vadd.f32 %v255_v39, %v231_v3 }
 0x1c3   :  { %v271_v35 = vmul.f32 %v268_v6, %v261_v24  ;;  %v249_v48 = vmul.f32 %v242_v2, %v236_v37 }
 0x1c5   :  { %v273_v41 = vsel %vm752_vm3, %v271_v35, 0.0  ;;  %v254_v53 = vsel %vm253_vm4, %v249_v48, 0.0 }
 0x1c6   :  { %v279_v27 = vpop.permute.xlu1 %278  ;;  %v275_v45 = vadd.f32 %v273_v41, %v257_v42  ;;  %v347_v46 = vpop.permute.xlu0 %346  ;;  %v256_v61 = vadd.f32 %v254_v53, %v226_v5 }
 0x1c7   :  { %v289_v40 = vmul.f32 %v286_v8, %v279_v27 }
 0x1c9   :  { %v293_v44 = vsel %vm291_vm6, %v289_v40, 0.0 }
 0x1ca   :  { %v329_v33 = vpop.permute.xlu1 %328  ;;  %v295_v49 = vadd.f32 %v293_v44, %v275_v45  ;;  %v345_v55 = vpop.permute.xlu0 %344 }
 0x1cb   :  { %v339_v63 = vmul.f32 %v336_v9, %v329_v33  ;;  %v356_v24 = vmul.f32 %v350_v20, %v345_v55 }
 0x1cc   :  { %v313_v54 = vadd.f32 %v311_v52, %v295_v49 }
 0x1cd   :  { %v341_v59 = vsel %vm760_vm5, %v339_v63, 0.0  ;;  %v360_v31 = vsel %vm359_vm8, %v356_v24, 0.0 }
 0x1ce   :  { %v325_v0 = vadd.f32 %v323_v60, %v313_v54  ;;  %v365_v7 = vpop.permute.xlu0 %364 }
 0x1d0   :  { %v343_v21 = vadd.f32 %v341_v59, %v325_v0 }
 0x1d2   :  { %v383_v11 = vpop.permute.xlu0 %382 }
 0x1d7   :  { %v388_v38 = vpop.permute.xlu1 %387 }
 0x1d8   :  { %v394_v32 = vmul.f32 %v388_v38, %v383_v11 }
 0x1da   :  { %v397_v39 = vsel %vm396_vm9, %v394_v32, 0.0 }
 0x1db   :  { %v367_v43 = vpop.permute.xlu1 %366 }
 0x1dc   :  { %v377_v5 = vmul.f32 %v374_v17, %v367_v43  ;;  %v376_v17 = vmul.f32 %v746_v22, %v365_v7 }
 0x1de   :  { %v379_v27 = vsel %vm795_vm7, %v377_v5, 0.0  ;;  %v378_v33 = vsel %vm795_vm7, %v376_v17, 0.0 }
 0x1df   :  { %v259_v50 = vpop.permute.xlu1 %258  ;;  %v411_v36 = vpop.permute.xlu0 %410 }
 0x1e0   :  { %v270_v51 = vmul.f32 %v264_v4, %v259_v50 }
 0x1e2   :  { %v272_v57 = vsel %vm752_vm3, %v270_v51, 0.0 }
 0x1e3   :  { %v277_v56 = vpop.permute.xlu1 %276  ;;  %v274_v2 = vadd.f32 %v272_v57, %v256_v61 }
 0x1e4   :  { %v288_v58 = vmul.f32 %v282_v10, %v277_v56  ;;  %v357_v10 = vmul.f32 %v354_v15, %v347_v46 }
 0x1e6   :  { %v292_v1 = vsel %vm291_vm6, %v288_v58, 0.0  ;;  %v361_v26 = vsel %vm359_vm8, %v357_v10, 0.0 }
 0x1e7   :  { %v297_v3 = vpop.permute.xlu1 %296  ;;  %v294_v8 = vadd.f32 %v292_v1, %v274_v2  ;;  %v363_v28 = vadd.f32 %v361_v26, %v343_v21 }
 0x1e8   :  { %v308_v6 = vmul.f32 %v302_v12, %v297_v3 }
 0x1ea   :  { %v310_v9 = vsel %vm748_vm2, %v308_v6, 0.0 }
 0x1eb   :  { %v312_v12 = vadd.f32 %v310_v9, %v294_v8  ;;  %v327_v23 = vpop.permute.xlu1 %326 }
 0x1ec   :  { %v338_v15 = vmul.f32 %v742_v18, %v327_v23  ;;  %v381_v18 = vadd.f32 %v379_v27, %v363_v28 }
 0x1ed   :  { %v324_v25 = vadd.f32 %v322_v16, %v312_v12 }
 0x1ee   :  { %v340_v62 = vsel %vm760_vm5, %v338_v15, 0.0 }
 0x1ef   :  { %v342_v29 = vadd.f32 %v340_v62, %v324_v25  ;;  %v385_v30 = vpop.permute.xlu1 %384 }
 0x1f0   :  { %v395_v20 = vmul.f32 %v744_v19, %v385_v30  ;;  %v99_v19 = vld [vmem:[%s844_s7 + $0x8] sm:$0xf] }
 0x1f1   :  { %v362_v22 = vadd.f32 %v360_v31, %v342_v29 }
 0x1f2   :  { %v398_v34 = vsel %vm396_vm9, %v395_v20, 0.0 }
 0x1f3   :  { %v400_v35 = vadd.f32 %v398_v34, %v381_v18  ;;  %v380_v37 = vadd.f32 %v378_v33, %v362_v22  ;;  %v406_v43 = vpop.permute.xlu1 %405 }
 0x1f5   :  { %v402_v40 = vmax.f32 %v400_v35, 0.0  ;;  %v399_v41 = vadd.f32 %v397_v39, %v380_v37 }
 0x1f7   :  { %526 = vmatprep.subr.msk.mxu1 %vm38_vm1, %v402_v40  ;;  %v401_v38 = vmax.f32 %v399_v41, 0.0 }
 0x1f8   :  { %527 = vmatpush3.msk.msra.mxu1 %vm38_vm1, %v402_v40 }
 0x1f9   :  { %528 = vmatprep.subr.mxu1 %v401_v38 }
 0x1fa   :  { %529 = vmatpush3.msra.mxu1 %v401_v38 }
 0x1fb   :  { %531 = vmatmul.mubr.msk.f32.vlgmr.msra.gmra.mxu1 %vm112_vm0, %v99_v19 }
 0x2bb   :  { %v532_v42 = vpop.f32.mrf.mxu1 }
 0x2bc   :  { %v494_v44 = vadd.f32 %v532_v42, %v411_v36 }
 0x2bd   :  { %v488_v45 = vpop.f32.mrf.mxu1 }
 0x2be   :  { %v498_v46 = vadd.f32 %v494_v44, %v677_v13  ;;  %v489_v47 = vadd.f32 %v488_v45, %v406_v43 }
 0x2c0   :  { %500 = vst [vmem:[%s845_s9 + $0x8] sm:$0xf] %v498_v46  ;;  %v497_v48 = vadd.f32 %v489_v47, %v683_v14 }
 0x2c2   :  { %499 = vst [vmem:[%s845_s9] sm:$0xff] %v497_v48 }

// kernel: light_generator_layer.9
= control target key start
LH: loop header
LB: loop body
LE: loop exit
PB: predicated region body
PF: predicated region fallthrough
CT: control target
= control target key end

     0   :  { %s3644_s0 = inlined_call_operand.vmem [shape: f32[2,15,256], index: 0, kind: input, shape index: {}]   ;;  %s3645_s1 = inlined_call_operand.vmem [shape: f32[15,1], index: 1, kind: input, shape index: {}]   ;;  %s3646_s2 = inlined_call_operand.vmem [shape: f32[15,1], index: 2, kind: input, shape index: {}]   ;;  %s3647_s3 = inlined_call_operand.vmem [shape: f32[15,15], index: 3, kind: input, shape index: {}]   ;;  %s3648_s4 = inlined_call_operand.vmem [shape: f32[15,1], index: 4, kind: input, shape index: {}]   ;;  %s3649_s5 = inlined_call_operand.vmem [shape: f32[15,9], index: 5, kind: input, shape index: {}]   ;;  %s3650_s6 = inlined_call_operand.vmem [shape: f32[15,1], index: 6, kind: input, shape index: {}]   ;;  %s3651_s7 = inlined_call_operand.vmem [shape: f32[15,15], index: 7, kind: input, shape index: {}]   ;;  %s3652_s8 = inlined_call_operand.vmem [shape: f32[15,1], index: 8, kind: input, shape index: {}]   ;;  %s3653_s9 = inlined_call_operand.vmem [shape: f32[15,1], index: 9, kind: input, shape index: {}]   ;;  %s3654_s10 = inlined_call_operand.vmem [shape: f32[15,1], index: 10, kind: input, shape index: {}]   ;;  %s3655_s11 = inlined_call_operand.vmem [shape: f32[15,15], index: 11, kind: input, shape index: {}]   ;;  %s3656_s12 = inlined_call_operand.vmem [shape: f32[15,1], index: 12, kind: input, shape index: {}]   ;;  %s3657_s13 = inlined_call_operand.vmem [shape: f32[30,15], index: 13, kind: input, shape index: {}]   ;;  %s3658_s14 = inlined_call_operand.vmem [shape: f32[15,30], index: 14, kind: input, shape index: {}]   ;;  %s3659_s15 = inlined_call_operand.vmem [shape: f32[15,1], index: 15, kind: input, shape index: {}]   ;;  %s3660_s16 = inlined_call_operand.vmem [shape: f32[15,1], index: 16, kind: input, shape index: {}]   ;;  %s3661_s17 = inlined_call_operand.vmem [shape: f32[15,15], index: 17, kind: input, shape index: {}]   ;;  %s3662_s18 = inlined_call_operand.vmem [shape: f32[15,1], index: 18, kind: input, shape index: {}]   ;;  %s3663_s19 = inlined_call_operand.vmem [shape: f32[15,9], index: 19, kind: input, shape index: {}]   ;;  %s3664_s20 = inlined_call_operand.vmem [shape: f32[15,1], index: 20, kind: input, shape index: {}]   ;;  %s3665_s21 = inlined_call_operand.vmem [shape: f32[3,15], index: 21, kind: input, shape index: {}]   ;;  %s3666_s22 = inlined_call_operand.vmem [shape: f32[3,1], index: 22, kind: input, shape index: {}]   ;;  %s3667_s23 = inlined_call_operand.vmem [shape: f32[2,3,256], index: 23, kind: output, shape index: {}]  }
   0x1   :  { %3715 = sst [smem:[#allocation2_spill]] %s3644_s0 }
   0x2   :  { %3716 = sst [smem:[#allocation3_spill]] %s3645_s1 }
   0x3   :  { %3717 = sst [smem:[#allocation4_spill]] %s3646_s2 }
   0x4   :  { %3718 = sst [smem:[#allocation5_spill]] %s3647_s3 }
   0x5   :  { %3719 = sst [smem:[#allocation6_spill]] %s3648_s4  ;;  %s2686_s4 = smov 0  }
   0x6   :  { %3720 = sst [smem:[#allocation7_spill]] %s3649_s5 }
   0x7   :  { %3721 = sst [smem:[#allocation8_spill]] %s3650_s6 }
   0x8   :  { %3722 = sst [smem:[#allocation9_spill]] %s3651_s7 }
   0x9   :  { %3723 = sst [smem:[#allocation10_spill]] %s3652_s8 }
   0xa   :  { %3724 = sst [smem:[#allocation11_spill]] %s3653_s9 }
   0xb   :  { %3725 = sst [smem:[#allocation12_spill]] %s3654_s10 }
   0xc   :  { %3726 = sst [smem:[#allocation13_spill]] %s3655_s11 }
   0xd LB: > { %s2424_s30 = sadd.s32 4294967295, %s2546_s4   ;;  %p2428_p0 = scmp.ge.s32.totalorder %s2546_s4, 1  ;;  %s2546_s4 = sphi %s2686_s4, %s33_s4  }
   0xe   : > { %p637_p1 = scmp.lt.s32.totalorder %s2546_s4, 3 }
  0x10   : > { %p638_p2 = pnand %p2428_p0, %p637_p1 }
  0x11   : > { %s3727_s5 = sld [smem:[#allocation4_spill]] (!%p638_p2)  ;;  %p701_p3 = scmp.lt.s32.totalorder (!%p638_p2), %s2424_s30, 1 }
  0x12   : > { %641 = sbr.rel (%p638_p2) target bundleno = 2258 (0x8d2), region = 112  ;;  %s3728_s2 = sld [smem:[#allocation3_spill]] (!%p638_p2) }
  0x13   : > { %s3729_s0 = sld [smem:[#allocation6_spill]] (!%p638_p2)  ;;  %s3675_s26 = smov (!%p638_p2), 16  }
  0x14   : > { %s3730_s6 = sld [smem:[#allocation7_spill]] (!%p638_p2)  ;;  %s3691_s28 = smov (!%p638_p2), 15  }
  0x15   : > { %s3731_s24 = sld [smem:[#allocation2_spill]] (!%p638_p2)  ;;  %s3677_s29 = smov (!%p638_p2), 127  }
  0x16   : > { %s3732_s7 = sld [smem:[#allocation8_spill]] (!%p638_p2)  ;;  %s3681_s3 = smov (!%p638_p2), 1  }
  0x17   : > { %v718_v0 = vld [vmem:[%s3727_s5 + $0x8] sm:$0x7f]  ;;  %v3695_v2 = vmov 0   ;;  %v717_v3 = vld [vmem:[%s3727_s5] sm:$0xff]  ;;  %v2549_v7 = vmov 0.0   ;;  %s3799_s30 = smov (!%p701_p3, %s2424_s30), 1 }
  0x18   : > { %v716_v1 = vld [vmem:[%s3728_s2 + $0x8] sm:$0x7f]  ;;  %2493 = vset.pattern.permute.xlu1 %v3695_v2  ;;  %2492 = vset.pattern.permute.xlu0 %v3695_v2  ;;  %v715_v4 = vld [vmem:[%s3728_s2] sm:$0xff]  ;;  %s2464_s27 = sshll.u32 %s3799_s30, 5  ;;  %v2550_v10 = vmov 2   ;;  %v2551_v11 = vmov 1  }
  0x19   : > { %794 = vperm.xlu1 %2493, %v718_v0   ;;  %780 = vperm.xlu0 %2492, %v716_v1   ;;  %v803_v5 = vld [vmem:[%s3729_s0] sm:$0xff]  ;;  %v804_v6 = vld [vmem:[%s3729_s0 + $0x8] sm:$0x7f]  ;;  %vm3714_vm0 = vcmask 1046528   ;;  %v3704_v17 = vmov 3   ;;  %v3702_v22 = vmov 4  }
  0x1a   : > { %900 = vmatprep.mubr.f32.mxu0 %v2549_v7  ;;  %1364 = vmatprep.mubr.f32.mxu1 %v2549_v7  ;;  %v2721_v8 = vld [vmem:[%s3730_s6] sm:$0xff]  ;;  %v2728_v9 = vld [vmem:[%s3730_s6 + $0x8] sm:$0x7f]  ;;  %v3700_v25 = vmov 5   ;;  %v3699_v29 = vmov 6   ;;  %v3697_v35 = vmov 7  }
  0x1b   : > { %s705_s25 = scalar_lea.vmem %s3731_s24, %s2464_s27  ;;  %v3696_v38 = vmov 8   ;;  %s3733_s24 = sld [smem:[#allocation5_spill]]  ;;  %vm3713_vm1 = vcmask 121856  }
  0x1c   : > { %v713_v12 = vld [vmem:[%s705_s25 + $0x10] sm:$0x7f]  ;;  %v714_v13 = vld [vmem:[%s705_s25 + $0x18] sm:$0x7f]  ;;  %v807_v14 = vld [vmem:[%s3732_s7] sm:$0xff]  ;;  %s3687_s27 = smov 17  }
  0x1d   : > { %789 = vperm.xlu1 %2493, %v717_v3   ;;  %775 = vperm.xlu0 %2492, %v715_v4   ;;  %v711_v15 = vld [vmem:[%s705_s25] sm:$0xff]  ;;  %v720_v16 = vsel %vm3714_vm0, %v713_v12, 0.0  ;;  %v712_v18 = vld [vmem:[%s705_s25 + $0x8] sm:$0xff]  ;;  %v728_v19 = vsel %vm3714_vm0, %v714_v13, 0.0  ;;  %s3685_s25 = smov 112   ;;  %s3679_s1 = smov 113  }
  0x1e   : > { %v721_v20 = vadd.f32 %v720_v16, %v711_v15  ;;  %v729_v21 = vadd.f32 %v728_v19, %v712_v18  ;;  %v808_v40 = vld [vmem:[%s3732_s7 + $0x8] sm:$0x7f]  ;;  %s3735_s8 = sld [smem:[#allocation10_spill]]  ;;  %s3740_s2 = smov 113  }
  0x1f   : > { %s3736_s9 = sld [smem:[#allocation11_spill]]  ;;  %s3741_s0 = smov 111  }
  0x20   : > { %v722_v23 = vrot.slane %v721_v20, 4  ;;  %v730_v24 = vrot.slane %v729_v21, 4  ;;  %s3738_s10 = sld [smem:[#allocation12_spill]]  ;;  %s3773_s7 = smov 112  }
  0x21   : > { %815 = vperm.xlu1 %2493, %v803_v5   ;;  %820 = vperm.xlu0 %2492, %v804_v6   ;;  %s3763_s11 = sld [smem:[#allocation13_spill]] }
  0x22   : > { %v723_v26 = vadd.f32 %v722_v23, %v721_v20  ;;  %v731_v27 = vadd.f32 %v730_v24, %v729_v21 }
  0x24   : > { %v724_v28 = vrot.slane %v723_v26, 2  ;;  %v732_v30 = vrot.slane %v731_v27, 2 }
  0x25   : > { %991 = vperm.xlu1 %2493, %v2721_v8   ;;  %2495 = vset.pattern.permute.xlu0 %v2550_v10 }
  0x26   : > { %1068 = vperm.xlu0 %2495, %v2728_v9   ;;  %v725_v31 = vadd.f32 %v724_v28, %v723_v26  ;;  %v733_v32 = vadd.f32 %v732_v30, %v731_v27 }
  0x28   : > { %v726_v33 = vrot.slane %v725_v31, 1  ;;  %v734_v34 = vrot.slane %v733_v32, 1 }
  0x29   : > { %2494 = vset.pattern.permute.xlu1 %v2551_v11 }
  0x2a   : > { %1035 = vperm.xlu1 %2494, %v2728_v9   ;;  %1064 = vperm.xlu0 %2495, %v2721_v8   ;;  %v727_v36 = vadd.f32 %v726_v33, %v725_v31  ;;  %v735_v37 = vadd.f32 %v734_v34, %v733_v32  ;;  %v801_v32 = vld [vmem:[%s3733_s24] sm:$0xff]  ;;  %v802_v33 = vld [vmem:[%s3733_s24 + $0x8] sm:$0x7f] }
  0x2c   : > { %v737_v39 = vmul.f32 0.06666667, %v727_v36  ;;  %v738_v41 = vmul.f32 0.06666667, %v735_v37 }
  0x2e   : > { %2496 = vset.pattern.permute.xlu1 %v3695_v2  ;;  %2499 = vset.pattern.permute.xlu0 %v3704_v17  ;;  %v741_v42 = vsub.f32 %v713_v12, %v737_v39  ;;  %v742_v43 = vsub.f32 %v714_v13, %v738_v41  ;;  %v739_v44 = vsub.f32 %v711_v15, %v737_v39 }
  0x2f   : > { %966 = vperm.xlu1 %2496, %v807_v14   ;;  %1101 = vperm.xlu0 %2499, %v2721_v8   ;;  %v740_v46 = vsub.f32 %v712_v18, %v738_v41 }
  0x30   : > { %v745_v45 = vmul.f32 %v741_v42, %v741_v42  ;;  %v746_v47 = vmul.f32 %v742_v43, %v742_v43  ;;  %v743_v48 = vmul.f32 %v739_v44, %v739_v44 }
  0x31   : > { %v744_v50 = vmul.f32 %v740_v46, %v740_v46 }
  0x32   : > { %v747_v49 = vsel %vm3714_vm0, %v745_v45, 0.0  ;;  %v755_v51 = vsel %vm3714_vm0, %v746_v47, 0.0  ;;  %v1377_v47 = vld [vmem:[%s3736_s9] sm:$0xff] }
  0x33   : > { %2497 = vset.pattern.permute.xlu1 %v2551_v11  ;;  %2500 = vset.pattern.permute.xlu0 %v3702_v22  ;;  %v748_v52 = vadd.f32 %v747_v49, %v743_v48  ;;  %v756_v53 = vadd.f32 %v755_v51, %v744_v50  ;;  %v1379_v49 = vld [vmem:[%s3738_s10] sm:$0xff] }
  0x34   : > { %1031 = vperm.xlu1 %2497, %v2721_v8   ;;  %1125 = vperm.xlu0 %2500, %v2728_v9   ;;  %v1463_v51 = vld [vmem:[%s3656_s12] sm:$0xff] }
  0x35   : > { %v749_v54 = vrot.slane %v748_v52, 4  ;;  %v757_v55 = vrot.slane %v756_v53, 4 }
  0x37   : > { %v750_v56 = vadd.f32 %v749_v54, %v748_v52  ;;  %v758_v57 = vadd.f32 %v757_v55, %v756_v53 }
  0x38   : > { %2498 = vset.pattern.permute.xlu1 %v3704_v17  ;;  %2501 = vset.pattern.permute.xlu0 %v3700_v25 }
  0x39   : > { %1105 = vperm.xlu1 %2498, %v2728_v9   ;;  %1154 = vperm.xlu0 %2501, %v2728_v9   ;;  %v751_v58 = vrot.slane %v750_v56, 2  ;;  %v759_v59 = vrot.slane %v758_v57, 2 }
  0x3b   : > { %v752_v60 = vadd.f32 %v751_v58, %v750_v56  ;;  %v760_v61 = vadd.f32 %v759_v59, %v758_v57  ;;  %v811_v56 = vld [vmem:[%s3735_s8] sm:$0xff]  ;;  %v1378_v59 = vld [vmem:[%s3736_s9 + $0x8] sm:$0x7f] }
  0x3d   : > { %2502 = vset.pattern.permute.xlu1 %v3702_v22  ;;  %2504 = vset.pattern.permute.xlu0 %v3699_v29  ;;  %v753_v62 = vrot.slane %v752_v60, 1  ;;  %v761_v63 = vrot.slane %v760_v61, 1 }
  0x3e   : > { %1121 = vperm.xlu1 %2502, %v2721_v8   ;;  %1187 = vperm.xlu0 %2504, %v2728_v9  }
  0x3f   : > { %v754_v0 = vadd.f32 %v753_v62, %v752_v60  ;;  %v762_v1 = vadd.f32 %v761_v63, %v760_v61  ;;  %v1380_v61 = vld [vmem:[%s3738_s10 + $0x8] sm:$0x7f]  ;;  %s3771_s10 = smov 17  }
  0x41   : > { %v763_v3 = vmul.f32 0.06666667, %v754_v0  ;;  %v764_v4 = vmul.f32 0.06666667, %v762_v1  ;;  %v1464_v0 = vld [vmem:[%s3656_s12 + $0x8] sm:$0x7f] }
  0x42   : > { %2503 = vset.pattern.permute.xlu1 %v3700_v25  ;;  %1183 = vperm.xlu0 %2504, %v2721_v8  }
  0x43   : > { %1150 = vperm.xlu1 %2503, %v2721_v8   ;;  %v765_v5 = vadd.f32 1e-05, %v763_v3  ;;  %v766_v6 = vadd.f32 1e-05, %v764_v4 }
  0x45   : > { %2524 = vrsqrt.f32 %v765_v5 }
  0x46   : > { %2506 = vset.pattern.permute.xlu0 %v3697_v35  ;;  %2526 = vrsqrt.f32 %v766_v6 }
  0x47   : > { %2505 = vset.pattern.permute.xlu1 %v3697_v35  ;;  %1220 = vperm.xlu0 %2506, %v2721_v8  }
  0x48   : > { %1224 = vperm.xlu1 %2505, %v2728_v9  }
  0x4b   : > { %2507 = vset.pattern.permute.xlu0 %v3695_v2 }
  0x4c   : > { %2508 = vset.pattern.permute.xlu1 %v3696_v38  ;;  %996 = vperm.xlu0 %2507, %v2728_v9  }
  0x4d   : > { %1257 = vperm.xlu1 %2508, %v2728_v9  }
  0x50   : > { %971 = vperm.xlu0 %2507, %v808_v40  }
  0x51   : > { %1253 = vperm.xlu1 %2508, %v2721_v8  }
  0x52   : > { %v2525_v8 = vpop.eup %2524 }
  0x53   : > { %v2527_v9 = vpop.eup %2526  ;;  %v771_v12 = vmul.f32 %v2525_v8, %v741_v42  ;;  %v769_v18 = vmul.f32 %v2525_v8, %v739_v44 }
  0x54   : > { %v772_v13 = vmul.f32 %v2527_v9, %v742_v43  ;;  %v770_v19 = vmul.f32 %v2527_v9, %v740_v46  ;;  %v812_v46 = vld [vmem:[%s3735_s8 + $0x8] sm:$0x7f] }
  0x55   : > { %2509 = vset.pattern.permute.xlu1 %v3695_v2 }
  0x94   : > { %v795_v14 = vpop.permute.xlu1 %794  ;;  %v781_v15 = vpop.permute.xlu0 %780 }
  0x95   : > { %v785_v16 = vmul.f32 %v781_v15, %v771_v12  ;;  %v786_v20 = vmul.f32 %v781_v15, %v772_v13 }
  0x97   : > { %v800_v21 = vadd.f32 %v795_v14, %v786_v20  ;;  %v799_v23 = vadd.f32 %v795_v14, %v785_v16 }
  0x98   : > { %v776_v24 = vpop.permute.xlu0 %775  ;;  %v790_v28 = vpop.permute.xlu1 %789 }
  0x99   : > { %v783_v26 = vmul.f32 %v776_v24, %v769_v18  ;;  %v784_v27 = vmul.f32 %v776_v24, %v770_v19  ;;  %2433 = vmatprep.subr.msk.mxu0 %vm3714_vm0, %v800_v21  ;;  %v913_v19 = vlaneseq }
  0x9a   : > { %2434 = vmatpush1.msk.msra.mxu0 %vm3714_vm0, %v799_v23 }
  0x9b   : > { %v798_v30 = vadd.f32 %v790_v28, %v784_v27  ;;  %v797_v31 = vadd.f32 %v790_v28, %v783_v26  ;;  %v2934_v23 = vand.u32 127, %v913_v19 }
  0x9c   : > { %v816_v34 = vpop.permute.xlu1 %815  ;;  %v821_v42 = vpop.permute.xlu0 %820 }
  0x9d   : > { %866 = vmatprep.subr.mxu0 %v798_v30  ;;  %v920_v27 = vand.u32 255, %v2934_v23  ;;  %v944_v28 = vand.u32 15, %v2934_v23  ;;  %vm984_vm2 = vcmp.lt.s32.totalorder %v2934_v23, 17  ;;  %vm1025_vm5 = vcmp.lt.s32.totalorder %v2934_v23, 16 }
  0x9e   : > { %867 = vmatpush1.msra.mxu0 %v797_v31  ;;  %vm3707_vm7 = vcmp.lt.s32.totalorder %v2934_v23, 1  ;;  %vm3706_vm8 = vcmp.lt.s32.totalorder %v2934_v23, 15  ;;  %vm3712_vm11 = vcmp.lt.s32.totalorder %v2934_v23, 113  ;;  %vm3708_vm12 = vcmp.lt.s32.totalorder %v2934_v23, 127 }
  0x9f   : > { %2435 = vmatmul.mubr.msk.f32.vlgmr.msra.gmra.mxu0 %vm3713_vm1, %v801_v32  ;;  %vm2943_vm3 = vcmp.ge.s32.totalorder %v920_v27, 16  ;;  %vm2949_vm4 = vcmp.ge.s32.totalorder %v944_v28, 1  ;;  %vm2973_vm9 = vcmp.le.s32.totalorder %v944_v28, 14  ;;  %v915_v29 = vadd.s32 128, %v2934_v23 }
  0xa0   : > { %906 = vmatprep.mubr.f32.mxu0 %v2549_v7  ;;  %v2863_v50 = vpop.permute.xlu1 %991  ;;  %vm2961_vm6 = vmand %vm2943_vm3, %vm2949_vm4 }
  0xa1   : > { %v2856_v48 = vpop.permute.xlu0 %1068  ;;  %vm2988_vm10 = vmand %vm2943_vm3, %vm2973_vm9 }
  0xa3   : > { %2436 = vmatmul.mubr.msk.f32.gmra.mxu0 %vm3713_vm1, %v802_v33 }
  0xa4   : > { %1551 = vmatprep.mubr.f32.mxu0 %v2549_v7 }
  0xa5   : > { %v2870_v52 = vpop.permute.xlu0 %1064  ;;  %v2872_v53 = vpop.permute.xlu1 %1035 }
  0xaa   : > { %v2876_v54 = vpop.permute.xlu0 %1101  ;;  %v2880_v55 = vpop.permute.xlu1 %966 }
  0xaf   : > { %v2887_v57 = vpop.permute.xlu0 %1125  ;;  %v2889_v58 = vpop.permute.xlu1 %1031 }
  0xb4   : > { %v2894_v60 = vpop.permute.xlu0 %1154  ;;  %v2899_v62 = vpop.permute.xlu1 %1105 }
  0xb9   : > { %v2901_v63 = vpop.permute.xlu0 %1187  ;;  %v2906_v1 = vpop.permute.xlu1 %1121 }
  0xbd   : > { %v2908_v3 = vpop.permute.xlu0 %1183 }
  0xbe   : > { %v2910_v4 = vpop.permute.xlu1 %1150 }
  0xc2   : > { %v2912_v5 = vpop.permute.xlu0 %1220 }
  0xc3   : > { %v2914_v6 = vpop.permute.xlu1 %1224 }
  0xc7   : > { %v2916_v8 = vpop.permute.xlu0 %996 }
  0xc8   : > { %v2918_v9 = vpop.permute.xlu1 %1257 }
  0xcb   : > { %v2920_v12 = vpop.permute.xlu0 %971 }
  0xcc   : > { %v2922_v13 = vpop.permute.xlu1 %1253 }
 0x15f   : > { %v902_v36 = vpop.f32.mrf.mxu0 }
 0x160   : > { %v2788_v37 = vadd.f32 %v902_v36, %v816_v34 }
 0x161   : > { %v904_v39 = vpop.f32.mrf.mxu0 }
 0x162   : > { %1017 = vrot.lane.b32.xlu1 %v2788_v37, %s3675_s26  ;;  %976 = vrot.lane.b32.xlu0 %v2788_v37, %s3687_s27  ;;  %v2802_v40 = vadd.f32 %v904_v39, %v816_v34 }
 0x163   : > { %v908_v41 = vpop.f32.mrf.mxu0 }
 0x164   : > { %v2812_v43 = vadd.f32 %v908_v41, %v821_v42 }
 0x165   : > { %v910_v44 = vpop.f32.mrf.mxu0 }
 0x166   : > { %1050 = vrot.lane.b32.xlu1 %v2788_v37, %s3691_s28  ;;  %1136 = vrot.lane.b32.xlu0 %v2788_v37, %s3677_s29  ;;  %v2838_v45 = vadd.f32 %v910_v44, %v821_v42 }
 0x16a   : > { %1087 = vrot.lane.b32.xlu1 %v2788_v37, %s3681_s3  ;;  %1206 = vrot.lane.b32.xlu0 %v2788_v37, %s3685_s25 }
 0x16e   : > { %1169 = vrot.lane.b32.xlu1 %v2788_v37, %s3679_s1  ;;  %1091 = vrot.lane.b32.xlu0 %v2802_v40, %s3681_s3 }
 0x172   : > { %980 = vrot.lane.b32.xlu1 %v2802_v40, %s3687_s27  ;;  %1173 = vrot.lane.b32.xlu0 %v2802_v40, %s3679_s1 }
 0x176   : > { %1021 = vrot.lane.b32.xlu1 %v2802_v40, %s3675_s26  ;;  %978 = vrot.lane.b32.xlu0 %v2812_v43, %s3687_s27 }
 0x17a   : > { %1054 = vrot.lane.b32.xlu1 %v2802_v40, %s3691_s28  ;;  %1019 = vrot.lane.b32.xlu0 %v2812_v43, %s3675_s26  ;;  %s3689_s26 = smov 111  }
 0x17e   : > { %1140 = vrot.lane.b32.xlu1 %v2802_v40, %s3677_s29  ;;  %1052 = vrot.lane.b32.xlu0 %v2812_v43, %s3691_s28 }
 0x182   : > { %1210 = vrot.lane.b32.xlu1 %v2802_v40, %s3685_s25  ;;  %1089 = vrot.lane.b32.xlu0 %v2812_v43, %s3681_s3  ;;  %s3739_s3 = smov 127  }
 0x186   : > { %1138 = vrot.lane.b32.xlu1 %v2812_v43, %s3677_s29  ;;  %1171 = vrot.lane.b32.xlu0 %v2812_v43, %s3679_s1  ;;  %s3734_s29 = smov 16  }
 0x18a   : > { %1208 = vrot.lane.b32.xlu1 %v2812_v43, %s3685_s25  ;;  %1241 = vrot.lane.b32.xlu0 %v2812_v43, %s3689_s26 }
 0x18e   : > { %982 = vrot.lane.b32.xlu1 %v2838_v45, %s3687_s27  ;;  %1212 = vrot.lane.b32.xlu0 %v2838_v45, %s3685_s25  ;;  %s3737_s25 = smov 1  }
 0x192   : > { %1023 = vrot.lane.b32.xlu1 %v2838_v45, %s3734_s29  ;;  %1239 = vrot.lane.b32.xlu0 %v2788_v37, %s3689_s26 }
 0x196   : > { %1056 = vrot.lane.b32.xlu1 %v2838_v45, %s3691_s28  ;;  %1285 = vperm.xlu0 %2507, %v812_v46   ;;  %s3762_s28 = sld [smem:[#allocation9_spill]] }
 0x19a   : > { %1093 = vrot.lane.b32.xlu1 %v2838_v45, %s3737_s25  ;;  %1435 = vperm.xlu0 %2507, %v1377_v47  }
 0x19e   : > { %1142 = vrot.lane.b32.xlu1 %v2838_v45, %s3739_s3  ;;  %1449 = vperm.xlu0 %2507, %v1379_v49  }
 0x1a2   : > { %1175 = vrot.lane.b32.xlu1 %v2838_v45, %s3740_s2  ;;  %1467 = vperm.xlu0 %2507, %v1463_v51  }
 0x1a6   : > { %1245 = vrot.lane.b32.xlu1 %v2838_v45, %s3741_s0 }
 0x1aa   : > { %1243 = vrot.lane.b32.xlu1 %v2802_v40, %s3741_s0 }
 0x1ae   : > { %1280 = vperm.xlu1 %2509, %v811_v56  }
 0x1b2   : > { %1440 = vperm.xlu1 %2509, %v1378_v59  }
 0x1b6   : > { %1454 = vperm.xlu1 %2509, %v1380_v61  }
 0x1ba   : > { %1472 = vperm.xlu1 %2509, %v1464_v0  }
 0x1d4   : > { %v2924_v14 = vpop.permute.xlu1 %1017  ;;  %v977_v15 = vpop.permute.xlu0 %976 }
 0x1d8   : > { %v2926_v16 = vpop.permute.xlu1 %1050  ;;  %v2928_v18 = vpop.permute.xlu0 %1136 }
 0x1dc   : > { %v2930_v20 = vpop.permute.xlu1 %1087  ;;  %v2932_v21 = vpop.permute.xlu0 %1206 }
 0x1e0   : > { %v2936_v24 = vpop.permute.xlu1 %1169  ;;  %v2938_v26 = vpop.permute.xlu0 %1091 }
 0x1e1   : > { %v1098_v49 = vsel %vm3707_vm7, %v2938_v26, %v2930_v20 }
 0x1e2   : > { %v1108_v27 = vmul.f32 %v2876_v54, %v1098_v49 }
 0x1e4   : > { %v981_v31 = vpop.permute.xlu1 %980  ;;  %v2954_v36 = vpop.permute.xlu0 %1173 }
 0x1e5   : > { %v987_v32 = vsel %vm984_vm2, %v981_v31, %v977_v15 }
 0x1e6   : > { %v999_v34 = vmul.f32 %v2863_v50, %v987_v32 }
 0x1e8   : > { %v1022_v41 = vpop.permute.xlu1 %1021  ;;  %v1009_v44 = vsel %vm2961_vm6, %v999_v34, 0.0  ;;  %v979_v56 = vpop.permute.xlu0 %978 }
 0x1e9   : > { %v1028_v42 = vsel %vm1025_vm5, %v1022_v41, %v2924_v14  ;;  %v1013_v61 = vadd.f32 %v1009_v44, %v2880_v55  ;;  %v1178_v44 = vsel %vm3712_vm11, %v2936_v24, %v2954_v36 }
 0x1ea   : > { %v1038_v46 = vmul.f32 %v2889_v58, %v1028_v42  ;;  %v1190_v38 = vmul.f32 %v2908_v3, %v1178_v44  ;;  %v951_v44 = vand.u32 15, %v915_v29 }
 0x1ec   : > { %v1042_v51 = vsel %vm2943_vm3, %v1038_v46, 0.0  ;;  %v1055_v59 = vpop.permute.xlu1 %1054  ;;  %vm3033_vm13 = vcmp.ge.s32.totalorder %v951_v44, 1  ;;  %vm3056_vm14 = vcmp.le.s32.totalorder %v951_v44, 14 }
 0x1ed   : > { %v1061_v19 = vsel %vm3706_vm8, %v1055_v59, %v2926_v16  ;;  %v1046_v32 = vadd.f32 %v1042_v51, %v1013_v61  ;;  %v1020_v51 = vpop.permute.xlu0 %1019 }
 0x1ee   : > { %v1071_v28 = vmul.f32 %v2870_v52, %v1061_v19  ;;  %v1112_v19 = vsel %vm2949_vm4, %v1108_v27, 0.0  ;;  %v1198_v27 = vsel %vm2949_vm4, %v1190_v38, 0.0 }
 0x1f0   : > { %v1079_v34 = vsel %vm2988_vm10, %v1071_v28, 0.0  ;;  %v3001_v42 = vpop.permute.xlu1 %1140  ;;  %v1128_v28 = vmul.f32 %v2906_v1, %v2788_v37  ;;  %v985_v37 = vsel %vm984_vm2, %v977_v15, %v981_v31  ;;  %v1026_v15 = vsel %vm1025_vm5, %v2924_v14, %v1022_v41 }
 0x1f1   : > { %v1083_v46 = vadd.f32 %v1079_v34, %v1046_v32  ;;  %v1145_v49 = vsel %vm3708_vm12, %v2928_v18, %v3001_v42  ;;  %v1053_v22 = vpop.permute.xlu0 %1052 }
 0x1f2   : > { %v1157_v61 = vmul.f32 %v2910_v4, %v1145_v49 }
 0x1f3   : > { %v1116_v2 = vadd.f32 %v1112_v19, %v1083_v46 }
 0x1f4   : > { %v3017_v35 = vpop.permute.xlu1 %1210  ;;  %v1161_v34 = vsel %vm2973_vm9, %v1157_v61, 0.0 }
 0x1f5   : > { %v1132_v32 = vadd.f32 %v1128_v28, %v1116_v2  ;;  %v1000_v2 = vmul.f32 %v2863_v50, %v985_v37  ;;  %v1090_v61 = vpop.permute.xlu0 %1089  ;;  %v1039_v37 = vmul.f32 %v2889_v58, %v1026_v15  ;;  %v1096_v58 = vsel %vm3707_vm7, %v2930_v20, %v2938_v26 }
 0x1f7   : > { %v1165_v25 = vadd.f32 %v1161_v34, %v1132_v32  ;;  %v1010_v38 = vsel %vm3033_vm13, %v1000_v2, 0.0 }
 0x1f8   : > { %v3024_v49 = vpop.permute.xlu1 %1138 }
 0x1f9   : > { %v3028_v46 = vadd.f32 %v1198_v27, %v1165_v25  ;;  %v1059_v25 = vsel %vm3706_vm8, %v2926_v16, %v1055_v59  ;;  %v1014_v27 = vadd.f32 %v1010_v38, %v2880_v55  ;;  %v3053_v17 = vpop.permute.xlu0 %1171 }
 0x1fa   : > { %v1072_v2 = vmul.f32 %v2870_v52, %v1059_v25 }
 0x1fb   : > { %v1047_v44 = vadd.f32 %v1039_v37, %v1014_v27 }
 0x1fc   : > { %v3031_v19 = vpop.permute.xlu1 %1208  ;;  %v1080_v38 = vsel %vm3056_vm14, %v1072_v2, 0.0 }
 0x1fd   : > { %v3082_v20 = vpop.permute.xlu0 %1241  ;;  %v1084_v37 = vadd.f32 %v1080_v38, %v1047_v44 }
 0x200   : > { %v983_v32 = vpop.permute.xlu1 %982 }
 0x201   : > { %v986_v50 = vsel %vm984_vm2, %v979_v56, %v983_v32  ;;  %v988_v31 = vsel %vm984_vm2, %v983_v32, %v979_v56  ;;  %v1213_v38 = vpop.permute.xlu0 %1212 }
 0x202   : > { %v1002_v34 = vmul.f32 %v2916_v8, %v986_v50  ;;  %v1001_v14 = vmul.f32 %v2916_v8, %v988_v31  ;;  %v927_v8 = vand.u32 255, %v915_v29  ;;  %v1109_v29 = vmul.f32 %v2876_v54, %v1096_v58 }
 0x203   : > { %v1180_v54 = vsel %vm3712_vm11, %v2954_v36, %v2936_v24 }
 0x204   : > { %v1024_v41 = vpop.permute.xlu1 %1023  ;;  %v1012_v59 = vsel %vm3033_vm13, %v1002_v34, 0.0  ;;  %v1011_v32 = vsel %vm2961_vm6, %v1001_v14, 0.0  ;;  %vm3107_vm15 = vcmp.lt.s32.totalorder %v927_v8, 240 }
 0x205   : > { %v1029_v56 = vsel %vm1025_vm5, %v1024_v41, %v1020_v51  ;;  %v1027_v55 = vsel %vm1025_vm5, %v1020_v51, %v1024_v41  ;;  %v1016_v25 = vadd.f32 %v1012_v59, %v2920_v12  ;;  %v1015_v2 = vadd.f32 %v1011_v32, %v2920_v12 }
 0x206   : > { %v1040_v52 = vmul.f32 %v2872_v53, %v1029_v56  ;;  %v1041_v51 = vmul.f32 %v2872_v53, %v1027_v55  ;;  %v1129_v53 = vmul.f32 %v2906_v1, %v2802_v40  ;;  %v1113_v1 = vsel %vm3033_vm13, %v1109_v29, 0.0 }
 0x207   : > { %v1117_v55 = vadd.f32 %v1113_v1, %v1084_v37 }
 0x208   : > { %v1057_v15 = vpop.permute.xlu1 %1056  ;;  %v1044_v26 = vsel %vm2943_vm3, %v1040_v52, 0.0  ;;  %v1049_v59 = vadd.f32 %v1041_v51, %v1016_v25  ;;  %v1147_v52 = vsel %vm3708_vm12, %v3001_v42, %v2928_v18 }
 0x209   : > { %v1060_v50 = vsel %vm3706_vm8, %v1053_v22, %v1057_v15  ;;  %v1062_v31 = vsel %vm3706_vm8, %v1057_v15, %v1053_v22  ;;  %v1130_v22 = vmul.f32 %v2887_v57, %v2812_v43  ;;  %v1048_v56 = vadd.f32 %v1044_v26, %v1015_v2  ;;  %vm3134_vm8 = vmand %vm3107_vm15, %vm3033_vm13 }
 0x20a   : > { %v1073_v34 = vmul.f32 %v2856_v48, %v1062_v31  ;;  %v1074_v27 = vmul.f32 %v2856_v48, %v1060_v50  ;;  %v1133_v31 = vadd.f32 %v1129_v53, %v1117_v55 }
 0x20c   : > { %v1081_v14 = vsel %vm2988_vm10, %v1073_v34, 0.0  ;;  %v1082_v48 = vsel %vm3056_vm14, %v1074_v27, 0.0  ;;  %v1094_v41 = vpop.permute.xlu1 %1093 }
 0x20d   : > { %v1097_v40 = vsel %vm3707_vm7, %v1090_v61, %v1094_v41  ;;  %v1099_v43 = vsel %vm3707_vm7, %v1094_v41, %v1090_v61  ;;  %v1085_v58 = vadd.f32 %v1081_v14, %v1048_v56  ;;  %v1086_v44 = vadd.f32 %v1082_v48, %v1049_v59 }
 0x20e   : > { %v1110_v24 = vmul.f32 %v2899_v62, %v1099_v43  ;;  %v1111_v36 = vmul.f32 %v2899_v62, %v1097_v40  ;;  %v1191_v61 = vmul.f32 %v2908_v3, %v1180_v54  ;;  %v1131_v62 = vmul.f32 %v2887_v57, %v2838_v45 }
 0x20f   : > { %v1158_v45 = vmul.f32 %v2910_v4, %v1147_v52  ;;  %vm3709_vm7 = vcmp.lt.s32.totalorder %v2934_v23, 112 }
 0x210   : > { %v1114_v8 = vsel %vm2949_vm4, %v1110_v24, 0.0  ;;  %v1115_v32 = vsel %vm3033_vm13, %v1111_v36, 0.0  ;;  %v1143_v15 = vpop.permute.xlu1 %1142  ;;  %v1199_v37 = vsel %vm3134_vm8, %v1191_v61, 0.0 }
 0x211   : > { %v1118_v25 = vadd.f32 %v1114_v8, %v1085_v58  ;;  %v1119_v51 = vadd.f32 %v1115_v32, %v1086_v44  ;;  %v1146_v18 = vsel %vm3708_vm12, %v3024_v49, %v1143_v15  ;;  %v1148_v3 = vsel %vm3708_vm12, %v1143_v15, %v3024_v49  ;;  %v1240_v32 = vpop.permute.xlu0 %1239 }
 0x212   : > { %v1159_v57 = vmul.f32 %v2894_v60, %v1146_v18  ;;  %v1160_v50 = vmul.f32 %v2894_v60, %v1148_v3  ;;  %v1218_v49 = vsel %vm3709_vm7, %v1213_v38, %v3031_v19  ;;  %vm3711_vm12 = vcmp.lt.s32.totalorder %v2934_v23, 111 }
 0x213   : > { %v1134_v29 = vadd.f32 %v1130_v22, %v1118_v25  ;;  %v1135_v26 = vadd.f32 %v1131_v62, %v1119_v51  ;;  %v1216_v60 = vsel %vm3709_vm7, %v3031_v19, %v1213_v38  ;;  %v1162_v22 = vsel %vm3056_vm14, %v1158_v45, 0.0 }
 0x214   : > { %v1163_v34 = vsel %vm2973_vm9, %v1159_v57, 0.0  ;;  %v1164_v27 = vsel %vm3056_vm14, %v1160_v50, 0.0  ;;  %v1176_v4 = vpop.permute.xlu1 %1175  ;;  %v1230_v54 = vmul.f32 %v2914_v6, %v1218_v49  ;;  %v1166_v41 = vadd.f32 %v1162_v22, %v1133_v31 }
 0x215   : > { %v1179_v53 = vsel %vm3712_vm11, %v3053_v17, %v1176_v4  ;;  %v1181_v2 = vsel %vm3712_vm11, %v1176_v4, %v3053_v17  ;;  %v1217_v19 = vsel %vm3709_vm7, %v3017_v35, %v2932_v21  ;;  %v1167_v56 = vadd.f32 %v1163_v34, %v1134_v29  ;;  %v1286_v22 = vpop.permute.xlu0 %1285 }
 0x216   : > { %v1192_v14 = vmul.f32 %v2901_v63, %v1179_v53  ;;  %v1193_v48 = vmul.f32 %v2901_v63, %v1181_v2  ;;  %v1168_v59 = vadd.f32 %v1164_v27, %v1135_v26  ;;  %v1215_v17 = vsel %vm3709_vm7, %v2932_v21, %v3017_v35  ;;  %vm3189_vm7 = vmand %vm3107_vm15, %vm3056_vm14 }
 0x217   : > { %v1229_v40 = vmul.f32 %v2914_v6, %v1216_v60  ;;  %v1228_v6 = vmul.f32 %v2912_v5, %v1217_v19  ;;  %v1234_v21 = vsel %vm3107_vm15, %v1230_v54, 0.0  ;;  %v1203_v61 = vadd.f32 %v1199_v37, %v1166_v41 }
 0x218   : > { %v1200_v43 = vsel %vm2949_vm4, %v1192_v14, 0.0  ;;  %v1201_v63 = vsel %vm3134_vm8, %v1193_v48, 0.0  ;;  %v1246_v1 = vpop.permute.xlu1 %1245  ;;  %v1227_v8 = vmul.f32 %v2912_v5, %v1215_v17  ;;  %vm1705_vm11 = vcmask 244736  }
 0x219   : > { %v1204_v24 = vadd.f32 %v1200_v43, %v1167_v56  ;;  %v1205_v36 = vadd.f32 %v1201_v63, %v1168_v59  ;;  %v1249_v55 = vsel %vm3711_vm12, %v3082_v20, %v1246_v1  ;;  %v1251_v52 = vsel %vm3711_vm12, %v1246_v1, %v3082_v20 }
 0x21a   : > { %v1262_v58 = vmul.f32 %v2918_v9, %v1249_v55  ;;  %v1263_v44 = vmul.f32 %v2918_v9, %v1251_v52  ;;  %v1232_v45 = vsel %vm3107_vm15, %v1228_v6, 0.0  ;;  %v1235_v50 = vadd.f32 %v1227_v8, %v3028_v46  ;;  %v810_v46 = vld [vmem:[%s3762_s28 + $0x8] sm:$0x7f] }
 0x21b   : > { %v1238_v38 = vadd.f32 %v1234_v21, %v1205_v36  ;;  %v1237_v20 = vadd.f32 %v1229_v40, %v1204_v24  ;;  %v1236_v31 = vadd.f32 %v1232_v45, %v1203_v61 }
 0x21c   : > { %v1268_v62 = vsel %vm2973_vm9, %v1262_v58, 0.0  ;;  %v1244_v15 = vpop.permute.xlu1 %1243  ;;  %v1269_v25 = vsel %vm3189_vm7, %v1263_v44, 0.0 }
 0x21d   : > { %v1248_v51 = vsel %vm3711_vm12, %v1240_v32, %v1244_v15  ;;  %v1250_v18 = vsel %vm3711_vm12, %v1244_v15, %v1240_v32  ;;  %v1273_v9 = vadd.f32 %v1269_v25, %v1238_v38  ;;  %v1272_v3 = vadd.f32 %v1268_v62, %v1237_v20 }
 0x21e   : > { %v1260_v5 = vmul.f32 %v2922_v13, %v1248_v51  ;;  %v1261_v57 = vmul.f32 %v2922_v13, %v1250_v18  ;;  %v809_v13 = vld [vmem:[%s3762_s28] sm:$0xff]  ;;  %vm1712_vm12 = vcmask 1045504  }
 0x21f   : > { %v1277_v49 = vmax.f32 %v1273_v9, 0.0  ;;  %v1276_v29 = vmax.f32 %v1272_v3, 0.0 }
 0x220   : > { %v1266_v26 = vsel %vm2973_vm9, %v1260_v5, 0.0  ;;  %v1267_v34 = vsel %vm3189_vm7, %v1261_v57, 0.0 }
 0x221   : > { %2437 = vmatprep.subr.msk.mxu1 %vm3714_vm0, %v1277_v49  ;;  %v1271_v27 = vadd.f32 %v1267_v34, %v1236_v31  ;;  %v1270_v4 = vadd.f32 %v1266_v26, %v1235_v50 }
 0x222   : > { %2438 = vmatpush1.msk.msra.mxu1 %vm3714_vm0, %v1276_v29 }
 0x223   : > { %v1275_v37 = vmax.f32 %v1271_v27, 0.0  ;;  %v1274_v60 = vmax.f32 %v1270_v4, 0.0 }
 0x225   : > { %1330 = vmatprep.subr.mxu1 %v1275_v37 }
 0x226   : > { %1331 = vmatpush1.msra.mxu1 %v1274_v60 }
 0x227   : > { %2439 = vmatmul.mubr.msk.f32.vlgmr.msra.gmra.mxu1 %vm3713_vm1, %v809_v13 }
 0x228   : > { %1370 = vmatprep.mubr.f32.mxu1 %v2549_v7 }
 0x229   : > { %v1281_v14 = vpop.permute.xlu1 %1280 }
 0x22b   : > { %2440 = vmatmul.mubr.msk.f32.gmra.mxu1 %vm3713_vm1, %v810_v46 }
 0x22c   : > { %1670 = vmatprep.mubr.f32.mxu1 %v2549_v7 }
 0x2e7   : > { %v1366_v53 = vpop.f32.mrf.mxu1 }
 0x2e8   : > { %v1367_v41 = vadd.f32 %v1366_v53, %v1281_v14 }
 0x2e9   : > { %v1368_v2 = vpop.f32.mrf.mxu1 }
 0x2ea   : > { %v1369_v17 = vadd.f32 %v1368_v2, %v1281_v14 }
 0x2eb   : > { %v1372_v54 = vpop.f32.mrf.mxu1 }
 0x2ec   : > { %v1373_v48 = vadd.f32 %v1372_v54, %v1286_v22 }
 0x2ed   : > { %v1374_v19 = vpop.f32.mrf.mxu1 }
 0x2ee   : > { %v1381_v56 = vsel %vm3714_vm0, %v1373_v48, 0.0  ;;  %v1375_v59 = vadd.f32 %v1374_v19, %v1286_v22  ;;  %v1441_v19 = vpop.permute.xlu1 %1440 }
 0x2ef   : > { %v1382_v40 = vadd.f32 %v1381_v56, %v1367_v41 }
 0x2f0   : > { %v1389_v43 = vsel %vm3714_vm0, %v1375_v59, 0.0 }
 0x2f1   : > { %v1383_v63 = vrot.slane %v1382_v40, 4  ;;  %v1390_v1 = vadd.f32 %v1389_v43, %v1369_v17 }
 0x2f3   : > { %v1384_v24 = vadd.f32 %v1383_v63, %v1382_v40  ;;  %v1391_v36 = vrot.slane %v1390_v1, 4 }
 0x2f5   : > { %v1385_v55 = vrot.slane %v1384_v24, 2  ;;  %v1392_v52 = vadd.f32 %v1391_v36, %v1390_v1 }
 0x2f7   : > { %v1386_v6 = vadd.f32 %v1385_v55, %v1384_v24  ;;  %v1393_v21 = vrot.slane %v1392_v52, 2  ;;  %v1455_v55 = vpop.permute.xlu1 %1454 }
 0x2f9   : > { %v1387_v58 = vrot.slane %v1386_v6, 1  ;;  %v1394_v44 = vadd.f32 %v1393_v21, %v1392_v52 }
 0x2fb   : > { %v1388_v61 = vadd.f32 %v1387_v58, %v1386_v6  ;;  %v1395_v38 = vrot.slane %v1394_v44, 1 }
 0x2fd   : > { %v1397_v20 = vmul.f32 0.06666667, %v1388_v61  ;;  %v1396_v8 = vadd.f32 %v1395_v38, %v1394_v44  ;;  %v1461_v38 = vld [vmem:[%s3763_s11] sm:$0xff] }
 0x2ff   : > { %v1399_v32 = vsub.f32 %v1367_v41, %v1397_v20  ;;  %v1401_v62 = vsub.f32 %v1373_v48, %v1397_v20  ;;  %v1398_v15 = vmul.f32 0.06666667, %v1396_v8  ;;  %v1462_v20 = vld [vmem:[%s3763_s11 + $0x8] sm:$0x7f]  ;;  %s3772_s11 = smov 15  }
 0x301   : > { %v1403_v25 = vmul.f32 %v1399_v32, %v1399_v32  ;;  %v1405_v51 = vmul.f32 %v1401_v62, %v1401_v62  ;;  %v1400_v18 = vsub.f32 %v1369_v17, %v1398_v15  ;;  %v1402_v9 = vsub.f32 %v1375_v59, %v1398_v15  ;;  %v1436_v17 = vpop.permute.xlu0 %1435 }
 0x303   : > { %v1407_v3 = vsel %vm3714_vm0, %v1405_v51, 0.0  ;;  %v1404_v45 = vmul.f32 %v1400_v18, %v1400_v18  ;;  %v1406_v5 = vmul.f32 %v1402_v9, %v1402_v9  ;;  %v1473_v51 = vpop.permute.xlu1 %1472 }
 0x304   : > { %v1408_v57 = vadd.f32 %v1407_v3, %v1403_v25 }
 0x305   : > { %v1415_v50 = vsel %vm3714_vm0, %v1406_v5, 0.0  ;;  %v1450_v21 = vpop.permute.xlu0 %1449 }
 0x306   : > { %v1409_v31 = vrot.slane %v1408_v57, 4  ;;  %v1416_v49 = vadd.f32 %v1415_v50, %v1404_v45 }
 0x308   : > { %v1410_v29 = vadd.f32 %v1409_v31, %v1408_v57  ;;  %v1417_v26 = vrot.slane %v1416_v49, 4 }
 0x309   : > { %v1468_v8 = vpop.permute.xlu0 %1467 }
 0x30a   : > { %v1411_v34 = vrot.slane %v1410_v29, 2  ;;  %v1418_v27 = vadd.f32 %v1417_v26, %v1416_v49 }
 0x30c   : > { %v1412_v4 = vadd.f32 %v1411_v34, %v1410_v29  ;;  %v1419_v37 = vrot.slane %v1418_v27, 2 }
 0x30e   : > { %v1413_v60 = vrot.slane %v1412_v4, 1  ;;  %v1420_v13 = vadd.f32 %v1419_v37, %v1418_v27  ;;  %v1796_v27 = vld [vmem:[%s3659_s15] sm:$0xff]  ;;  %v1799_v37 = vld [vmem:[%s3660_s16 + $0x8] sm:$0x7f] }
 0x310   : > { %v1414_v46 = vadd.f32 %v1413_v60, %v1412_v4  ;;  %v1421_v53 = vrot.slane %v1420_v13, 1  ;;  %v1797_v4 = vld [vmem:[%s3659_s15 + $0x8] sm:$0x7f]  ;;  %v1798_v60 = vld [vmem:[%s3660_s16] sm:$0xff] }
 0x312   : > { %v1423_v2 = vmul.f32 0.06666667, %v1414_v46  ;;  %v1422_v22 = vadd.f32 %v1421_v53, %v1420_v13  ;;  %v1883_v13 = vld [vmem:[%s3662_s18 + $0x8] sm:$0x7f]  ;;  %v1882_v46 = vld [vmem:[%s3662_s18] sm:$0xff] }
 0x313   : > { %v3267_v53 = vld [vmem:[%s3663_s19 + $0x8] sm:$0x7f] }
 0x314   : > { %v1425_v54 = vadd.f32 1e-05, %v1423_v2  ;;  %v1424_v14 = vmul.f32 0.06666667, %v1422_v22  ;;  %v1887_v2 = vld [vmem:[%s3664_s20 + $0x8] sm:$0x7f] }
 0x315   : > { %v1886_v22 = vld [vmem:[%s3664_s20] sm:$0xff] }
 0x316   : > { %2528 = vrsqrt.f32 %v1425_v54  ;;  %v1426_v48 = vadd.f32 1e-05, %v1424_v14 }
 0x318   : > { %2530 = vrsqrt.f32 %v1426_v48 }
 0x323   : > { %v2529_v41 = vpop.eup %2528 }
 0x324   : > { %v1431_v56 = vmul.f32 %v2529_v41, %v1401_v62  ;;  %v1429_v40 = vmul.f32 %v2529_v41, %v1399_v32 }
 0x325   : > { %v2531_v59 = vpop.eup %2530 }
 0x326   : > { %v1432_v43 = vmul.f32 %v2531_v59, %v1402_v9  ;;  %v1430_v63 = vmul.f32 %v2531_v59, %v1400_v18  ;;  %v1445_v1 = vmul.f32 %v1441_v19, %v1431_v56  ;;  %v1443_v52 = vmul.f32 %v1436_v17, %v1429_v40 }
 0x328   : > { %v1446_v24 = vmul.f32 %v1441_v19, %v1432_v43  ;;  %v1444_v36 = vmul.f32 %v1436_v17, %v1430_v63  ;;  %v1459_v58 = vadd.f32 %v1455_v55, %v1445_v1  ;;  %v1457_v61 = vadd.f32 %v1450_v21, %v1443_v52  ;;  %v1585_v43 = vld [vmem:[%s3657_s13 + $0x8] sm:$0xff]  ;;  %v1586_v63 = vld [vmem:[%s3657_s13 + $0x10] sm:$0xff]  ;;  %v1587_v1 = vld [vmem:[%s3657_s13 + $0x18] sm:$0x3f] }
 0x32a   : > { %v1460_v6 = vadd.f32 %v1455_v55, %v1446_v24  ;;  %v1458_v44 = vadd.f32 %v1450_v21, %v1444_v36 }
 0x32c   : > { %2441 = vmatprep.subr.msk.mxu0 %vm3714_vm0, %v1460_v6 }
 0x32d   : > { %2442 = vmatpush1.msk.msra.mxu0 %vm3714_vm0, %v1459_v58 }
 0x32e   : > { %1517 = vmatprep.subr.mxu0 %v1458_v44 }
 0x32f   : > { %1518 = vmatpush1.msra.mxu0 %v1457_v61 }
 0x330   : > { %2443 = vmatmul.mubr.msk.f32.vlgmr.msra.gmra.mxu0 %vm3713_vm1, %v1461_v38 }
 0x331   : > { %1557 = vmatprep.mubr.f32.mxu0 %v2549_v7 }
 0x334   : > { %2444 = vmatmul.mubr.msk.f32.gmra.mxu0 %vm3713_vm1, %v1462_v20 }
 0x335   : > { %1783 = vmatprep.mubr.f32.mxu0 %v2549_v7 }
 0x3f0   : > { %v1553_v32 = vpop.f32.mrf.mxu0 }
 0x3f1   : > { %v1554_v62 = vadd.f32 %v1553_v32, %v1468_v8 }
 0x3f2   : > { %v1555_v15 = vpop.f32.mrf.mxu0 }
 0x3f3   : > { %v1556_v25 = vadd.f32 %v1555_v15, %v1468_v8  ;;  %v1564_v9 = vmul.f32 %v1554_v62, %v1554_v62 }
 0x3f4   : > { %v1559_v18 = vpop.f32.mrf.mxu0 }
 0x3f5   : > { %v1565_v3 = vmul.f32 %v1556_v25, %v1556_v25  ;;  %v1560_v45 = vadd.f32 %v1559_v18, %v1473_v51  ;;  %v1704_v18 = vld [vmem:[%s3658_s14 + $0x8] sm:$0x7f] }
 0x3f6   : > { %v1561_v5 = vpop.f32.mrf.mxu0 }
 0x3f7   : > { %v1566_v57 = vmul.f32 %v1560_v45, %v1560_v45  ;;  %v1562_v50 = vadd.f32 %v1561_v5, %v1473_v51  ;;  %v1568_v31 = vadd.f32 %v1565_v3, %v1564_v9  ;;  %v1703_v51 = vld [vmem:[%s3658_s14] sm:$0xff]  ;;  %v3764_v3 = vmov 3  }
 0x3f8   : > { %v1884_v9 = vld [vmem:[%s3663_s19] sm:$0xff]  ;;  %v3766_v5 = vmov 5  }
 0x3f9   : > { %v1567_v49 = vmul.f32 %v1562_v50, %v1562_v50  ;;  %1569 = vadd.xlane.f32.xlu0 %v1568_v31  ;;  %v1571_v29 = vsel %vm3714_vm0, %v1566_v57, 0.0  ;;  %v3767_v57 = vmov 6   ;;  %v3769_v31 = vmov 8  }
 0x3fb   : > { %v1572_v26 = vsel %vm3714_vm0, %v1567_v49, 0.0  ;;  %v3770_v49 = vmov 0  }
 0x3fc   : > { %v1573_v34 = vadd.f32 %v1572_v26, %v1571_v29 }
 0x3fe   : > { %1574 = vadd.xlane.f32.xlu1 %v1573_v34 }
 0x40f   : > { %1854 = vperm.xlu1 %2509, %v1796_v27   ;;  %1859 = vperm.xlu0 %2507, %v1797_v4  }
 0x413   : > { %1873 = vperm.xlu1 %2509, %v1799_v37   ;;  %1868 = vperm.xlu0 %2507, %v1798_v60  }
 0x417   : > { %1897 = vperm.xlu1 %2509, %v1883_v13   ;;  %1892 = vperm.xlu0 %2507, %v1882_v46  }
 0x41b   : > { %2020 = vperm.xlu1 %2509, %v3267_v53   ;;  %2510 = vset.pattern.permute.xlu0 %v2551_v11 }
 0x41c   : > { %2052 = vperm.xlu0 %2510, %v3267_v53  }
 0x41f   : > { %1996 = vperm.xlu1 %2509, %v1887_v2  }
 0x420   : > { %2511 = vset.pattern.permute.xlu0 %v2550_v10 }
 0x421   : > { %2084 = vperm.xlu0 %2511, %v3267_v53  }
 0x423   : > { %1991 = vperm.xlu1 %2509, %v1886_v22  }
 0x425   : > { %2080 = vperm.xlu0 %2511, %v1884_v9  }
 0x427   : > { %2512 = vset.pattern.permute.xlu1 %v2551_v11  ;;  %v1584_v11 = vld [vmem:[%s3657_s13] sm:$0xff] }
 0x428   : > { %2048 = vperm.xlu1 %2512, %v1884_v9  }
 0x429   : > { %2514 = vset.pattern.permute.xlu0 %v3764_v3 }
 0x42a   : > { %2112 = vperm.xlu0 %2514, %v1884_v9  }
 0x42c   : > { %2513 = vset.pattern.permute.xlu1 %v3764_v3 }
 0x42d   : > { %2116 = vperm.xlu1 %2513, %v3267_v53  }
 0x482   : > { %v1570_v54 = vpop.xlane.xlu0 %1569 }
 0x483   : > { %v1576_v14 = vmax.f32 %v1570_v54, 1e-24 }
 0x485   : > { %2532 = vrsqrt.f32 %v1576_v14 }
 0x487   : > { %v1575_v48 = vpop.xlane.xlu1 %1574 }
 0x488   : > { %v1577_v41 = vmax.f32 %v1575_v48, 1e-24 }
 0x48a   : > { %2534 = vrsqrt.f32 %v1577_v41 }
 0x492   : > { %v2533_v19 = vpop.eup %2532 }
 0x493   : > { %v1581_v40 = vmul.f32 %v2533_v19, %v1556_v25  ;;  %v1580_v10 = vmul.f32 %v2533_v19, %v1554_v62 }
 0x497   : > { %v2535_v56 = vpop.eup %2534 }
 0x498   : > { %v1583_v59 = vmul.f32 %v2535_v56, %v1562_v50  ;;  %v1582_v17 = vmul.f32 %v2535_v56, %v1560_v45  ;;  %v3765_v45 = vmov 4   ;;  %v3768_v50 = vmov 7  }
 0x499   : > { %2517 = vset.pattern.permute.xlu1 %v3765_v45  ;;  %2515 = vset.pattern.permute.xlu0 %v3765_v45 }
 0x49a   : > { %2445 = vmatprep.subr.msk.mxu1 %vm3714_vm0, %v1583_v59  ;;  %2132 = vperm.xlu1 %2517, %v1884_v9  }
 0x49b   : > { %2446 = vmatpush1.msk.msra.mxu1 %vm3714_vm0, %v1582_v17  ;;  %2136 = vperm.xlu0 %2515, %v3267_v53  }
 0x49c   : > { %1636 = vmatprep.subr.mxu1 %v1581_v40 }
 0x49d   : > { %1637 = vmatpush1.msra.mxu1 %v1580_v10 }
 0x49e   : > { %2447 = vmatmul.mubr.msk.f32.vlgmr.msra.gmra.mxu1 %vm3713_vm1, %v1584_v11  ;;  %2518 = vset.pattern.permute.xlu1 %v3766_v5 }
 0x49f   : > { %1676 = vmatprep.mubr.f32.mxu1 %v2549_v7  ;;  %2516 = vset.pattern.permute.xlu0 %v3766_v5 }
 0x4a0   : > { %2164 = vperm.xlu0 %2516, %v3267_v53   ;;  %2160 = vperm.xlu1 %2518, %v1884_v9  }
 0x4a2   : > { %2448 = vmatmul.mubr.msk.f32.gmra.mxu1 %vm3713_vm1, %v1585_v43 }
 0x4a3   : > { %1682 = vmatprep.mubr.f32.mxu1 %v2549_v7 }
 0x4a4   : > { %2519 = vset.pattern.permute.xlu0 %v3767_v57  ;;  %2520 = vset.pattern.permute.xlu1 %v3768_v50 }
 0x4a5   : > { %2196 = vperm.xlu0 %2519, %v3267_v53   ;;  %2228 = vperm.xlu1 %2520, %v3267_v53  }
 0x4a6   : > { %2449 = vmatmul.mubr.msk.f32.gmra.mxu1 %vm3713_vm1, %v1586_v63 }
 0x4a7   : > { %1688 = vmatprep.mubr.f32.mxu1 %v2549_v7 }
 0x4a9   : > { %2192 = vperm.xlu0 %2519, %v1884_v9   ;;  %2523 = vset.pattern.permute.xlu1 %v3769_v31 }
 0x4aa   : > { %2450 = vmatmul.mubr.msk.f32.gmra.mxu1 %vm3713_vm1, %v1587_v1  ;;  %2260 = vperm.xlu1 %2523, %v3267_v53  }
 0x4ab   : > { %2357 = vmatprep.mubr.f32.mxu1 %v2549_v7 }
 0x4ad   : > { %2521 = vset.pattern.permute.xlu0 %v3768_v50 }
 0x4ae   : > { %2224 = vperm.xlu0 %2521, %v1884_v9   ;;  %2256 = vperm.xlu1 %2523, %v1884_v9  }
 0x4b2   : > { %2522 = vset.pattern.permute.xlu0 %v3770_v49  ;;  %v1855_v49 = vpop.permute.xlu1 %1854 }
 0x4b3   : > { %2015 = vperm.xlu0 %2522, %v1884_v9  }
 0x55e   : > { %v1672_v24 = vpop.f32.mrf.mxu1 }
 0x55f   : > { %v1695_v25 = vmax.f32 %v1672_v24, 0.0 }
 0x560   : > { %v1674_v36 = vpop.f32.mrf.mxu1 }
 0x561   : > { %v1696_v15 = vmax.f32 %v1674_v36, 0.0 }
 0x562   : > { %v1678_v55 = vpop.f32.mrf.mxu1 }
 0x563   : > { %v1697_v62 = vmax.f32 %v1678_v55, 0.0 }
 0x564   : > { %v1680_v52 = vpop.f32.mrf.mxu1 }
 0x565   : > { %v1698_v32 = vmax.f32 %v1680_v52, 0.0 }
 0x566   : > { %v1684_v6 = vpop.f32.mrf.mxu1 }
 0x567   : > { %v1699_v8 = vmax.f32 %v1684_v6, 0.0 }
 0x568   : > { %v1686_v21 = vpop.f32.mrf.mxu1 }
 0x569   : > { %v1700_v20 = vmax.f32 %v1686_v21, 0.0 }
 0x56a   : > { %v1690_v58 = vpop.f32.mrf.mxu1 }
 0x56b   : > { %v1701_v38 = vmax.f32 %v1690_v58, 0.0 }
 0x56c   : > { %v1692_v44 = vpop.f32.mrf.mxu1 }
 0x56d   : > { %v1702_v61 = vmax.f32 %v1692_v44, 0.0 }
 0x56f   : > { %2451 = vmatprep.subr.msk.mxu0 %vm1712_vm12, %v1702_v61 }
 0x570   : > { %2452 = vmatpush1.msk.msra.mxu0 %vm1712_vm12, %v1701_v38 }
 0x571   : > { %1745 = vmatprep.subr.mxu0 %v1700_v20 }
 0x572   : > { %1746 = vmatpush1.msra.mxu0 %v1699_v8 }
 0x573   : > { %1747 = vmatprep.subr.mxu0 %v1698_v32 }
 0x574   : > { %1748 = vmatpush1.msra.mxu0 %v1697_v62 }
 0x575   : > { %1749 = vmatprep.subr.mxu0 %v1696_v15 }
 0x576   : > { %1750 = vmatpush1.msra.mxu0 %v1695_v25 }
 0x577   : > { %2453 = vmatmul.mubr.msk.f32.vlgmr.msra.gmra.mxu0 %vm1705_vm11, %v1703_v51 }
 0x578   : > { %1789 = vmatprep.mubr.f32.mxu0 %v2549_v7 }
 0x57b   : > { %2454 = vmatmul.mubr.msk.f32.gmra.mxu0 %vm1705_vm11, %v1704_v18  ;;  %vm3774_vm11 = vcmp.lt.s32.totalorder %v2934_v23, 1 }
 0x57c   : > { %1976 = vmatprep.mubr.f32.mxu0 %v2549_v7  ;;  %vm3775_vm12 = vmmov %vm3774_vm11 }
 0x637   : > { %v1785_v29 = vpop.f32.mrf.mxu0 }
 0x639   : > { %v1787_v26 = vpop.f32.mrf.mxu0 }
 0x63b   : > { %v1791_v34 = vpop.f32.mrf.mxu0 }
 0x63c   : > { %v1800_v27 = vsel %vm3714_vm0, %v1791_v34, 0.0 }
 0x63d   : > { %v1801_v4 = vadd.f32 %v1800_v27, %v1785_v29  ;;  %v1793_v37 = vpop.f32.mrf.mxu0 }
 0x63e   : > { %v1808_v60 = vsel %vm3714_vm0, %v1793_v37, 0.0 }
 0x63f   : > { %v1802_v13 = vrot.slane %v1801_v4, 4  ;;  %v1809_v46 = vadd.f32 %v1808_v60, %v1787_v26 }
 0x641   : > { %v1803_v2 = vadd.f32 %v1802_v13, %v1801_v4  ;;  %v1810_v53 = vrot.slane %v1809_v46, 4 }
 0x643   : > { %v1804_v22 = vrot.slane %v1803_v2, 2  ;;  %v1811_v54 = vadd.f32 %v1810_v53, %v1809_v46 }
 0x645   : > { %v1805_v14 = vadd.f32 %v1804_v22, %v1803_v2  ;;  %v1812_v48 = vrot.slane %v1811_v54, 2  ;;  %v1874_v2 = vpop.permute.xlu1 %1873 }
 0x647   : > { %v1806_v41 = vrot.slane %v1805_v14, 1  ;;  %v1813_v19 = vadd.f32 %v1812_v48, %v1811_v54 }
 0x649   : > { %v1807_v56 = vadd.f32 %v1806_v41, %v1805_v14  ;;  %v1814_v59 = vrot.slane %v1813_v19, 1 }
 0x64b   : > { %v1816_v17 = vmul.f32 0.06666667, %v1807_v56  ;;  %v1815_v40 = vadd.f32 %v1814_v59, %v1813_v19  ;;  %v1880_v19 = vld [vmem:[%s3661_s17] sm:$0xff]  ;;  %v1881_v56 = vld [vmem:[%s3661_s17 + $0x8] sm:$0x7f]  ;;  %v1898_v59 = vpop.permute.xlu1 %1897 }
 0x64d   : > { %v1818_v10 = vsub.f32 %v1785_v29, %v1816_v17  ;;  %v1820_v11 = vsub.f32 %v1791_v34, %v1816_v17  ;;  %v1817_v43 = vmul.f32 0.06666667, %v1815_v40  ;;  %v1860_v34 = vpop.permute.xlu0 %1859 }
 0x64f   : > { %v1822_v63 = vmul.f32 %v1818_v10, %v1818_v10  ;;  %v1824_v1 = vmul.f32 %v1820_v11, %v1820_v11  ;;  %v1819_v24 = vsub.f32 %v1787_v26, %v1817_v43  ;;  %v1821_v36 = vsub.f32 %v1793_v37, %v1817_v43  ;;  %v3346_v17 = vpop.permute.xlu1 %2020 }
 0x651   : > { %v1826_v55 = vsel %vm3714_vm0, %v1824_v1, 0.0  ;;  %v1823_v52 = vmul.f32 %v1819_v24, %v1819_v24  ;;  %v1825_v6 = vmul.f32 %v1821_v36, %v1821_v36  ;;  %v1869_v54 = vpop.permute.xlu0 %1868 }
 0x652   : > { %v1827_v21 = vadd.f32 %v1826_v55, %v1822_v63 }
 0x653   : > { %v1834_v58 = vsel %vm3714_vm0, %v1825_v6, 0.0  ;;  %v3348_v40 = vpop.permute.xlu1 %1996 }
 0x654   : > { %v1828_v44 = vrot.slane %v1827_v21, 4  ;;  %v1835_v61 = vadd.f32 %v1834_v58, %v1823_v52 }
 0x655   : > { %v1893_v63 = vpop.permute.xlu0 %1892 }
 0x656   : > { %v1829_v38 = vadd.f32 %v1828_v44, %v1827_v21  ;;  %v1836_v20 = vrot.slane %v1835_v61, 4 }
 0x658   : > { %v1830_v8 = vrot.slane %v1829_v38, 2  ;;  %v1837_v32 = vadd.f32 %v1836_v20, %v1835_v61  ;;  %v1889_v61 = vld [vmem:[%s3666_s22] sm:$0x7] }
 0x65a   : > { %v1831_v62 = vadd.f32 %v1830_v8, %v1829_v38  ;;  %v1838_v15 = vrot.slane %v1837_v32, 2  ;;  %v3416_v38 = vpop.permute.xlu0 %2052 }
 0x65c   : > { %v1832_v25 = vrot.slane %v1831_v62, 1  ;;  %v1839_v51 = vadd.f32 %v1838_v15, %v1837_v32 }
 0x65e   : > { %v1833_v18 = vadd.f32 %v1832_v25, %v1831_v62  ;;  %v1840_v9 = vrot.slane %v1839_v51, 1  ;;  %v3420_v20 = vpop.permute.xlu0 %2084 }
 0x660   : > { %v1842_v3 = vmul.f32 0.06666667, %v1833_v18  ;;  %v1841_v45 = vadd.f32 %v1840_v9, %v1839_v51 }
 0x662   : > { %v1844_v5 = vadd.f32 1e-05, %v1842_v3  ;;  %v1843_v57 = vmul.f32 0.06666667, %v1841_v45  ;;  %v2081_v8 = vpop.permute.xlu0 %2080 }
 0x664   : > { %2536 = vrsqrt.f32 %v1844_v5  ;;  %v1845_v50 = vadd.f32 1e-05, %v1843_v57 }
 0x666   : > { %2538 = vrsqrt.f32 %v1845_v50  ;;  %v2113_v32 = vpop.permute.xlu0 %2112 }
 0x66a   : > { %v3430_v62 = vpop.permute.xlu0 %2136 }
 0x66e   : > { %v3432_v15 = vpop.permute.xlu0 %2164 }
 0x671   : > { %v2537_v31 = vpop.eup %2536 }
 0x672   : > { %v1850_v29 = vmul.f32 %v2537_v31, %v1820_v11  ;;  %v1848_v27 = vmul.f32 %v2537_v31, %v1818_v10  ;;  %v3350_v10 = vpop.permute.xlu1 %1991  ;;  %v3436_v51 = vpop.permute.xlu0 %2196 }
 0x673   : > { %v2539_v26 = vpop.eup %2538 }
 0x674   : > { %v1849_v4 = vmul.f32 %v2539_v26, %v1819_v24  ;;  %v1851_v37 = vmul.f32 %v2539_v26, %v1821_v36  ;;  %v1864_v60 = vmul.f32 %v1860_v34, %v1850_v29  ;;  %v1862_v53 = vmul.f32 %v1855_v49, %v1848_v27 }
 0x676   : > { %v1865_v13 = vmul.f32 %v1860_v34, %v1851_v37  ;;  %v1863_v46 = vmul.f32 %v1855_v49, %v1849_v4  ;;  %v1878_v14 = vadd.f32 %v1874_v2, %v1864_v60  ;;  %v1876_v41 = vadd.f32 %v1869_v54, %v1862_v53  ;;  %v3352_v11 = vpop.permute.xlu1 %2048  ;;  %v3440_v9 = vpop.permute.xlu0 %2192 }
 0x678   : > { %v1879_v22 = vadd.f32 %v1874_v2, %v1865_v13  ;;  %v1877_v48 = vadd.f32 %v1869_v54, %v1863_v46 }
 0x67a   : > { %2455 = vmatprep.subr.msk.mxu0 %vm3714_vm0, %v1879_v22  ;;  %v3354_v43 = vpop.permute.xlu1 %2116  ;;  %v3444_v45 = vpop.permute.xlu0 %2224 }
 0x67b   : > { %2456 = vmatpush1.msk.msra.mxu0 %vm3714_vm0, %v1878_v14 }
 0x67c   : > { %1942 = vmatprep.subr.mxu0 %v1877_v48 }
 0x67d   : > { %1943 = vmatpush1.msra.mxu0 %v1876_v41 }
 0x67e   : > { %2457 = vmatmul.mubr.msk.f32.vlgmr.msra.gmra.mxu0 %vm3713_vm1, %v1880_v19  ;;  %v2016_v57 = vpop.permute.xlu0 %2015 }
 0x67f   : > { %1982 = vmatprep.mubr.f32.mxu0 %v2549_v7  ;;  %v3356_v7 = vpop.permute.xlu1 %2132 }
 0x682   : > { %2458 = vmatmul.mubr.msk.f32.gmra.mxu0 %vm3713_vm1, %v1881_v56  ;;  %vm3776_vm1 = vcmp.lt.s32.totalorder %v2934_v23, 15 }
 0x683   : > { %v3434_v25 = vpop.permute.xlu1 %2160  ;;  %vm3777_vm0 = vmmov %vm3776_vm1 }
 0x687   : > { %v3438_v18 = vpop.permute.xlu1 %2228 }
 0x68b   : > { %v3442_v3 = vpop.permute.xlu1 %2260 }
 0x68f   : > { %v3446_v5 = vpop.permute.xlu1 %2256 }
 0x73e   : > { %v1978_v1 = vpop.f32.mrf.mxu0 }
 0x73f   : > { %v1979_v24 = vadd.f32 %v1978_v1, %v1893_v63 }
 0x740   : > { %v1980_v55 = vpop.f32.mrf.mxu0 }
 0x741   : > { %v3359_v36 = vmul.f32 %v3356_v7, %v1979_v24  ;;  %2035 = vrot.lane.b32.xlu1 %v1979_v24, %s3734_s29  ;;  %2001 = vrot.lane.b32.xlu0 %v1979_v24, %s3771_s10  ;;  %v3367_v52 = vadd.f32 %v1980_v55, %v1893_v63 }
 0x742   : > { %v1984_v6 = vpop.f32.mrf.mxu0 }
 0x743   : > { %v3376_v21 = vadd.f32 %v1984_v6, %v1898_v59 }
 0x744   : > { %v1986_v58 = vpop.f32.mrf.mxu0 }
 0x745   : > { %2067 = vrot.lane.b32.xlu1 %v1979_v24, %s3772_s11  ;;  %2147 = vrot.lane.b32.xlu0 %v1979_v24, %s3739_s3  ;;  %v3398_v44 = vadd.f32 %v1986_v58, %v1898_v59 }
 0x749   : > { %2099 = vrot.lane.b32.xlu1 %v1979_v24, %s3737_s25  ;;  %2211 = vrot.lane.b32.xlu0 %v1979_v24, %s3773_s7 }
 0x74d   : > { %2179 = vrot.lane.b32.xlu1 %v1979_v24, %s3740_s2  ;;  %2103 = vrot.lane.b32.xlu0 %v3367_v52, %s3737_s25 }
 0x751   : > { %2005 = vrot.lane.b32.xlu1 %v3367_v52, %s3771_s10  ;;  %2183 = vrot.lane.b32.xlu0 %v3367_v52, %s3740_s2 }
 0x755   : > { %2039 = vrot.lane.b32.xlu1 %v3367_v52, %s3734_s29  ;;  %2037 = vrot.lane.b32.xlu0 %v3376_v21, %s3734_s29 }
 0x759   : > { %2071 = vrot.lane.b32.xlu1 %v3367_v52, %s3772_s11  ;;  %2069 = vrot.lane.b32.xlu0 %v3376_v21, %s3772_s11 }
 0x75d   : > { %2151 = vrot.lane.b32.xlu1 %v3367_v52, %s3739_s3  ;;  %2101 = vrot.lane.b32.xlu0 %v3376_v21, %s3737_s25 }
 0x761   : > { %2215 = vrot.lane.b32.xlu1 %v3367_v52, %s3773_s7  ;;  %2181 = vrot.lane.b32.xlu0 %v3376_v21, %s3740_s2 }
 0x765   : > { %2003 = vrot.lane.b32.xlu1 %v3376_v21, %s3771_s10  ;;  %2245 = vrot.lane.b32.xlu0 %v3376_v21, %s3741_s0 }
 0x769   : > { %2149 = vrot.lane.b32.xlu1 %v3376_v21, %s3739_s3  ;;  %2217 = vrot.lane.b32.xlu0 %v3398_v44, %s3773_s7 }
 0x76d   : > { %2213 = vrot.lane.b32.xlu1 %v3376_v21, %s3773_s7  ;;  %2243 = vrot.lane.b32.xlu0 %v1979_v24, %s3741_s0 }
 0x771   : > { %2007 = vrot.lane.b32.xlu1 %v3398_v44, %s3771_s10  ;;  %2281 = vperm.xlu0 %2522, %v1889_v61  }
 0x775   : > { %2041 = vrot.lane.b32.xlu1 %v3398_v44, %s3734_s29 }
 0x779   : > { %2073 = vrot.lane.b32.xlu1 %v3398_v44, %s3772_s11 }
 0x77d   : > { %2105 = vrot.lane.b32.xlu1 %v3398_v44, %s3737_s25 }
 0x781   : > { %2153 = vrot.lane.b32.xlu1 %v3398_v44, %s3739_s3  ;;  %s2465_s3 = sshll.u32 %s3799_s30, 3 }
 0x782   : > { %s710_s27 = scalar_lea.vmem %s3667_s23, %s2465_s3 }
 0x785   : > { %2185 = vrot.lane.b32.xlu1 %v3398_v44, %s3740_s2 }
 0x789   : > { %2249 = vrot.lane.b32.xlu1 %v3398_v44, %s3741_s0 }
 0x78d   : > { %2247 = vrot.lane.b32.xlu1 %v3367_v52, %s3741_s0 }
 0x7b3   : > { %v2036_v50 = vpop.permute.xlu1 %2035  ;;  %v2002_v31 = vpop.permute.xlu0 %2001 }
 0x7b7   : > { %v2068_v49 = vpop.permute.xlu1 %2067  ;;  %v3448_v29 = vpop.permute.xlu0 %2147 }
 0x7bb   : > { %v2100_v26 = vpop.permute.xlu1 %2099  ;;  %v3452_v27 = vpop.permute.xlu0 %2211 }
 0x7bf   : > { %v3450_v34 = vpop.permute.xlu1 %2179  ;;  %v2104_v2 = vpop.permute.xlu0 %2103 }
 0x7c0   : > { %v2107_v19 = vsel %vm3774_vm11, %v2100_v26, %v2104_v2  ;;  %v2109_v56 = vsel %vm3775_vm12, %v2104_v2, %v2100_v26  ;;  %vm3783_vm12 = vmmov %vm3774_vm11 }
 0x7c1   : > { %v2119_v61 = vmul.f32 %v2113_v32, %v2109_v56 }
 0x7c3   : > { %v2006_v4 = vpop.permute.xlu1 %2005 }
 0x7c4   : > { %v2009_v37 = vsel %vm984_vm2, %v2002_v31, %v2006_v4  ;;  %v2011_v60 = vsel %vm984_vm2, %v2006_v4, %v2002_v31 }
 0x7c5   : > { %v2023_v13 = vmul.f32 %v2016_v57, %v2011_v60  ;;  %v2024_v46 = vmul.f32 %v2016_v57, %v2009_v37  ;;  %v2120_v57 = vmul.f32 %v2113_v32, %v2107_v19  ;;  %v2184_v32 = vpop.permute.xlu0 %2183 }
 0x7c7   : > { %v2028_v53 = vsel %vm3033_vm13, %v2024_v46, 0.0  ;;  %v2040_v22 = vpop.permute.xlu1 %2039  ;;  %v2027_v48 = vsel %vm2961_vm6, %v2023_v13, 0.0  ;;  %v2123_v46 = vsel %vm2949_vm4, %v2119_v61, 0.0 }
 0x7c8   : > { %v2043_v54 = vsel %vm1025_vm5, %v2036_v50, %v2040_v22  ;;  %v2045_v14 = vsel %vm1025_vm5, %v2040_v22, %v2036_v50  ;;  %v2032_v59 = vadd.f32 %v2028_v53, %v3350_v10  ;;  %v2031_v55 = vadd.f32 %v2027_v48, %v3350_v10 }
 0x7c9   : > { %v2055_v41 = vmul.f32 %v3352_v11, %v2045_v14  ;;  %v2056_v63 = vmul.f32 %v3352_v11, %v2043_v54  ;;  %v2140_v53 = vmul.f32 %v3356_v7, %v3367_v52  ;;  %v2038_v48 = vpop.permute.xlu0 %2037 }
 0x7cb   : > { %v2059_v1 = vsel %vm2943_vm3, %v2055_v41, 0.0  ;;  %v2072_v24 = vpop.permute.xlu1 %2071  ;;  %v2064_v4 = vadd.f32 %v2056_v63, %v2032_v59 }
 0x7cc   : > { %v2075_v6 = vsel %vm3776_vm1, %v2068_v49, %v2072_v24  ;;  %v2077_v58 = vsel %vm3777_vm0, %v2072_v24, %v2068_v49  ;;  %v2063_v26 = vadd.f32 %v2059_v1, %v2031_v55  ;;  %v2124_v49 = vsel %vm3033_vm13, %v2120_v57, 0.0  ;;  %vm3778_vm1 = vmmov %vm3777_vm0 }
 0x7cd   : > { %v2087_v50 = vmul.f32 %v2081_v8, %v2077_v58  ;;  %v2088_v31 = vmul.f32 %v2081_v8, %v2075_v6  ;;  %v2070_v56 = vpop.permute.xlu0 %2069 }
 0x7cf   : > { %v2091_v11 = vsel %vm2988_vm10, %v2087_v50, 0.0  ;;  %v2092_v37 = vsel %vm3056_vm14, %v2088_v31, 0.0  ;;  %v2152_v60 = vpop.permute.xlu1 %2151 }
 0x7d0   : > { %v2095_v10 = vadd.f32 %v2091_v11, %v2063_v26  ;;  %v2096_v13 = vadd.f32 %v2092_v37, %v2064_v4 }
 0x7d1   : > { %v2102_v63 = vpop.permute.xlu0 %2101 }
 0x7d2   : > { %v2127_v2 = vadd.f32 %v2123_v46, %v2095_v10  ;;  %v2128_v8 = vadd.f32 %v2124_v49, %v2096_v13 }
 0x7d3   : > { %v3490_v22 = vpop.permute.xlu1 %2215 }
 0x7d4   : > { %v3493_v54 = vadd.f32 %v3359_v36, %v2127_v2  ;;  %v3495_v14 = vadd.f32 %v2140_v53, %v2128_v8 }
 0x7d5   : > { %v2182_v58 = vpop.permute.xlu0 %2181 }
 0x7d7   : > { %v2004_v41 = vpop.permute.xlu1 %2003 }
 0x7d9   : > { %v2246_v8 = vpop.permute.xlu0 %2245 }
 0x7db   : > { %v2150_v19 = vpop.permute.xlu1 %2149 }
 0x7df   : > { %v3497_v59 = vpop.permute.xlu1 %2213 }
 0x7e3   : > { %v2008_v1 = vpop.permute.xlu1 %2007 }
 0x7e4   : > { %v2010_v24 = vsel %vm984_vm2, %v2004_v41, %v2008_v1  ;;  %v2012_v7 = vsel %vm984_vm2, %v2008_v1, %v2004_v41  ;;  %vm3779_vm2 = vcmp.lt.s32.totalorder %v2934_v23, 113 }
 0x7e5   : > { %v2026_v52 = vmul.f32 %v3346_v17, %v2010_v24  ;;  %v2025_v36 = vmul.f32 %v3346_v17, %v2012_v7  ;;  %v2187_v39 = vsel %vm3779_vm2, %v3450_v34, %v2184_v32 }
 0x7e6   : > { %v2199_v1 = vmul.f32 %v3440_v9, %v2187_v39 }
 0x7e7   : > { %v2042_v55 = vpop.permute.xlu1 %2041  ;;  %v2030_v61 = vsel %vm3033_vm13, %v2026_v52, 0.0  ;;  %v2029_v31 = vsel %vm2961_vm6, %v2025_v36, 0.0  ;;  %vm3781_vm6 = vcmp.lt.s32.totalorder %v2934_v23, 127 }
 0x7e8   : > { %v2046_v6 = vsel %vm1025_vm5, %v2042_v55, %v2038_v48  ;;  %v2044_v57 = vsel %vm1025_vm5, %v2038_v48, %v2042_v55  ;;  %v2034_v4 = vadd.f32 %v2030_v61, %v3348_v40  ;;  %vm3780_vm5 = vmmov %vm3779_vm2  ;;  %v2033_v49 = vadd.f32 %v2029_v31, %v3348_v40  ;;  %v2218_v61 = vpop.permute.xlu0 %2217 }
 0x7e9   : > { %v2057_v50 = vmul.f32 %v3416_v38, %v2046_v6  ;;  %v2058_v17 = vmul.f32 %v3416_v38, %v2044_v57  ;;  %v2189_v38 = vsel %vm3780_vm5, %v2184_v32, %v3450_v34  ;;  %v2155_v2 = vsel %vm3781_vm6, %v3448_v29, %v2152_v60  ;;  %vm3788_vm5 = vmmov %vm3779_vm2 }
 0x7ea   : > { %v2200_v24 = vmul.f32 %v3440_v9, %v2189_v38  ;;  %v2167_v36 = vmul.f32 %v3434_v25, %v2155_v2 }
 0x7eb   : > { %v2074_v26 = vpop.permute.xlu1 %2073  ;;  %v2061_v10 = vsel %vm2943_vm3, %v2057_v50, 0.0  ;;  %vm3782_vm3 = vmmov %vm3781_vm6  ;;  %v2066_v34 = vadd.f32 %v2058_v17, %v2034_v4  ;;  %v2203_v50 = vsel %vm2949_vm4, %v2199_v1, 0.0 }
 0x7ec   : > { %v2076_v11 = vsel %vm3777_vm0, %v2070_v56, %v2074_v26  ;;  %v2078_v37 = vsel %vm3778_vm1, %v2074_v26, %v2070_v56  ;;  %v2157_v30 = vsel %vm3782_vm3, %v2152_v60, %v3448_v29  ;;  %v2065_v41 = vadd.f32 %v2061_v10, %v2033_v49  ;;  %vm3785_vm0 = vmmov %vm3782_vm3 }
 0x7ed   : > { %v2089_v13 = vmul.f32 %v3420_v20, %v2078_v37  ;;  %v2090_v46 = vmul.f32 %v3420_v20, %v2076_v11  ;;  %v2141_v56 = vmul.f32 %v3430_v62, %v3376_v21  ;;  %v2142_v29 = vmul.f32 %v3430_v62, %v3398_v44 }
 0x7ee   : > { %v2204_v4 = vsel %vm3134_vm8, %v2200_v24, 0.0 }
 0x7ef   : > { %v2093_v20 = vsel %vm2988_vm10, %v2089_v13, 0.0  ;;  %v2094_v53 = vsel %vm3056_vm14, %v2090_v46, 0.0  ;;  %v2106_v48 = vpop.permute.xlu1 %2105  ;;  %vm3784_vm10 = vmmov %vm3782_vm3  ;;  %vm3791_vm3 = vcmp.lt.s32.totalorder %v2934_v23, 111 }
 0x7f0   : > { %v2108_v40 = vsel %vm3774_vm11, %v2102_v63, %v2106_v48  ;;  %v2110_v32 = vsel %vm3783_vm12, %v2106_v48, %v2102_v63  ;;  %v2097_v7 = vadd.f32 %v2093_v20, %v2065_v41  ;;  %v2098_v52 = vadd.f32 %v2094_v53, %v2066_v34  ;;  %vm3792_vm11 = vmmov %vm3791_vm3 }
 0x7f1   : > { %v2121_v0 = vmul.f32 %v3354_v43, %v2110_v32  ;;  %v2122_v60 = vmul.f32 %v3354_v43, %v2108_v40  ;;  %v2168_v63 = vmul.f32 %v3434_v25, %v2157_v30  ;;  %vm3795_vm12 = vcmask 1046528  }
 0x7f3   : > { %v2125_v21 = vsel %vm2949_vm4, %v2121_v0, 0.0  ;;  %v2126_v44 = vsel %vm3033_vm13, %v2122_v60, 0.0  ;;  %v2154_v62 = vpop.permute.xlu1 %2153  ;;  %vm3786_vm13 = vcmp.lt.s32.totalorder %v2934_v23, 112  ;;  %v2172_v37 = vsel %vm3056_vm14, %v2168_v63, 0.0  ;;  %v2244_v60 = vpop.permute.xlu0 %2243 }
 0x7f4   : > { %v2129_v55 = vadd.f32 %v2125_v21, %v2097_v7  ;;  %v2130_v6 = vadd.f32 %v2126_v44, %v2098_v52  ;;  %v2156_v43 = vsel %vm3784_vm10, %v2150_v19, %v2154_v62  ;;  %v2158_v9 = vsel %vm3785_vm0, %v2154_v62, %v2150_v19  ;;  %vm3787_vm1 = vmmov %vm3786_vm13 }
 0x7f5   : > { %v2169_v57 = vmul.f32 %v3432_v15, %v2156_v43  ;;  %v2170_v25 = vmul.f32 %v3432_v15, %v2158_v9  ;;  %v2222_v28 = vsel %vm3786_vm13, %v2218_v61, %v3497_v59  ;;  %v2171_v19 = vsel %vm2973_vm9, %v2167_v36, 0.0  ;;  %vm3789_vm6 = vmmov %vm3787_vm1 }
 0x7f6   : > { %v2145_v31 = vadd.f32 %v2141_v56, %v2129_v55  ;;  %v2146_v26 = vadd.f32 %v2142_v29, %v2130_v6  ;;  %v2220_v10 = vsel %vm3787_vm1, %v3497_v59, %v2218_v61  ;;  %v2221_v39 = vsel %vm3789_vm6, %v3490_v22, %v3452_v27 }
 0x7f7   : > { %v2173_v17 = vsel %vm2973_vm9, %v2169_v57, 0.0  ;;  %v2174_v15 = vsel %vm3056_vm14, %v2170_v25, 0.0  ;;  %v2186_v11 = vpop.permute.xlu1 %2185  ;;  %v2234_v38 = vmul.f32 %v3438_v18, %v2222_v28  ;;  %v2175_v2 = vadd.f32 %v2171_v19, %v3493_v54  ;;  %vm3790_vm14 = vmmov %vm3787_vm1  ;;  %v2282_v35 = vpop.permute.xlu0 %2281 }
 0x7f8   : > { %v2188_v13 = vsel %vm3779_vm2, %v2182_v58, %v2186_v11  ;;  %v2190_v46 = vsel %vm3788_vm5, %v2186_v11, %v2182_v58  ;;  %v2176_v59 = vadd.f32 %v2172_v37, %v3495_v14  ;;  %v2177_v30 = vadd.f32 %v2173_v17, %v2145_v31 }
 0x7f9   : > { %v2201_v16 = vmul.f32 %v3436_v51, %v2188_v13  ;;  %v2202_v49 = vmul.f32 %v3436_v51, %v2190_v46  ;;  %v2178_v20 = vadd.f32 %v2174_v15, %v2146_v26  ;;  %v2219_v58 = vsel %vm3790_vm14, %v3452_v27, %v3490_v22 }
 0x7fa   : > { %v2233_v53 = vmul.f32 %v3438_v18, %v2220_v10  ;;  %v2232_v32 = vmul.f32 %v3444_v45, %v2221_v39  ;;  %v2238_v18 = vsel %vm3107_vm15, %v2234_v38, 0.0  ;;  %v2207_v42 = vadd.f32 %v2203_v50, %v2175_v2 }
 0x7fb   : > { %v2205_v48 = vsel %vm2949_vm4, %v2201_v16, 0.0  ;;  %v2206_v41 = vsel %vm3134_vm8, %v2202_v49, 0.0  ;;  %v2250_v51 = vpop.permute.xlu1 %2249  ;;  %v2208_v22 = vadd.f32 %v2204_v4, %v2176_v59  ;;  %v2231_v0 = vmul.f32 %v3444_v45, %v2219_v58  ;;  %vm3793_vm4 = vmmov %vm3791_vm3 }
 0x7fc   : > { %v2209_v34 = vadd.f32 %v2205_v48, %v2177_v30  ;;  %v2210_v54 = vadd.f32 %v2206_v41, %v2178_v20  ;;  %v2252_v14 = vsel %vm3791_vm3, %v2246_v8, %v2250_v51  ;;  %v2254_v40 = vsel %vm3792_vm11, %v2250_v51, %v2246_v8  ;;  %vm3794_vm8 = vmmov %vm3791_vm3 }
 0x7fd   : > { %v2265_v33 = vmul.f32 %v3442_v3, %v2252_v14  ;;  %v2266_v27 = vmul.f32 %v3442_v3, %v2254_v40  ;;  %v2236_v63 = vsel %vm3107_vm15, %v2232_v32, 0.0  ;;  %v2239_v44 = vadd.f32 %v2231_v0, %v2207_v42  ;;  %vm3796_vm15 = vmmov %vm3795_vm12 }
 0x7fe   : > { %v2241_v56 = vadd.f32 %v2233_v53, %v2209_v34  ;;  %v2242_v29 = vadd.f32 %v2238_v18, %v2210_v54  ;;  %v2240_v62 = vadd.f32 %v2236_v63, %v2208_v22  ;;  %vm3797_vm10 = vcmask 121856  }
 0x7ff   : > { %v2269_v1 = vsel %vm2973_vm9, %v2265_v33, 0.0  ;;  %v2270_v8 = vsel %vm3189_vm7, %v2266_v27, 0.0  ;;  %v2248_v24 = vpop.permute.xlu1 %2247 }
 0x800   : > { %v2273_v7 = vadd.f32 %v2269_v1, %v2241_v56  ;;  %v2274_v52 = vadd.f32 %v2270_v8, %v2242_v29  ;;  %v2251_v36 = vsel %vm3793_vm4, %v2244_v60, %v2248_v24  ;;  %v2253_v3 = vsel %vm3794_vm8, %v2248_v24, %v2244_v60 }
 0x801   : > { %v2263_v45 = vmul.f32 %v3446_v5, %v2251_v36  ;;  %v2264_v21 = vmul.f32 %v3446_v5, %v2253_v3  ;;  %v1888_v5 = vld [vmem:[%s3665_s21] sm:$0x7] }
 0x802   : > { %v2277_v55 = vmax.f32 %v2273_v7, 0.0  ;;  %v2278_v6 = vmax.f32 %v2274_v52, 0.0 }
 0x803   : > { %v2267_v43 = vsel %vm2973_vm9, %v2263_v45, 0.0  ;;  %v2268_v9 = vsel %vm3189_vm7, %v2264_v21, 0.0 }
 0x804   : > { %v2271_v23 = vadd.f32 %v2267_v43, %v2239_v44  ;;  %2459 = vmatprep.subr.msk.mxu1 %vm3795_vm12, %v2278_v6  ;;  %v2272_v12 = vadd.f32 %v2268_v9, %v2240_v62 }
 0x805   : > { %2460 = vmatpush1.msk.msra.mxu1 %vm3796_vm15, %v2277_v55 }
 0x806   : > { %v2275_v61 = vmax.f32 %v2271_v23, 0.0  ;;  %v2276_v57 = vmax.f32 %v2272_v12, 0.0 }
 0x808   : > { %2323 = vmatprep.subr.mxu1 %v2276_v57 }
 0x809   : > { %2324 = vmatpush1.msra.mxu1 %v2275_v61 }
 0x80a   : > { %2461 = vmatmul.mubr.msk.f32.vlgmr.msra.gmra.mxu1 %vm3797_vm10, %v1888_v5 }
 0x8ca   : > { %v2359_v47 = vpop.f32.mrf.mxu1 }
 0x8cb   : > { %v2360_v50 = vadd.f32 %v2359_v47, %v2282_v35 }
 0x8cc   : > { %v2361_v25 = vpop.f32.mrf.mxu1 }
 0x8cd   : > { %v2362_v28 = vadd.f32 %v2361_v25, %v2282_v35 }
 0x8cf   : > { %v2366_v31 = vcombine.low %v2360_v50, %v2362_v28 }
 0x8d1   : > { %2368 = vst [vmem:[%s710_s27] sm:$0x77] %v2366_v31 }
 0x8d2 PF: > { %s33_s4 = sadd.s32 1, %s2546_s4  }
 0x8d3   : > { %p30_p4 = scmp.ge.s32.totalorder %s33_s4, 4  }
 0x8d5   :  { %32 = sbr.rel (!%p30_p4) target bundleno = 13 (0xd), region = 142 }

</bundles_post_ra>
